<compile_context>
chip_gen: v7x
topology: tpu7x:2x2x1
jax: 0.10.0
libtpu: 0.0.40
codegen_flags: <defaults>
</compile_context>

<pallas_src>
import functools
import math

import jax
import jax.numpy as jnp
from jax.experimental import pallas as pl
from jax.experimental.pallas import tpu as pltpu

KSIZE = 5
NEG_BIG = -1e30  # pool padding value (never reaches the output)


@functools.lru_cache(maxsize=1)
def _vmem_limit_bytes():
    try:
        cap = int(getattr(pltpu.get_tpu_info(), "vmem_capacity_bytes",
                          64 * 1024 * 1024))
        return max(16 * 1024 * 1024, min(cap // 2, 64 * 1024 * 1024))
    except Exception:
        return 32 * 1024 * 1024


def _cparams(n_grid):
    return pltpu.CompilerParams(
        dimension_semantics=("parallel",) * n_grid,
        vmem_limit_bytes=_vmem_limit_bytes())


# --------------------------------------------------------------------------- #
# Weight pre-processing (wrapper-side XLA on tiny matrices, fused under jit)
# --------------------------------------------------------------------------- #
def _bn_fold(gamma, beta, mean, var, conv_bias, eps=1e-5):
    scale = gamma / jnp.sqrt(var + eps)
    shift = (conv_bias - mean) * scale + beta
    return scale, shift


def _conv_band_weights(w, w_out, pad_in, col_pad):
    """Banded block-Toeplitz matrices for a kxk 'same' conv on lane-folded rows.

    w: (Cout, Cin, k, k) torch layout.  Returns bf16 (k, (w_out+2*pad_in)*Cin,
    (w_out+2*col_pad)*Cout) with
        band[ky, (j+kx)*Cin + c, (j+col_pad)*Cout + n] = w[n, c, ky, kx].
    The conv is then   out[i, j*Cout+n] = sum_ky  x_pad_folded[i+ky, :] @ band[ky].
    """
    Cout, Cin, k, _ = w.shape
    wk = jnp.transpose(w, (2, 3, 1, 0)).astype(jnp.float32)      # (k, k, Cin, Cout)
    wp_in = w_out + 2 * pad_in
    eye = jnp.eye(w_out, dtype=jnp.float32)
    bands = []
    for ky in range(k):
        band = jnp.zeros((wp_in * Cin, w_out * Cout), jnp.float32)
        for kx in range(k):
            blk = jnp.kron(eye, wk[ky, kx])                      # (w_out*Cin, w_out*Cout)
            band = band + jnp.pad(
                blk, ((kx * Cin, (wp_in - w_out - kx) * Cin), (0, 0)))
        band = jnp.pad(band, ((0, 0), (col_pad * Cout, col_pad * Cout)))
        bands.append(band)
    return jnp.stack(bands).astype(jnp.bfloat16)


def _interp_matrix(n_in, n_out):
    """1-D linear interpolation matrix, align_corners=True, shape (n_out, n_in)."""
    if n_out == 1:
        pos = jnp.zeros((1,), jnp.float32)
    else:
        pos = jnp.arange(n_out, dtype=jnp.float32) * (n_in - 1) / (n_out - 1)
    lo = jnp.clip(jnp.floor(pos), 0, n_in - 1).astype(jnp.int32)
    hi = jnp.minimum(lo + 1, n_in - 1)
    frac = pos - lo.astype(jnp.float32)
    return ((1.0 - frac)[:, None] * jax.nn.one_hot(lo, n_in, dtype=jnp.float32)
            + frac[:, None] * jax.nn.one_hot(hi, n_in, dtype=jnp.float32))


# --------------------------------------------------------------------------- #
# Encoder stage: conv(k,'same') + folded BN + MaxPool(k, s, pad), fully fused
# --------------------------------------------------------------------------- #
def _enc_stage_kernel(x_ref, wband_ref, scale_ref, shift_ref, sh_ref, sw_ref,
                      o_ref, *, k, H, W, Cout, pk, pp):
    x = x_ref[0]                                          # (Hp, Wp*Cin) bf16
    # conv as k accumulating MXU matmuls of row bands against Toeplitz weights
    acc = jnp.dot(x[0:H, :], wband_ref[0], preferred_element_type=jnp.float32)
    for ky in range(1, k):
        acc += jnp.dot(x[ky:ky + H, :], wband_ref[ky],
                       preferred_element_type=jnp.float32)
    # BN epilogue; the pp*Cout border lane-groups are 0*scale + NEG_BIG and act as
    # the max-pool width padding.  LeakyReLU(True) == slope 1.0 == identity: skipped.
    y = acc * scale_ref[...] + shift_ref[...]             # (H, (W+2pp)*Cout)

    # width-direction dense max over pk taps (lane-offset slices of the padded row)
    mw = y[:, 0:W * Cout]
    for dx in range(1, pk):
        mw = jnp.maximum(mw, y[:, dx * Cout:(dx + W) * Cout])
    # height-direction dense max over pk taps (rows padded with NEG_BIG)
    neg = jnp.full((pp, W * Cout), NEG_BIG, jnp.float32)
    mhp = jnp.concatenate([neg, mw, neg], axis=0)         # (H+2pp, W*Cout)
    mh = mhp[0:H, :]
    for dy in range(1, pk):
        mh = jnp.maximum(mh, mhp[dy:dy + H, :])           # (H, W*Cout) dense pooled
    # stride-s subsample via one-hot selection matmuls (rows, then folded columns)
    pooled = jnp.dot(sh_ref[...], mh, preferred_element_type=jnp.float32)
    pooled = jnp.dot(pooled, sw_ref[...], preferred_element_type=jnp.float32)
    o_ref[0] = pooled.astype(o_ref.dtype)


def encoder_stage(x, w, scale, shift, stride, k=KSIZE):
    """Conv2d(k, stride=1, 'same') + folded BN + MaxPool2d(k, stride, pad) (NHWC)."""
    B, H, W, Cin = x.shape
    Cout = w.shape[0]
    pad = (k - 1) // 2                 # conv pad == pool pad in this module
    assert H % stride == 0 and W % stride == 0
    Ho, Wo = H // stride, W // stride
    Hp, Wp = H + 2 * pad, W + 2 * pad
    Wp2 = W + 2 * pad                  # pool-padded conv-output width

    xp = jnp.pad(x.astype(jnp.bfloat16), ((0, 0), (pad, pad), (pad, pad), (0, 0)))
    xf = xp.reshape(B, Hp, Wp * Cin)                       # lane-folded, bf16 once

    wband = _conv_band_weights(w, W, pad, col_pad=pad)     # (k, Wp*Cin, Wp2*Cout)
    neg = jnp.full((pad * Cout,), NEG_BIG, jnp.float32)
    scale_f = jnp.tile(scale.astype(jnp.float32), Wp2).reshape(1, Wp2 * Cout)
    shift_f = jnp.concatenate(
        [neg, jnp.tile(shift.astype(jnp.float32), W), neg]).reshape(1, Wp2 * Cout)

    sh = jax.nn.one_hot(jnp.arange(Ho) * stride, H, dtype=jnp.float32)     # (Ho, H)
    swsel = jax.nn.one_hot(jnp.arange(Wo) * stride, W, dtype=jnp.float32)  # (Wo, W)
    sw = jnp.kron(swsel.T, jnp.eye(Cout, dtype=jnp.float32))    # (W*Cout, Wo*Cout)

    out = pl.pallas_call(
        functools.partial(_enc_stage_kernel, k=k, H=H, W=W, Cout=Cout,
                          pk=k, pp=pad),
        grid=(B,),
        in_specs=[
            pl.BlockSpec((1, Hp, Wp * Cin), lambda b: (b, 0, 0)),
            pl.BlockSpec((k, Wp * Cin, Wp2 * Cout), lambda b: (0, 0, 0)),
            pl.BlockSpec((1, Wp2 * Cout), lambda b: (0, 0)),
            pl.BlockSpec((1, Wp2 * Cout), lambda b: (0, 0)),
            pl.BlockSpec((Ho, H), lambda b: (0, 0)),
            pl.BlockSpec((W * Cout, Wo * Cout), lambda b: (0, 0)),
        ],
        out_specs=pl.BlockSpec((1, Ho, Wo * Cout), lambda b: (b, 0, 0)),
        out_shape=jax.ShapeDtypeStruct((B, Ho, Wo * Cout), jnp.bfloat16),
        compiler_params=_cparams(1),
    )(xf, wband, scale_f, shift_f, sh, sw)
    return out.reshape(B, Ho, Wo, Cout)


# --------------------------------------------------------------------------- #
# Decoder stage: bilinear upsample + conv(k,'same') + folded BN (+ final 1x1+sigmoid)
# --------------------------------------------------------------------------- #
def _dec_stage_kernel(x_ref, ah_ref, aw_ref, wband_ref, scale_ref, shift_ref,
                      *rest, k, Hu, has_final):
    if has_final:
        wf_ref, bf_ref, o_ref = rest
    else:
        (o_ref,) = rest
    x = x_ref[0]                                          # (H, W*Cin) bf16
    # bilinear upsample (align_corners=True); conv 'same' zero padding is baked into
    # the interpolation matrices so u is already the padded upsampled image.
    t = jnp.dot(ah_ref[...], x, preferred_element_type=jnp.float32)   # (Hup, W*Cin)
    u = jnp.dot(t.astype(jnp.bfloat16), aw_ref[...],
                preferred_element_type=jnp.float32)                   # (Hup, Wup*Cin)
    u = u.astype(jnp.bfloat16)
    acc = jnp.dot(u[0:Hu, :], wband_ref[0], preferred_element_type=jnp.float32)
    for ky in range(1, k):
        acc += jnp.dot(u[ky:ky + Hu, :], wband_ref[ky],
                       preferred_element_type=jnp.float32)
    y = acc * scale_ref[...] + shift_ref[...]             # (Hu, Wu*Cout)
    # LeakyReLU(True) == slope 1.0 == identity: skipped.
    if has_final:
        # fused final 1x1 conv + sigmoid (block-diagonal weights on folded lanes)
        y = jnp.dot(y.astype(jnp.bfloat16), wf_ref[...],
                    preferred_element_type=jnp.float32) + bf_ref[...]
        y = jax.nn.sigmoid(y)
    o_ref[0] = y.astype(o_ref.dtype)


def decoder_stage(x, w, scale, shift, stride, k=KSIZE, final_w=None, final_b=None):
    """Upsample(x stride, bilinear, align_corners=True) + Conv2d(k,'same') + folded BN,
    optionally fused with the final 1x1 conv + sigmoid (NHWC)."""
    B, H, W, Cin = x.shape
    Cout = w.shape[0]
    pad = (k - 1) // 2
    Hu, Wu = H * stride, W * stride
    Hup, Wup = Hu + 2 * pad, Wu + 2 * pad

    ah = jnp.pad(_interp_matrix(H, Hu), ((pad, pad), (0, 0))).astype(jnp.bfloat16)
    awp = jnp.pad(_interp_matrix(W, Wu), ((pad, pad), (0, 0)))          # (Wup, W)
    aw = jnp.kron(awp.T, jnp.eye(Cin, dtype=jnp.float32)).astype(jnp.bfloat16)
    wband = _conv_band_weights(w, Wu, pad, col_pad=0)      # (k, Wup*Cin, Wu*Cout)
    scale_f = jnp.tile(scale.astype(jnp.float32), Wu).reshape(1, Wu * Cout)
    shift_f = jnp.tile(shift.astype(jnp.float32), Wu).reshape(1, Wu * Cout)

    xf = x.astype(jnp.bfloat16).reshape(B, H, W * Cin)

    has_final = final_w is not None
    operands = [xf, ah, aw, wband, scale_f, shift_f]
    in_specs = [
        pl.BlockSpec((1, H, W * Cin), lambda b: (b, 0, 0)),
        pl.BlockSpec((Hup, H), lambda b: (0, 0)),
        pl.BlockSpec((W * Cin, Wup * Cin), lambda b: (0, 0)),
        pl.BlockSpec((k, Wup * Cin, Wu * Cout), lambda b: (0, 0, 0)),
        pl.BlockSpec((1, Wu * Cout), lambda b: (0, 0)),
        pl.BlockSpec((1, Wu * Cout), lambda b: (0, 0)),
    ]
    if has_final:
        Cfin = final_w.shape[0]
        wf = jnp.kron(jnp.eye(Wu, dtype=jnp.float32),
                      final_w.reshape(Cfin, Cout).T.astype(jnp.float32)
                      ).astype(jnp.bfloat16)               # (Wu*Cout, Wu*Cfin)
        bf = jnp.tile(final_b.astype(jnp.float32), Wu).reshape(1, Wu * Cfin)
        operands += [wf, bf]
        in_specs += [pl.BlockSpec((Wu * Cout, Wu * Cfin), lambda b: (0, 0)),
                     pl.BlockSpec((1, Wu * Cfin), lambda b: (0, 0))]
        out_c, out_dtype = Cfin, jnp.float32
    else:
        out_c, out_dtype = Cout, jnp.bfloat16

    out = pl.pallas_call(
        functools.partial(_dec_stage_kernel, k=k, Hu=Hu, has_final=has_final),
        grid=(B,),
        in_specs=in_specs,
        out_specs=pl.BlockSpec((1, Hu, Wu * out_c), lambda b: (b, 0, 0)),
        out_shape=jax.ShapeDtypeStruct((B, Hu, Wu * out_c), out_dtype),
        compiler_params=_cparams(1),
    )(*operands)
    return out.reshape(B, Hu, Wu, out_c)


# --------------------------------------------------------------------------- #
# Bottleneck: lin_enc(1x1) -> NCHW flatten -> Linear -> Linear -> lin_dec(1x1)
# fused into a single pallas_call (permutations folded into the weights)
# --------------------------------------------------------------------------- #
def _bottleneck_kernel(h_ref, w1_ref, b1_ref, w2_ref, b2_ref, w3_ref, b3_ref,
                       w4_ref, b4_ref, zlat_ref, out_ref):
    h = h_ref[...]                                        # (B, HW*Cend) bf16
    z2 = jnp.dot(h, w1_ref[...], preferred_element_type=jnp.float32) + b1_ref[...]
    zlat = jnp.dot(z2.astype(jnp.bfloat16), w2_ref[...],
                   preferred_element_type=jnp.float32) + b2_ref[...]
    zlat_ref[...] = zlat
    zd = jnp.dot(zlat.astype(jnp.bfloat16), w3_ref[...],
                 preferred_element_type=jnp.float32) + b3_ref[...]
    out = jnp.dot(zd.astype(jnp.bfloat16), w4_ref[...],
                  preferred_element_type=jnp.float32) + b4_ref[...]
    out_ref[...] = out.astype(out_ref.dtype)


def bottleneck(h, p_lin_enc, p_lay_enc, p_lay_dec, p_lin_dec):
    B, Hz, Wz, Cend = h.shape
    HW = Hz * Wz
    D = p_lin_enc["w"].shape[0]                           # 64
    L = p_lay_enc["w"].shape[0]                           # 128
    assert HW * D == p_lay_enc["w"].shape[1]              # 256

    w1 = p_lin_enc["w"].reshape(D, Cend).astype(jnp.float32)
    w1blk = jnp.kron(jnp.eye(HW, dtype=jnp.float32), w1.T).astype(jnp.bfloat16)
    b1t = jnp.tile(p_lin_enc["b"].astype(jnp.float32), HW).reshape(1, HW * D)

    w2 = p_lay_enc["w"].astype(jnp.float32)               # (L, HW*D), NCHW-flat cols
    w2p = jnp.transpose(w2.T.reshape(D, HW, L), (1, 0, 2)).reshape(HW * D, L)
    w2p = w2p.astype(jnp.bfloat16)
    b2 = p_lay_enc["b"].astype(jnp.float32).reshape(1, L)

    w3 = p_lay_dec["w"].astype(jnp.float32)               # (HW*D, L), NCHW-flat rows
    w3p = jnp.transpose(w3.reshape(D, HW, L), (1, 0, 2)).reshape(HW * D, L).T
    w3p = w3p.astype(jnp.bfloat16)
    b3p = p_lay_dec["b"].astype(jnp.float32).reshape(D, HW).T.reshape(1, HW * D)

    w4 = p_lin_dec["w"].reshape(Cend, D).astype(jnp.float32)
    w4blk = jnp.kron(jnp.eye(HW, dtype=jnp.float32), w4.T).astype(jnp.bfloat16)
    b4t = jnp.tile(p_lin_dec["b"].astype(jnp.float32), HW).reshape(1, HW * Cend)

    hf = h.astype(jnp.bfloat16).reshape(B, HW * Cend)

    zlat, outf = pl.pallas_call(
        _bottleneck_kernel,
        grid=(1,),
        in_specs=[
            pl.BlockSpec((B, HW * Cend), lambda i: (0, 0)),
            pl.BlockSpec((HW * Cend, HW * D), lambda i: (0, 0)),
            pl.BlockSpec((1, HW * D), lambda i: (0, 0)),
            pl.BlockSpec((HW * D, L), lambda i: (0, 0)),
            pl.BlockSpec((1, L), lambda i: (0, 0)),
            pl.BlockSpec((L, HW * D), lambda i: (0, 0)),
            pl.BlockSpec((1, HW * D), lambda i: (0, 0)),
            pl.BlockSpec((HW * D, HW * Cend), lambda i: (0, 0)),
            pl.BlockSpec((1, HW * Cend), lambda i: (0, 0)),
        ],
        out_specs=(pl.BlockSpec((B, L), lambda i: (0, 0)),
                   pl.BlockSpec((B, HW * Cend), lambda i: (0, 0))),
        out_shape=(jax.ShapeDtypeStruct((B, L), jnp.float32),
                   jax.ShapeDtypeStruct((B, HW * Cend), jnp.bfloat16)),
        compiler_params=_cparams(1),
    )(hf, w1blk, b1t, w2p, b2, w3p, b3p, w4blk, b4t)
    return zlat, outf.reshape(B, Hz, Wz, Cend)


# --------------------------------------------------------------------------- #
# Parameter init (deterministic, matching the PyTorch module's shapes)
# --------------------------------------------------------------------------- #
def _conv_init(key, cin, cout, k):
    k1, k2 = jax.random.split(key)
    bound = 1.0 / math.sqrt(cin * k * k)
    w = jax.random.uniform(k1, (cout, cin, k, k), jnp.float32, -bound, bound)
    b = jax.random.uniform(k2, (cout,), jnp.float32, -bound, bound)
    return w, b


def _bn_init(key, c):
    k1, k2, k3, k4 = jax.random.split(key, 4)
    gamma = 1.0 + 0.1 * jax.random.normal(k1, (c,), jnp.float32)
    beta = 0.1 * jax.random.normal(k2, (c,), jnp.float32)
    mean = 0.1 * jax.random.normal(k3, (c,), jnp.float32)
    var = 1.0 + 0.5 * jax.random.uniform(k4, (c,), jnp.float32)
    return gamma, beta, mean, var


def _linear_init(key, fin, fout):
    k1, k2 = jax.random.split(key)
    bound = 1.0 / math.sqrt(fin)
    w = jax.random.uniform(k1, (fout, fin), jnp.float32, -bound, bound)
    b = jax.random.uniform(k2, (fout,), jnp.float32, -bound, bound)
    return w, b


def init_params(key, in_channels, channels, out_ch, strides, kernel_size=KSIZE):
    keys = iter(jax.random.split(key, 64))
    nk = lambda: next(keys)
    params = {}

    enc = []
    encoder_channels = list(channels) + [channels[-1]]
    lc = in_channels
    for c, _s in zip(encoder_channels, strides):
        w, b = _conv_init(nk(), lc, c, kernel_size)
        gamma, beta, mean, var = _bn_init(nk(), c)
        enc.append(dict(w=w, b=b, gamma=gamma, beta=beta, mean=mean, var=var))
        lc = c
    params["encoder"] = enc

    cl = channels[-1]
    params["lin_enc"] = dict(zip(("w", "b"), _conv_init(nk(), cl, 64, 1)))
    params["lin_lay_enc"] = dict(zip(("w", "b"), _linear_init(nk(), 256, 128)))
    params["lin_lay_dec"] = dict(zip(("w", "b"), _linear_init(nk(), 128, 256)))
    params["lin_dec"] = dict(zip(("w", "b"), _conv_init(nk(), 64, cl, 1)))

    dec = []
    decode_channel_list = list(reversed(channels)) + [channels[0]]
    lc = channels[-1]
    for c, _s in zip(decode_channel_list, strides[::-1]):
        w, b = _conv_init(nk(), lc, c, kernel_size)
        gamma, beta, mean, var = _bn_init(nk(), c)
        dec.append(dict(w=w, b=b, gamma=gamma, beta=beta, mean=mean, var=var))
        lc = c
    params["decoder"] = dec
    params["dec_final"] = dict(zip(("w", "b"), _conv_init(nk(), lc, out_ch, 1)))
    return params


# --------------------------------------------------------------------------- #
# Forward pass (mirrors DenseConvAutoEncoderBaur.forward), NHWC / lane-folded inside
# --------------------------------------------------------------------------- #
def forward(params, x_nchw, strides):
    h = jnp.transpose(x_nchw, (0, 2, 3, 1))               # NHWC, f32

    # Encoder: fused conv+BN+(identity LeakyReLU(True))+MaxPool per stage.
    for layer, s in zip(params["encoder"], strides):
        scale, shift = _bn_fold(layer["gamma"], layer["beta"], layer["mean"],
                                layer["var"], layer["b"])
        h = encoder_stage(h, layer["w"], scale, shift, s)

    # Fully fused bottleneck (lin_enc -> Linear -> Linear -> lin_dec).
    z_lat, h = bottleneck(h, params["lin_enc"], params["lin_lay_enc"],
                          params["lin_lay_dec"], params["lin_dec"])

    # Decoder: fused upsample+conv+BN per stage; last stage fuses 1x1+sigmoid.
    dec = params["decoder"]
    dec_strides = tuple(strides[::-1])
    for idx, (layer, s) in enumerate(zip(dec, dec_strides)):
        scale, shift = _bn_fold(layer["gamma"], layer["beta"], layer["mean"],
                                layer["var"], layer["b"])
        if idx == len(dec) - 1:
            h = decoder_stage(h, layer["w"], scale, shift, s,
                              final_w=params["dec_final"]["w"],
                              final_b=params["dec_final"]["b"])
        else:
            h = decoder_stage(h, layer["w"], scale, shift, s)

    return jnp.transpose(h, (0, 3, 1, 2)), {"z": z_lat}


# --------------------------------------------------------------------------- #
if __name__ == "__main__":
    # Small config: in=4 ch, channels=[8,16], strides=(2,2,2), 16x16 input
    # -> bottleneck is (B, 64, 2, 2) so Linear(256, 128) matches exactly.
    B, IN_CH, HW = 2, 4, 16
    CHANNELS = [8, 16]
    OUT_CH = 4
    STRIDES = (2, 2, 2)

    root = jax.random.PRNGKey(0)
    pkey, xkey = jax.random.split(root)
    params = init_params(pkey, IN_CH, CHANNELS, OUT_CH, STRIDES)
    x = jax.random.normal(xkey, (B, IN_CH, HW, HW), jnp.float32)

    fwd = jax.jit(forward, static_argnums=(2,))
    x_rec, aux = fwd(params, x, STRIDES)
    x_rec = jax.block_until_ready(x_rec)
    z = jax.block_until_ready(aux["z"])

    assert x_rec.shape == (B, OUT_CH, HW, HW), x_rec.shape
    assert z.shape == (B, 128), z.shape
    assert bool(jnp.all(jnp.isfinite(x_rec))) and bool(jnp.all(jnp.isfinite(z)))
    assert bool(jnp.all(x_rec >= 0.0)) and bool(jnp.all(x_rec <= 1.0))  # sigmoid range
    print("KERNEL_OK")
</pallas_src>

<mosaic_0001>
module attributes {stable_mosaic.version = 11 : i64} {
  func.func @_enc_stage_kernel(%arg0: i32, %arg1: memref<1x20x80xbf16, #tpu.memory_space<vmem>>, %arg2: memref<5x80x160xbf16, #tpu.memory_space<vmem>>, %arg3: memref<1x160xf32, #tpu.memory_space<vmem>>, %arg4: memref<1x160xf32, #tpu.memory_space<vmem>>, %arg5: memref<8x16xf32, #tpu.memory_space<vmem>>, %arg6: memref<128x64xf32, #tpu.memory_space<vmem>>, %arg7: memref<1x8x64xbf16, #tpu.memory_space<vmem>>) attributes {dimension_semantics = [#tpu.dimension_semantics<parallel>], iteration_bounds = array<i64: 2>, scalar_prefetch = 0 : i64, scratch_operands = 0 : i64, tpu.core_type = #tpu.core_type<tc>, window_params = [{transform_indices = @transform_0, window_bounds = array<i64: 1, 20, 80>}, {pipeline_mode = #tpu.pipeline_mode<synchronous>, transform_indices = @transform_1, window_bounds = array<i64: 5, 80, 160>}, {pipeline_mode = #tpu.pipeline_mode<synchronous>, transform_indices = @transform_2, window_bounds = array<i64: 1, 160>}, {pipeline_mode = #tpu.pipeline_mode<synchronous>, transform_indices = @transform_3, window_bounds = array<i64: 1, 160>}, {pipeline_mode = #tpu.pipeline_mode<synchronous>, transform_indices = @transform_4, window_bounds = array<i64: 8, 16>}, {pipeline_mode = #tpu.pipeline_mode<synchronous>, transform_indices = @transform_5, window_bounds = array<i64: 128, 64>}, {transform_indices = @transform_6, window_bounds = array<i64: 1, 8, 64>}]} {
    %c0 = arith.constant 0 : index
    %c0_0 = arith.constant 0 : index
    %c0_1 = arith.constant 0 : index
    %0 = vector.load %arg1[%c0, %c0_0, %c0_1] : memref<1x20x80xbf16, #tpu.memory_space<vmem>>, vector<1x20x80xbf16>
    %1 = vector.shape_cast %0 : vector<1x20x80xbf16> to vector<20x80xbf16>
    %2 = vector.extract_strided_slice %1 {offsets = [0, 0], sizes = [16, 80], strides = [1, 1]} : vector<20x80xbf16> to vector<16x80xbf16>
    %c0_2 = arith.constant 0 : index
    %c0_3 = arith.constant 0 : index
    %c0_4 = arith.constant 0 : index
    %3 = vector.load %arg2[%c0_2, %c0_3, %c0_4] : memref<5x80x160xbf16, #tpu.memory_space<vmem>>, vector<1x80x160xbf16>
    %4 = vector.shape_cast %3 : vector<1x80x160xbf16> to vector<80x160xbf16>
    %cst = arith.constant dense<0.000000e+00> : vector<16x160xf32>
    %5 = tpu.matmul %2, %4, %cst {dimension_numbers = #tpu.dot_dimension_numbers<[1], [0], [0], [1], [0, 0, 1, 1], [], []>} : vector<16x80xbf16>, vector<80x160xbf16>, vector<16x160xf32> -> vector<16x160xf32>
    %6 = vector.extract_strided_slice %1 {offsets = [1, 0], sizes = [16, 80], strides = [1, 1]} : vector<20x80xbf16> to vector<16x80xbf16>
    %c1 = arith.constant 1 : index
    %c0_5 = arith.constant 0 : index
    %c0_6 = arith.constant 0 : index
    %7 = vector.load %arg2[%c1, %c0_5, %c0_6] : memref<5x80x160xbf16, #tpu.memory_space<vmem>>, vector<1x80x160xbf16>
    %8 = vector.shape_cast %7 : vector<1x80x160xbf16> to vector<80x160xbf16>
    %cst_7 = arith.constant dense<0.000000e+00> : vector<16x160xf32>
    %9 = tpu.matmul %6, %8, %cst_7 {dimension_numbers = #tpu.dot_dimension_numbers<[1], [0], [0], [1], [0, 0, 1, 1], [], []>} : vector<16x80xbf16>, vector<80x160xbf16>, vector<16x160xf32> -> vector<16x160xf32>
    %10 = arith.addf %5, %9 : vector<16x160xf32>
    %11 = vector.extract_strided_slice %1 {offsets = [2, 0], sizes = [16, 80], strides = [1, 1]} : vector<20x80xbf16> to vector<16x80xbf16>
    %c2 = arith.constant 2 : index
    %c0_8 = arith.constant 0 : index
    %c0_9 = arith.constant 0 : index
    %12 = vector.load %arg2[%c2, %c0_8, %c0_9] : memref<5x80x160xbf16, #tpu.memory_space<vmem>>, vector<1x80x160xbf16>
    %13 = vector.shape_cast %12 : vector<1x80x160xbf16> to vector<80x160xbf16>
    %cst_10 = arith.constant dense<0.000000e+00> : vector<16x160xf32>
    %14 = tpu.matmul %11, %13, %cst_10 {dimension_numbers = #tpu.dot_dimension_numbers<[1], [0], [0], [1], [0, 0, 1, 1], [], []>} : vector<16x80xbf16>, vector<80x160xbf16>, vector<16x160xf32> -> vector<16x160xf32>
    %15 = arith.addf %10, %14 : vector<16x160xf32>
    %16 = vector.extract_strided_slice %1 {offsets = [3, 0], sizes = [16, 80], strides = [1, 1]} : vector<20x80xbf16> to vector<16x80xbf16>
    %c3 = arith.constant 3 : index
    %c0_11 = arith.constant 0 : index
    %c0_12 = arith.constant 0 : index
    %17 = vector.load %arg2[%c3, %c0_11, %c0_12] : memref<5x80x160xbf16, #tpu.memory_space<vmem>>, vector<1x80x160xbf16>
    %18 = vector.shape_cast %17 : vector<1x80x160xbf16> to vector<80x160xbf16>
    %cst_13 = arith.constant dense<0.000000e+00> : vector<16x160xf32>
    %19 = tpu.matmul %16, %18, %cst_13 {dimension_numbers = #tpu.dot_dimension_numbers<[1], [0], [0], [1], [0, 0, 1, 1], [], []>} : vector<16x80xbf16>, vector<80x160xbf16>, vector<16x160xf32> -> vector<16x160xf32>
    %20 = arith.addf %15, %19 : vector<16x160xf32>
    %21 = vector.extract_strided_slice %1 {offsets = [4, 0], sizes = [16, 80], strides = [1, 1]} : vector<20x80xbf16> to vector<16x80xbf16>
    %c4 = arith.constant 4 : index
    %c0_14 = arith.constant 0 : index
    %c0_15 = arith.constant 0 : index
    %22 = vector.load %arg2[%c4, %c0_14, %c0_15] : memref<5x80x160xbf16, #tpu.memory_space<vmem>>, vector<1x80x160xbf16>
    %23 = vector.shape_cast %22 : vector<1x80x160xbf16> to vector<80x160xbf16>
    %cst_16 = arith.constant dense<0.000000e+00> : vector<16x160xf32>
    %24 = tpu.matmul %21, %23, %cst_16 {dimension_numbers = #tpu.dot_dimension_numbers<[1], [0], [0], [1], [0, 0, 1, 1], [], []>} : vector<16x80xbf16>, vector<80x160xbf16>, vector<16x160xf32> -> vector<16x160xf32>
    %25 = arith.addf %20, %24 : vector<16x160xf32>
    %c0_17 = arith.constant 0 : index
    %c0_18 = arith.constant 0 : index
    %26 = vector.load %arg3[%c0_17, %c0_18] : memref<1x160xf32, #tpu.memory_space<vmem>>, vector<1x160xf32>
    %27 = vector.broadcast %26 : vector<1x160xf32> to vector<16x160xf32>
    %28 = arith.mulf %25, %27 : vector<16x160xf32>
    %c0_19 = arith.constant 0 : index
    %c0_20 = arith.constant 0 : index
    %29 = vector.load %arg4[%c0_19, %c0_20] : memref<1x160xf32, #tpu.memory_space<vmem>>, vector<1x160xf32>
    %30 = vector.broadcast %29 : vector<1x160xf32> to vector<16x160xf32>
    %31 = arith.addf %28, %30 : vector<16x160xf32>
    %32 = vector.extract_strided_slice %31 {offsets = [0, 0], sizes = [16, 128], strides = [1, 1]} : vector<16x160xf32> to vector<16x128xf32>
    %33 = vector.extract_strided_slice %31 {offsets = [0, 8], sizes = [16, 128], strides = [1, 1]} : vector<16x160xf32> to vector<16x128xf32>
    %34 = arith.maximumf %32, %33 : vector<16x128xf32>
    %35 = vector.extract_strided_slice %31 {offsets = [0, 16], sizes = [16, 128], strides = [1, 1]} : vector<16x160xf32> to vector<16x128xf32>
    %36 = arith.maximumf %34, %35 : vector<16x128xf32>
    %37 = vector.extract_strided_slice %31 {offsets = [0, 24], sizes = [16, 128], strides = [1, 1]} : vector<16x160xf32> to vector<16x128xf32>
    %38 = arith.maximumf %36, %37 : vector<16x128xf32>
    %39 = vector.extract_strided_slice %31 {offsets = [0, 32], sizes = [16, 128], strides = [1, 1]} : vector<16x160xf32> to vector<16x128xf32>
    %40 = arith.maximumf %38, %39 : vector<16x128xf32>
    %cst_21 = arith.constant -1.000000e+30 : f32
    %41 = vector.broadcast %cst_21 : f32 to vector<2x128xf32>
    %42 = tpu.concatenate %41, %40, %41 in 0 : vector<2x128xf32>, vector<16x128xf32>, vector<2x128xf32> -> vector<20x128xf32>
    %43 = vector.extract_strided_slice %42 {offsets = [0, 0], sizes = [16, 128], strides = [1, 1]} : vector<20x128xf32> to vector<16x128xf32>
    %44 = vector.extract_strided_slice %42 {offsets = [1, 0], sizes = [16, 128], strides = [1, 1]} : vector<20x128xf32> to vector<16x128xf32>
    %45 = arith.maximumf %43, %44 : vector<16x128xf32>
    %46 = vector.extract_strided_slice %42 {offsets = [2, 0], sizes = [16, 128], strides = [1, 1]} : vector<20x128xf32> to vector<16x128xf32>
    %47 = arith.maximumf %45, %46 : vector<16x128xf32>
    %48 = vector.extract_strided_slice %42 {offsets = [3, 0], sizes = [16, 128], strides = [1, 1]} : vector<20x128xf32> to vector<16x128xf32>
    %49 = arith.maximumf %47, %48 : vector<16x128xf32>
    %50 = vector.extract_strided_slice %42 {offsets = [4, 0], sizes = [16, 128], strides = [1, 1]} : vector<20x128xf32> to vector<16x128xf32>
    %51 = arith.maximumf %49, %50 : vector<16x128xf32>
    %c0_22 = arith.constant 0 : index
    %c0_23 = arith.constant 0 : index
    %52 = vector.load %arg5[%c0_22, %c0_23] : memref<8x16xf32, #tpu.memory_space<vmem>>, vector<8x16xf32>
    %cst_24 = arith.constant dense<0.000000e+00> : vector<8x128xf32>
    %53 = tpu.matmul %52, %51, %cst_24 {dimension_numbers = #tpu.dot_dimension_numbers<[1], [0], [0], [1], [0, 0, 1, 1], [], []>} : vector<8x16xf32>, vector<16x128xf32>, vector<8x128xf32> -> vector<8x128xf32>
    %c0_25 = arith.constant 0 : index
    %c0_26 = arith.constant 0 : index
    %54 = vector.load %arg6[%c0_25, %c0_26] : memref<128x64xf32, #tpu.memory_space<vmem>>, vector<128x64xf32>
    %cst_27 = arith.constant dense<0.000000e+00> : vector<8x64xf32>
    %55 = tpu.matmul %53, %54, %cst_27 {dimension_numbers = #tpu.dot_dimension_numbers<[1], [0], [0], [1], [0, 0, 1, 1], [], []>} : vector<8x128xf32>, vector<128x64xf32>, vector<8x64xf32> -> vector<8x64xf32>
    %56 = arith.truncf %55 : vector<8x64xf32> to vector<8x64xbf16>
    %c0_28 = arith.constant 0 : index
    %c0_29 = arith.constant 0 : index
    %c0_30 = arith.constant 0 : index
    %57 = vector.load %arg7[%c0_28, %c0_29, %c0_30] : memref<1x8x64xbf16, #tpu.memory_space<vmem>>, vector<1x8x64xbf16>
    %58 = vector.shape_cast %57 : vector<1x8x64xbf16> to vector<8x64xbf16>
    %59 = vector.shape_cast %56 : vector<8x64xbf16> to vector<1x8x64xbf16>
    tpu.vector_store %arg7[%c0_28, %c0_29, %c0_30], %59 {strides = array<i32>} : memref<1x8x64xbf16, #tpu.memory_space<vmem>>, vector<1x8x64xbf16>,
    return
  }
  func.func @transform_0(%arg0: i32) -> (i32, i32, i32) {
    %c0_i32 = arith.constant 0 : i32
    %c0_i32_0 = arith.constant 0 : i32
    %c0_i32_1 = arith.constant 0 : i32
    return %arg0, %c0_i32, %c0_i32_0 : i32, i32, i32
  }
  func.func @transform_1(%arg0: i32) -> (i32, i32, i32) {
    %c0_i32 = arith.constant 0 : i32
    %c0_i32_0 = arith.constant 0 : i32
    %c0_i32_1 = arith.constant 0 : i32
    %c0_i32_2 = arith.constant 0 : i32
    return %c0_i32, %c0_i32_0, %c0_i32_1 : i32, i32, i32
  }
  func.func @transform_2(%arg0: i32) -> (i32, i32) {
    %c0_i32 = arith.constant 0 : i32
    %c0_i32_0 = arith.constant 0 : i32
    %c0_i32_1 = arith.constant 0 : i32
    return %c0_i32, %c0_i32_0 : i32, i32
  }
  func.func @transform_3(%arg0: i32) -> (i32, i32) {
    %c0_i32 = arith.constant 0 : i32
    %c0_i32_0 = arith.constant 0 : i32
    %c0_i32_1 = arith.constant 0 : i32
    return %c0_i32, %c0_i32_0 : i32, i32
  }
  func.func @transform_4(%arg0: i32) -> (i32, i32) {
    %c0_i32 = arith.constant 0 : i32
    %c0_i32_0 = arith.constant 0 : i32
    %c0_i32_1 = arith.constant 0 : i32
    return %c0_i32, %c0_i32_0 : i32, i32
  }
  func.func @transform_5(%arg0: i32) -> (i32, i32) {
    %c0_i32 = arith.constant 0 : i32
    %c0_i32_0 = arith.constant 0 : i32
    %c0_i32_1 = arith.constant 0 : i32
    return %c0_i32, %c0_i32_0 : i32, i32
  }
  func.func @transform_6(%arg0: i32) -> (i32, i32, i32) {
    %c0_i32 = arith.constant 0 : i32
    %c0_i32_0 = arith.constant 0 : i32
    %c0_i32_1 = arith.constant 0 : i32
    return %arg0, %c0_i32, %c0_i32_0 : i32, i32, i32
  }
}

module attributes {stable_mosaic.version = 11 : i64} {
  func.func @_enc_stage_kernel(%arg0: i32, %arg1: memref<1x12x96xbf16, #tpu.memory_space<vmem>>, %arg2: memref<5x96x192xbf16, #tpu.memory_space<vmem>>, %arg3: memref<1x192xf32, #tpu.memory_space<vmem>>, %arg4: memref<1x192xf32, #tpu.memory_space<vmem>>, %arg5: memref<4x8xf32, #tpu.memory_space<vmem>>, %arg6: memref<128x64xf32, #tpu.memory_space<vmem>>, %arg7: memref<1x4x64xbf16, #tpu.memory_space<vmem>>) attributes {dimension_semantics = [#tpu.dimension_semantics<parallel>], iteration_bounds = array<i64: 2>, scalar_prefetch = 0 : i64, scratch_operands = 0 : i64, tpu.core_type = #tpu.core_type<tc>, window_params = [{transform_indices = @transform_0, window_bounds = array<i64: 1, 12, 96>}, {pipeline_mode = #tpu.pipeline_mode<synchronous>, transform_indices = @transform_1, window_bounds = array<i64: 5, 96, 192>}, {pipeline_mode = #tpu.pipeline_mode<synchronous>, transform_indices = @transform_2, window_bounds = array<i64: 1, 192>}, {pipeline_mode = #tpu.pipeline_mode<synchronous>, transform_indices = @transform_3, window_bounds = array<i64: 1, 192>}, {pipeline_mode = #tpu.pipeline_mode<synchronous>, transform_indices = @transform_4, window_bounds = array<i64: 4, 8>}, {pipeline_mode = #tpu.pipeline_mode<synchronous>, transform_indices = @transform_5, window_bounds = array<i64: 128, 64>}, {transform_indices = @transform_6, window_bounds = array<i64: 1, 4, 64>}]} {
    %c0 = arith.constant 0 : index
    %c0_0 = arith.constant 0 : index
    %c0_1 = arith.constant 0 : index
    %0 = vector.load %arg1[%c0, %c0_0, %c0_1] : memref<1x12x96xbf16, #tpu.memory_space<vmem>>, vector<1x12x96xbf16>
    %1 = vector.shape_cast %0 : vector<1x12x96xbf16> to vector<12x96xbf16>
    %2 = vector.extract_strided_slice %1 {offsets = [0, 0], sizes = [8, 96], strides = [1, 1]} : vector<12x96xbf16> to vector<8x96xbf16>
    %c0_2 = arith.constant 0 : index
    %c0_3 = arith.constant 0 : index
    %c0_4 = arith.constant 0 : index
    %3 = vector.load %arg2[%c0_2, %c0_3, %c0_4] : memref<5x96x192xbf16, #tpu.memory_space<vmem>>, vector<1x96x192xbf16>
    %4 = vector.shape_cast %3 : vector<1x96x192xbf16> to vector<96x192xbf16>
    %cst = arith.constant dense<0.000000e+00> : vector<8x192xf32>
    %5 = tpu.matmul %2, %4, %cst {dimension_numbers = #tpu.dot_dimension_numbers<[1], [0], [0], [1], [0, 0, 1, 1], [], []>} : vector<8x96xbf16>, vector<96x192xbf16>, vector<8x192xf32> -> vector<8x192xf32>
    %6 = vector.extract_strided_slice %1 {offsets = [1, 0], sizes = [8, 96], strides = [1, 1]} : vector<12x96xbf16> to vector<8x96xbf16>
    %c1 = arith.constant 1 : index
    %c0_5 = arith.constant 0 : index
    %c0_6 = arith.constant 0 : index
    %7 = vector.load %arg2[%c1, %c0_5, %c0_6] : memref<5x96x192xbf16, #tpu.memory_space<vmem>>, vector<1x96x192xbf16>
    %8 = vector.shape_cast %7 : vector<1x96x192xbf16> to vector<96x192xbf16>
    %cst_7 = arith.constant dense<0.000000e+00> : vector<8x192xf32>
    %9 = tpu.matmul %6, %8, %cst_7 {dimension_numbers = #tpu.dot_dimension_numbers<[1], [0], [0], [1], [0, 0, 1, 1], [], []>} : vector<8x96xbf16>, vector<96x192xbf16>, vector<8x192xf32> -> vector<8x192xf32>
    %10 = arith.addf %5, %9 : vector<8x192xf32>
    %11 = vector.extract_strided_slice %1 {offsets = [2, 0], sizes = [8, 96], strides = [1, 1]} : vector<12x96xbf16> to vector<8x96xbf16>
    %c2 = arith.constant 2 : index
    %c0_8 = arith.constant 0 : index
    %c0_9 = arith.constant 0 : index
    %12 = vector.load %arg2[%c2, %c0_8, %c0_9] : memref<5x96x192xbf16, #tpu.memory_space<vmem>>, vector<1x96x192xbf16>
    %13 = vector.shape_cast %12 : vector<1x96x192xbf16> to vector<96x192xbf16>
    %cst_10 = arith.constant dense<0.000000e+00> : vector<8x192xf32>
    %14 = tpu.matmul %11, %13, %cst_10 {dimension_numbers = #tpu.dot_dimension_numbers<[1], [0], [0], [1], [0, 0, 1, 1], [], []>} : vector<8x96xbf16>, vector<96x192xbf16>, vector<8x192xf32> -> vector<8x192xf32>
    %15 = arith.addf %10, %14 : vector<8x192xf32>
    %16 = vector.extract_strided_slice %1 {offsets = [3, 0], sizes = [8, 96], strides = [1, 1]} : vector<12x96xbf16> to vector<8x96xbf16>
    %c3 = arith.constant 3 : index
    %c0_11 = arith.constant 0 : index
    %c0_12 = arith.constant 0 : index
    %17 = vector.load %arg2[%c3, %c0_11, %c0_12] : memref<5x96x192xbf16, #tpu.memory_space<vmem>>, vector<1x96x192xbf16>
    %18 = vector.shape_cast %17 : vector<1x96x192xbf16> to vector<96x192xbf16>
    %cst_13 = arith.constant dense<0.000000e+00> : vector<8x192xf32>
    %19 = tpu.matmul %16, %18, %cst_13 {dimension_numbers = #tpu.dot_dimension_numbers<[1], [0], [0], [1], [0, 0, 1, 1], [], []>} : vector<8x96xbf16>, vector<96x192xbf16>, vector<8x192xf32> -> vector<8x192xf32>
    %20 = arith.addf %15, %19 : vector<8x192xf32>
    %21 = vector.extract_strided_slice %1 {offsets = [4, 0], sizes = [8, 96], strides = [1, 1]} : vector<12x96xbf16> to vector<8x96xbf16>
    %c4 = arith.constant 4 : index
    %c0_14 = arith.constant 0 : index
    %c0_15 = arith.constant 0 : index
    %22 = vector.load %arg2[%c4, %c0_14, %c0_15] : memref<5x96x192xbf16, #tpu.memory_space<vmem>>, vector<1x96x192xbf16>
    %23 = vector.shape_cast %22 : vector<1x96x192xbf16> to vector<96x192xbf16>
    %cst_16 = arith.constant dense<0.000000e+00> : vector<8x192xf32>
    %24 = tpu.matmul %21, %23, %cst_16 {dimension_numbers = #tpu.dot_dimension_numbers<[1], [0], [0], [1], [0, 0, 1, 1], [], []>} : vector<8x96xbf16>, vector<96x192xbf16>, vector<8x192xf32> -> vector<8x192xf32>
    %25 = arith.addf %20, %24 : vector<8x192xf32>
    %c0_17 = arith.constant 0 : index
    %c0_18 = arith.constant 0 : index
    %26 = vector.load %arg3[%c0_17, %c0_18] : memref<1x192xf32, #tpu.memory_space<vmem>>, vector<1x192xf32>
    %27 = vector.broadcast %26 : vector<1x192xf32> to vector<8x192xf32>
    %28 = arith.mulf %25, %27 : vector<8x192xf32>
    %c0_19 = arith.constant 0 : index
    %c0_20 = arith.constant 0 : index
    %29 = vector.load %arg4[%c0_19, %c0_20] : memref<1x192xf32, #tpu.memory_space<vmem>>, vector<1x192xf32>
    %30 = vector.broadcast %29 : vector<1x192xf32> to vector<8x192xf32>
    %31 = arith.addf %28, %30 : vector<8x192xf32>
    %32 = vector.extract_strided_slice %31 {offsets = [0, 0], sizes = [8, 128], strides = [1, 1]} : vector<8x192xf32> to vector<8x128xf32>
    %33 = vector.extract_strided_slice %31 {offsets = [0, 16], sizes = [8, 128], strides = [1, 1]} : vector<8x192xf32> to vector<8x128xf32>
    %34 = arith.maximumf %32, %33 : vector<8x128xf32>
    %35 = vector.extract_strided_slice %31 {offsets = [0, 32], sizes = [8, 128], strides = [1, 1]} : vector<8x192xf32> to vector<8x128xf32>
    %36 = arith.maximumf %34, %35 : vector<8x128xf32>
    %37 = vector.extract_strided_slice %31 {offsets = [0, 48], sizes = [8, 128], strides = [1, 1]} : vector<8x192xf32> to vector<8x128xf32>
    %38 = arith.maximumf %36, %37 : vector<8x128xf32>
    %39 = vector.extract_strided_slice %31 {offsets = [0, 64], sizes = [8, 128], strides = [1, 1]} : vector<8x192xf32> to vector<8x128xf32>
    %40 = arith.maximumf %38, %39 : vector<8x128xf32>
    %cst_21 = arith.constant -1.000000e+30 : f32
    %41 = vector.broadcast %cst_21 : f32 to vector<2x128xf32>
    %42 = tpu.concatenate %41, %40, %41 in 0 : vector<2x128xf32>, vector<8x128xf32>, vector<2x128xf32> -> vector<12x128xf32>
    %43 = vector.extract_strided_slice %42 {offsets = [0, 0], sizes = [8, 128], strides = [1, 1]} : vector<12x128xf32> to vector<8x128xf32>
    %44 = vector.extract_strided_slice %42 {offsets = [1, 0], sizes = [8, 128], strides = [1, 1]} : vector<12x128xf32> to vector<8x128xf32>
    %45 = arith.maximumf %43, %44 : vector<8x128xf32>
    %46 = vector.extract_strided_slice %42 {offsets = [2, 0], sizes = [8, 128], strides = [1, 1]} : vector<12x128xf32> to vector<8x128xf32>
    %47 = arith.maximumf %45, %46 : vector<8x128xf32>
    %48 = vector.extract_strided_slice %42 {offsets = [3, 0], sizes = [8, 128], strides = [1, 1]} : vector<12x128xf32> to vector<8x128xf32>
    %49 = arith.maximumf %47, %48 : vector<8x128xf32>
    %50 = vector.extract_strided_slice %42 {offsets = [4, 0], sizes = [8, 128], strides = [1, 1]} : vector<12x128xf32> to vector<8x128xf32>
    %51 = arith.maximumf %49, %50 : vector<8x128xf32>
    %c0_22 = arith.constant 0 : index
    %c0_23 = arith.constant 0 : index
    %52 = vector.load %arg5[%c0_22, %c0_23] : memref<4x8xf32, #tpu.memory_space<vmem>>, vector<4x8xf32>
    %cst_24 = arith.constant dense<0.000000e+00> : vector<4x128xf32>
    %53 = tpu.matmul %52, %51, %cst_24 {dimension_numbers = #tpu.dot_dimension_numbers<[1], [0], [0], [1], [0, 0, 1, 1], [], []>} : vector<4x8xf32>, vector<8x128xf32>, vector<4x128xf32> -> vector<4x128xf32>
    %c0_25 = arith.constant 0 : index
    %c0_26 = arith.constant 0 : index
    %54 = vector.load %arg6[%c0_25, %c0_26] : memref<128x64xf32, #tpu.memory_space<vmem>>, vector<128x64xf32>
    %cst_27 = arith.constant dense<0.000000e+00> : vector<4x64xf32>
    %55 = tpu.matmul %53, %54, %cst_27 {dimension_numbers = #tpu.dot_dimension_numbers<[1], [0], [0], [1], [0, 0, 1, 1], [], []>} : vector<4x128xf32>, vector<128x64xf32>, vector<4x64xf32> -> vector<4x64xf32>
    %56 = arith.truncf %55 : vector<4x64xf32> to vector<4x64xbf16>
    %c0_28 = arith.constant 0 : index
    %c0_29 = arith.constant 0 : index
    %c0_30 = arith.constant 0 : index
    %57 = vector.load %arg7[%c0_28, %c0_29, %c0_30] : memref<1x4x64xbf16, #tpu.memory_space<vmem>>, vector<1x4x64xbf16>
    %58 = vector.shape_cast %57 : vector<1x4x64xbf16> to vector<4x64xbf16>
    %59 = vector.shape_cast %56 : vector<4x64xbf16> to vector<1x4x64xbf16>
    tpu.vector_store %arg7[%c0_28, %c0_29, %c0_30], %59 {strides = array<i32>} : memref<1x4x64xbf16, #tpu.memory_space<vmem>>, vector<1x4x64xbf16>,
    return
  }
  func.func @transform_0(%arg0: i32) -> (i32, i32, i32) {
    %c0_i32 = arith.constant 0 : i32
    %c0_i32_0 = arith.constant 0 : i32
    %c0_i32_1 = arith.constant 0 : i32
    return %arg0, %c0_i32, %c0_i32_0 : i32, i32, i32
  }
  func.func @transform_1(%arg0: i32) -> (i32, i32, i32) {
    %c0_i32 = arith.constant 0 : i32
    %c0_i32_0 = arith.constant 0 : i32
    %c0_i32_1 = arith.constant 0 : i32
    %c0_i32_2 = arith.constant 0 : i32
    return %c0_i32, %c0_i32_0, %c0_i32_1 : i32, i32, i32
  }
  func.func @transform_2(%arg0: i32) -> (i32, i32) {
    %c0_i32 = arith.constant 0 : i32
    %c0_i32_0 = arith.constant 0 : i32
    %c0_i32_1 = arith.constant 0 : i32
    return %c0_i32, %c0_i32_0 : i32, i32
  }
  func.func @transform_3(%arg0: i32) -> (i32, i32) {
    %c0_i32 = arith.constant 0 : i32
    %c0_i32_0 = arith.constant 0 : i32
    %c0_i32_1 = arith.constant 0 : i32
    return %c0_i32, %c0_i32_0 : i32, i32
  }
  func.func @transform_4(%arg0: i32) -> (i32, i32) {
    %c0_i32 = arith.constant 0 : i32
    %c0_i32_0 = arith.constant 0 : i32
    %c0_i32_1 = arith.constant 0 : i32
    return %c0_i32, %c0_i32_0 : i32, i32
  }
  func.func @transform_5(%arg0: i32) -> (i32, i32) {
    %c0_i32 = arith.constant 0 : i32
    %c0_i32_0 = arith.constant 0 : i32
    %c0_i32_1 = arith.constant 0 : i32
    return %c0_i32, %c0_i32_0 : i32, i32
  }
  func.func @transform_6(%arg0: i32) -> (i32, i32, i32) {
    %c0_i32 = arith.constant 0 : i32
    %c0_i32_0 = arith.constant 0 : i32
    %c0_i32_1 = arith.constant 0 : i32
    return %arg0, %c0_i32, %c0_i32_0 : i32, i32, i32
  }
}

module attributes {stable_mosaic.version = 11 : i64} {
  func.func @_enc_stage_kernel(%arg0: i32, %arg1: memref<1x8x128xbf16, #tpu.memory_space<vmem>>, %arg2: memref<5x128x128xbf16, #tpu.memory_space<vmem>>, %arg3: memref<1x128xf32, #tpu.memory_space<vmem>>, %arg4: memref<1x128xf32, #tpu.memory_space<vmem>>, %arg5: memref<2x4xf32, #tpu.memory_space<vmem>>, %arg6: memref<64x32xf32, #tpu.memory_space<vmem>>, %arg7: memref<1x2x32xbf16, #tpu.memory_space<vmem>>) attributes {dimension_semantics = [#tpu.dimension_semantics<parallel>], iteration_bounds = array<i64: 2>, scalar_prefetch = 0 : i64, scratch_operands = 0 : i64, tpu.core_type = #tpu.core_type<tc>, window_params = [{transform_indices = @transform_0, window_bounds = array<i64: 1, 8, 128>}, {pipeline_mode = #tpu.pipeline_mode<synchronous>, transform_indices = @transform_1, window_bounds = array<i64: 5, 128, 128>}, {pipeline_mode = #tpu.pipeline_mode<synchronous>, transform_indices = @transform_2, window_bounds = array<i64: 1, 128>}, {pipeline_mode = #tpu.pipeline_mode<synchronous>, transform_indices = @transform_3, window_bounds = array<i64: 1, 128>}, {pipeline_mode = #tpu.pipeline_mode<synchronous>, transform_indices = @transform_4, window_bounds = array<i64: 2, 4>}, {pipeline_mode = #tpu.pipeline_mode<synchronous>, transform_indices = @transform_5, window_bounds = array<i64: 64, 32>}, {transform_indices = @transform_6, window_bounds = array<i64: 1, 2, 32>}]} {
    %c0 = arith.constant 0 : index
    %c0_0 = arith.constant 0 : index
    %c0_1 = arith.constant 0 : index
    %0 = vector.load %arg1[%c0, %c0_0, %c0_1] : memref<1x8x128xbf16, #tpu.memory_space<vmem>>, vector<1x8x128xbf16>
    %1 = vector.shape_cast %0 : vector<1x8x128xbf16> to vector<8x128xbf16>
    %2 = vector.extract_strided_slice %1 {offsets = [0, 0], sizes = [4, 128], strides = [1, 1]} : vector<8x128xbf16> to vector<4x128xbf16>
    %c0_2 = arith.constant 0 : index
    %c0_3 = arith.constant 0 : index
    %c0_4 = arith.constant 0 : index
    %3 = vector.load %arg2[%c0_2, %c0_3, %c0_4] : memref<5x128x128xbf16, #tpu.memory_space<vmem>>, vector<1x128x128xbf16>
    %4 = vector.shape_cast %3 : vector<1x128x128xbf16> to vector<128x128xbf16>
    %cst = arith.constant dense<0.000000e+00> : vector<4x128xf32>
    %5 = tpu.matmul %2, %4, %cst {dimension_numbers = #tpu.dot_dimension_numbers<[1], [0], [0], [1], [0, 0, 1, 1], [], []>} : vector<4x128xbf16>, vector<128x128xbf16>, vector<4x128xf32> -> vector<4x128xf32>
    %6 = vector.extract_strided_slice %1 {offsets = [1, 0], sizes = [4, 128], strides = [1, 1]} : vector<8x128xbf16> to vector<4x128xbf16>
    %c1 = arith.constant 1 : index
    %c0_5 = arith.constant 0 : index
    %c0_6 = arith.constant 0 : index
    %7 = vector.load %arg2[%c1, %c0_5, %c0_6] : memref<5x128x128xbf16, #tpu.memory_space<vmem>>, vector<1x128x128xbf16>
    %8 = vector.shape_cast %7 : vector<1x128x128xbf16> to vector<128x128xbf16>
    %cst_7 = arith.constant dense<0.000000e+00> : vector<4x128xf32>
    %9 = tpu.matmul %6, %8, %cst_7 {dimension_numbers = #tpu.dot_dimension_numbers<[1], [0], [0], [1], [0, 0, 1, 1], [], []>} : vector<4x128xbf16>, vector<128x128xbf16>, vector<4x128xf32> -> vector<4x128xf32>
    %10 = arith.addf %5, %9 : vector<4x128xf32>
    %11 = vector.extract_strided_slice %1 {offsets = [2, 0], sizes = [4, 128], strides = [1, 1]} : vector<8x128xbf16> to vector<4x128xbf16>
    %c2 = arith.constant 2 : index
    %c0_8 = arith.constant 0 : index
    %c0_9 = arith.constant 0 : index
    %12 = vector.load %arg2[%c2, %c0_8, %c0_9] : memref<5x128x128xbf16, #tpu.memory_space<vmem>>, vector<1x128x128xbf16>
    %13 = vector.shape_cast %12 : vector<1x128x128xbf16> to vector<128x128xbf16>
    %cst_10 = arith.constant dense<0.000000e+00> : vector<4x128xf32>
    %14 = tpu.matmul %11, %13, %cst_10 {dimension_numbers = #tpu.dot_dimension_numbers<[1], [0], [0], [1], [0, 0, 1, 1], [], []>} : vector<4x128xbf16>, vector<128x128xbf16>, vector<4x128xf32> -> vector<4x128xf32>
    %15 = arith.addf %10, %14 : vector<4x128xf32>
    %16 = vector.extract_strided_slice %1 {offsets = [3, 0], sizes = [4, 128], strides = [1, 1]} : vector<8x128xbf16> to vector<4x128xbf16>
    %c3 = arith.constant 3 : index
    %c0_11 = arith.constant 0 : index
    %c0_12 = arith.constant 0 : index
    %17 = vector.load %arg2[%c3, %c0_11, %c0_12] : memref<5x128x128xbf16, #tpu.memory_space<vmem>>, vector<1x128x128xbf16>
    %18 = vector.shape_cast %17 : vector<1x128x128xbf16> to vector<128x128xbf16>
    %cst_13 = arith.constant dense<0.000000e+00> : vector<4x128xf32>
    %19 = tpu.matmul %16, %18, %cst_13 {dimension_numbers = #tpu.dot_dimension_numbers<[1], [0], [0], [1], [0, 0, 1, 1], [], []>} : vector<4x128xbf16>, vector<128x128xbf16>, vector<4x128xf32> -> vector<4x128xf32>
    %20 = arith.addf %15, %19 : vector<4x128xf32>
    %21 = vector.extract_strided_slice %1 {offsets = [4, 0], sizes = [4, 128], strides = [1, 1]} : vector<8x128xbf16> to vector<4x128xbf16>
    %c4 = arith.constant 4 : index
    %c0_14 = arith.constant 0 : index
    %c0_15 = arith.constant 0 : index
    %22 = vector.load %arg2[%c4, %c0_14, %c0_15] : memref<5x128x128xbf16, #tpu.memory_space<vmem>>, vector<1x128x128xbf16>
    %23 = vector.shape_cast %22 : vector<1x128x128xbf16> to vector<128x128xbf16>
    %cst_16 = arith.constant dense<0.000000e+00> : vector<4x128xf32>
    %24 = tpu.matmul %21, %23, %cst_16 {dimension_numbers = #tpu.dot_dimension_numbers<[1], [0], [0], [1], [0, 0, 1, 1], [], []>} : vector<4x128xbf16>, vector<128x128xbf16>, vector<4x128xf32> -> vector<4x128xf32>
    %25 = arith.addf %20, %24 : vector<4x128xf32>
    %c0_17 = arith.constant 0 : index
    %c0_18 = arith.constant 0 : index
    %26 = vector.load %arg3[%c0_17, %c0_18] : memref<1x128xf32, #tpu.memory_space<vmem>>, vector<1x128xf32>
    %27 = vector.broadcast %26 : vector<1x128xf32> to vector<4x128xf32>
    %28 = arith.mulf %25, %27 : vector<4x128xf32>
    %c0_19 = arith.constant 0 : index
    %c0_20 = arith.constant 0 : index
    %29 = vector.load %arg4[%c0_19, %c0_20] : memref<1x128xf32, #tpu.memory_space<vmem>>, vector<1x128xf32>
    %30 = vector.broadcast %29 : vector<1x128xf32> to vector<4x128xf32>
    %31 = arith.addf %28, %30 : vector<4x128xf32>
    %32 = vector.extract_strided_slice %31 {offsets = [0, 0], sizes = [4, 64], strides = [1, 1]} : vector<4x128xf32> to vector<4x64xf32>
    %33 = vector.extract_strided_slice %31 {offsets = [0, 16], sizes = [4, 64], strides = [1, 1]} : vector<4x128xf32> to vector<4x64xf32>
    %34 = arith.maximumf %32, %33 : vector<4x64xf32>
    %35 = vector.extract_strided_slice %31 {offsets = [0, 32], sizes = [4, 64], strides = [1, 1]} : vector<4x128xf32> to vector<4x64xf32>
    %36 = arith.maximumf %34, %35 : vector<4x64xf32>
    %37 = vector.extract_strided_slice %31 {offsets = [0, 48], sizes = [4, 64], strides = [1, 1]} : vector<4x128xf32> to vector<4x64xf32>
    %38 = arith.maximumf %36, %37 : vector<4x64xf32>
    %39 = vector.extract_strided_slice %31 {offsets = [0, 64], sizes = [4, 64], strides = [1, 1]} : vector<4x128xf32> to vector<4x64xf32>
    %40 = arith.maximumf %38, %39 : vector<4x64xf32>
    %cst_21 = arith.constant -1.000000e+30 : f32
    %41 = vector.broadcast %cst_21 : f32 to vector<2x64xf32>
    %42 = tpu.concatenate %41, %40, %41 in 0 : vector<2x64xf32>, vector<4x64xf32>, vector<2x64xf32> -> vector<8x64xf32>
    %43 = vector.extract_strided_slice %42 {offsets = [0, 0], sizes = [4, 64], strides = [1, 1]} : vector<8x64xf32> to vector<4x64xf32>
    %44 = vector.extract_strided_slice %42 {offsets = [1, 0], sizes = [4, 64], strides = [1, 1]} : vector<8x64xf32> to vector<4x64xf32>
    %45 = arith.maximumf %43, %44 : vector<4x64xf32>
    %46 = vector.extract_strided_slice %42 {offsets = [2, 0], sizes = [4, 64], strides = [1, 1]} : vector<8x64xf32> to vector<4x64xf32>
    %47 = arith.maximumf %45, %46 : vector<4x64xf32>
    %48 = vector.extract_strided_slice %42 {offsets = [3, 0], sizes = [4, 64], strides = [1, 1]} : vector<8x64xf32> to vector<4x64xf32>
    %49 = arith.maximumf %47, %48 : vector<4x64xf32>
    %50 = vector.extract_strided_slice %42 {offsets = [4, 0], sizes = [4, 64], strides = [1, 1]} : vector<8x64xf32> to vector<4x64xf32>
    %51 = arith.maximumf %49, %50 : vector<4x64xf32>
    %c0_22 = arith.constant 0 : index
    %c0_23 = arith.constant 0 : index
    %52 = vector.load %arg5[%c0_22, %c0_23] : memref<2x4xf32, #tpu.memory_space<vmem>>, vector<2x4xf32>
    %cst_24 = arith.constant dense<0.000000e+00> : vector<2x64xf32>
    %53 = tpu.matmul %52, %51, %cst_24 {dimension_numbers = #tpu.dot_dimension_numbers<[1], [0], [0], [1], [0, 0, 1, 1], [], []>} : vector<2x4xf32>, vector<4x64xf32>, vector<2x64xf32> -> vector<2x64xf32>
    %c0_25 = arith.constant 0 : index
    %c0_26 = arith.constant 0 : index
    %54 = vector.load %arg6[%c0_25, %c0_26] : memref<64x32xf32, #tpu.memory_space<vmem>>, vector<64x32xf32>
    %cst_27 = arith.constant dense<0.000000e+00> : vector<2x32xf32>
    %55 = tpu.matmul %53, %54, %cst_27 {dimension_numbers = #tpu.dot_dimension_numbers<[1], [0], [0], [1], [0, 0, 1, 1], [], []>} : vector<2x64xf32>, vector<64x32xf32>, vector<2x32xf32> -> vector<2x32xf32>
    %56 = arith.truncf %55 : vector<2x32xf32> to vector<2x32xbf16>
    %c0_28 = arith.constant 0 : index
    %c0_29 = arith.constant 0 : index
    %c0_30 = arith.constant 0 : index
    %57 = vector.load %arg7[%c0_28, %c0_29, %c0_30] : memref<1x2x32xbf16, #tpu.memory_space<vmem>>, vector<1x2x32xbf16>
    %58 = vector.shape_cast %57 : vector<1x2x32xbf16> to vector<2x32xbf16>
    %59 = vector.shape_cast %56 : vector<2x32xbf16> to vector<1x2x32xbf16>
    tpu.vector_store %arg7[%c0_28, %c0_29, %c0_30], %59 {strides = array<i32>} : memref<1x2x32xbf16, #tpu.memory_space<vmem>>, vector<1x2x32xbf16>,
    return
  }
  func.func @transform_0(%arg0: i32) -> (i32, i32, i32) {
    %c0_i32 = arith.constant 0 : i32
    %c0_i32_0 = arith.constant 0 : i32
    %c0_i32_1 = arith.constant 0 : i32
    return %arg0, %c0_i32, %c0_i32_0 : i32, i32, i32
  }
  func.func @transform_1(%arg0: i32) -> (i32, i32, i32) {
    %c0_i32 = arith.constant 0 : i32
    %c0_i32_0 = arith.constant 0 : i32
    %c0_i32_1 = arith.constant 0 : i32
    %c0_i32_2 = arith.constant 0 : i32
    return %c0_i32, %c0_i32_0, %c0_i32_1 : i32, i32, i32
  }
  func.func @transform_2(%arg0: i32) -> (i32, i32) {
    %c0_i32 = arith.constant 0 : i32
    %c0_i32_0 = arith.constant 0 : i32
    %c0_i32_1 = arith.constant 0 : i32
    return %c0_i32, %c0_i32_0 : i32, i32
  }
  func.func @transform_3(%arg0: i32) -> (i32, i32) {
    %c0_i32 = arith.constant 0 : i32
    %c0_i32_0 = arith.constant 0 : i32
    %c0_i32_1 = arith.constant 0 : i32
    return %c0_i32, %c0_i32_0 : i32, i32
  }
  func.func @transform_4(%arg0: i32) -> (i32, i32) {
    %c0_i32 = arith.constant 0 : i32
    %c0_i32_0 = arith.constant 0 : i32
    %c0_i32_1 = arith.constant 0 : i32
    return %c0_i32, %c0_i32_0 : i32, i32
  }
  func.func @transform_5(%arg0: i32) -> (i32, i32) {
    %c0_i32 = arith.constant 0 : i32
    %c0_i32_0 = arith.constant 0 : i32
    %c0_i32_1 = arith.constant 0 : i32
    return %c0_i32, %c0_i32_0 : i32, i32
  }
  func.func @transform_6(%arg0: i32) -> (i32, i32, i32) {
    %c0_i32 = arith.constant 0 : i32
    %c0_i32_0 = arith.constant 0 : i32
    %c0_i32_1 = arith.constant 0 : i32
    return %arg0, %c0_i32, %c0_i32_0 : i32, i32, i32
  }
}

module attributes {stable_mosaic.version = 11 : i64} {
  func.func @_bottleneck_kernel(%arg0: i32, %arg1: memref<2x64xbf16, #tpu.memory_space<vmem>>, %arg2: memref<64x256xbf16, #tpu.memory_space<vmem>>, %arg3: memref<1x256xf32, #tpu.memory_space<vmem>>, %arg4: memref<256x128xbf16, #tpu.memory_space<vmem>>, %arg5: memref<1x128xf32, #tpu.memory_space<vmem>>, %arg6: memref<128x256xbf16, #tpu.memory_space<vmem>>, %arg7: memref<1x256xf32, #tpu.memory_space<vmem>>, %arg8: memref<256x64xbf16, #tpu.memory_space<vmem>>, %arg9: memref<1x64xf32, #tpu.memory_space<vmem>>, %arg10: memref<2x128xf32, #tpu.memory_space<vmem>>, %arg11: memref<2x64xbf16, #tpu.memory_space<vmem>>) attributes {dimension_semantics = [#tpu.dimension_semantics<parallel>], iteration_bounds = array<i64: 1>, scalar_prefetch = 0 : i64, scratch_operands = 0 : i64, tpu.core_type = #tpu.core_type<tc>, window_params = [{pipeline_mode = #tpu.pipeline_mode<synchronous>, transform_indices = @transform_0, window_bounds = array<i64: 2, 64>}, {pipeline_mode = #tpu.pipeline_mode<synchronous>, transform_indices = @transform_1, window_bounds = array<i64: 64, 256>}, {pipeline_mode = #tpu.pipeline_mode<synchronous>, transform_indices = @transform_2, window_bounds = array<i64: 1, 256>}, {pipeline_mode = #tpu.pipeline_mode<synchronous>, transform_indices = @transform_3, window_bounds = array<i64: 256, 128>}, {pipeline_mode = #tpu.pipeline_mode<synchronous>, transform_indices = @transform_4, window_bounds = array<i64: 1, 128>}, {pipeline_mode = #tpu.pipeline_mode<synchronous>, transform_indices = @transform_5, window_bounds = array<i64: 128, 256>}, {pipeline_mode = #tpu.pipeline_mode<synchronous>, transform_indices = @transform_6, window_bounds = array<i64: 1, 256>}, {pipeline_mode = #tpu.pipeline_mode<synchronous>, transform_indices = @transform_7, window_bounds = array<i64: 256, 64>}, {pipeline_mode = #tpu.pipeline_mode<synchronous>, transform_indices = @transform_8, window_bounds = array<i64: 1, 64>}, {pipeline_mode = #tpu.pipeline_mode<synchronous>, transform_indices = @transform_9, window_bounds = array<i64: 2, 128>}, {pipeline_mode = #tpu.pipeline_mode<synchronous>, transform_indices = @transform_10, window_bounds = array<i64: 2, 64>}]} {
    %c0 = arith.constant 0 : index
    %c0_0 = arith.constant 0 : index
    %0 = vector.load %arg1[%c0, %c0_0] : memref<2x64xbf16, #tpu.memory_space<vmem>>, vector<2x64xbf16>
    %c0_1 = arith.constant 0 : index
    %c0_2 = arith.constant 0 : index
    %1 = vector.load %arg2[%c0_1, %c0_2] : memref<64x256xbf16, #tpu.memory_space<vmem>>, vector<64x256xbf16>
    %cst = arith.constant dense<0.000000e+00> : vector<2x256xf32>
    %2 = tpu.matmul %0, %1, %cst {dimension_numbers = #tpu.dot_dimension_numbers<[1], [0], [0], [1], [0, 0, 1, 1], [], []>} : vector<2x64xbf16>, vector<64x256xbf16>, vector<2x256xf32> -> vector<2x256xf32>
    %c0_3 = arith.constant 0 : index
    %c0_4 = arith.constant 0 : index
    %3 = vector.load %arg3[%c0_3, %c0_4] : memref<1x256xf32, #tpu.memory_space<vmem>>, vector<1x256xf32>
    %4 = vector.broadcast %3 : vector<1x256xf32> to vector<2x256xf32>
    %5 = arith.addf %2, %4 : vector<2x256xf32>
    %6 = arith.truncf %5 : vector<2x256xf32> to vector<2x256xbf16>
    %c0_5 = arith.constant 0 : index
    %c0_6 = arith.constant 0 : index
    %7 = vector.load %arg4[%c0_5, %c0_6] : memref<256x128xbf16, #tpu.memory_space<vmem>>, vector<256x128xbf16>
    %cst_7 = arith.constant dense<0.000000e+00> : vector<2x128xf32>
    %8 = tpu.matmul %6, %7, %cst_7 {dimension_numbers = #tpu.dot_dimension_numbers<[1], [0], [0], [1], [0, 0, 1, 1], [], []>} : vector<2x256xbf16>, vector<256x128xbf16>, vector<2x128xf32> -> vector<2x128xf32>
    %c0_8 = arith.constant 0 : index
    %c0_9 = arith.constant 0 : index
    %9 = vector.load %arg5[%c0_8, %c0_9] : memref<1x128xf32, #tpu.memory_space<vmem>>, vector<1x128xf32>
    %10 = vector.broadcast %9 : vector<1x128xf32> to vector<2x128xf32>
    %11 = arith.addf %8, %10 : vector<2x128xf32>
    %c0_10 = arith.constant 0 : index
    %c0_11 = arith.constant 0 : index
    %12 = vector.load %arg10[%c0_10, %c0_11] : memref<2x128xf32, #tpu.memory_space<vmem>>, vector<2x128xf32>
    tpu.vector_store %arg10[%c0_10, %c0_11], %11 {strides = array<i32>} : memref<2x128xf32, #tpu.memory_space<vmem>>, vector<2x128xf32>,
    %13 = arith.truncf %11 : vector<2x128xf32> to vector<2x128xbf16>
    %c0_12 = arith.constant 0 : index
    %c0_13 = arith.constant 0 : index
    %14 = vector.load %arg6[%c0_12, %c0_13] : memref<128x256xbf16, #tpu.memory_space<vmem>>, vector<128x256xbf16>
    %cst_14 = arith.constant dense<0.000000e+00> : vector<2x256xf32>
    %15 = tpu.matmul %13, %14, %cst_14 {dimension_numbers = #tpu.dot_dimension_numbers<[1], [0], [0], [1], [0, 0, 1, 1], [], []>} : vector<2x128xbf16>, vector<128x256xbf16>, vector<2x256xf32> -> vector<2x256xf32>
    %c0_15 = arith.constant 0 : index
    %c0_16 = arith.constant 0 : index
    %16 = vector.load %arg7[%c0_15, %c0_16] : memref<1x256xf32, #tpu.memory_space<vmem>>, vector<1x256xf32>
    %17 = vector.broadcast %16 : vector<1x256xf32> to vector<2x256xf32>
    %18 = arith.addf %15, %17 : vector<2x256xf32>
    %19 = arith.truncf %18 : vector<2x256xf32> to vector<2x256xbf16>
    %c0_17 = arith.constant 0 : index
    %c0_18 = arith.constant 0 : index
    %20 = vector.load %arg8[%c0_17, %c0_18] : memref<256x64xbf16, #tpu.memory_space<vmem>>, vector<256x64xbf16>
    %cst_19 = arith.constant dense<0.000000e+00> : vector<2x64xf32>
    %21 = tpu.matmul %19, %20, %cst_19 {dimension_numbers = #tpu.dot_dimension_numbers<[1], [0], [0], [1], [0, 0, 1, 1], [], []>} : vector<2x256xbf16>, vector<256x64xbf16>, vector<2x64xf32> -> vector<2x64xf32>
    %c0_20 = arith.constant 0 : index
    %c0_21 = arith.constant 0 : index
    %22 = vector.load %arg9[%c0_20, %c0_21] : memref<1x64xf32, #tpu.memory_space<vmem>>, vector<1x64xf32>
    %23 = vector.broadcast %22 : vector<1x64xf32> to vector<2x64xf32>
    %24 = arith.addf %21, %23 : vector<2x64xf32>
    %25 = arith.truncf %24 : vector<2x64xf32> to vector<2x64xbf16>
    %c0_22 = arith.constant 0 : index
    %c0_23 = arith.constant 0 : index
    %26 = vector.load %arg11[%c0_22, %c0_23] : memref<2x64xbf16, #tpu.memory_space<vmem>>, vector<2x64xbf16>
    tpu.vector_store %arg11[%c0_22, %c0_23], %25 {strides = array<i32>} : memref<2x64xbf16, #tpu.memory_space<vmem>>, vector<2x64xbf16>,
    return
  }
  func.func @transform_0(%arg0: i32) -> (i32, i32) {
    %c0_i32 = arith.constant 0 : i32
    %c0_i32_0 = arith.constant 0 : i32
    %c0_i32_1 = arith.constant 0 : i32
    return %c0_i32, %c0_i32_0 : i32, i32
  }
  func.func @transform_1(%arg0: i32) -> (i32, i32) {
    %c0_i32 = arith.constant 0 : i32
    %c0_i32_0 = arith.constant 0 : i32
    %c0_i32_1 = arith.constant 0 : i32
    return %c0_i32, %c0_i32_0 : i32, i32
  }
  func.func @transform_2(%arg0: i32) -> (i32, i32) {
    %c0_i32 = arith.constant 0 : i32
    %c0_i32_0 = arith.constant 0 : i32
    %c0_i32_1 = arith.constant 0 : i32
    return %c0_i32, %c0_i32_0 : i32, i32
  }
  func.func @transform_3(%arg0: i32) -> (i32, i32) {
    %c0_i32 = arith.constant 0 : i32
    %c0_i32_0 = arith.constant 0 : i32
    %c0_i32_1 = arith.constant 0 : i32
    return %c0_i32, %c0_i32_0 : i32, i32
  }
  func.func @transform_4(%arg0: i32) -> (i32, i32) {
    %c0_i32 = arith.constant 0 : i32
    %c0_i32_0 = arith.constant 0 : i32
    %c0_i32_1 = arith.constant 0 : i32
    return %c0_i32, %c0_i32_0 : i32, i32
  }
  func.func @transform_5(%arg0: i32) -> (i32, i32) {
    %c0_i32 = arith.constant 0 : i32
    %c0_i32_0 = arith.constant 0 : i32
    %c0_i32_1 = arith.constant 0 : i32
    return %c0_i32, %c0_i32_0 : i32, i32
  }
  func.func @transform_6(%arg0: i32) -> (i32, i32) {
    %c0_i32 = arith.constant 0 : i32
    %c0_i32_0 = arith.constant 0 : i32
    %c0_i32_1 = arith.constant 0 : i32
    return %c0_i32, %c0_i32_0 : i32, i32
  }
  func.func @transform_7(%arg0: i32) -> (i32, i32) {
    %c0_i32 = arith.constant 0 : i32
    %c0_i32_0 = arith.constant 0 : i32
    %c0_i32_1 = arith.constant 0 : i32
    return %c0_i32, %c0_i32_0 : i32, i32
  }
  func.func @transform_8(%arg0: i32) -> (i32, i32) {
    %c0_i32 = arith.constant 0 : i32
    %c0_i32_0 = arith.constant 0 : i32
    %c0_i32_1 = arith.constant 0 : i32
    return %c0_i32, %c0_i32_0 : i32, i32
  }
  func.func @transform_9(%arg0: i32) -> (i32, i32) {
    %c0_i32 = arith.constant 0 : i32
    %c0_i32_0 = arith.constant 0 : i32
    %c0_i32_1 = arith.constant 0 : i32
    return %c0_i32, %c0_i32_0 : i32, i32
  }
  func.func @transform_10(%arg0: i32) -> (i32, i32) {
    %c0_i32 = arith.constant 0 : i32
    %c0_i32_0 = arith.constant 0 : i32
    %c0_i32_1 = arith.constant 0 : i32
    return %c0_i32, %c0_i32_0 : i32, i32
  }
}

module attributes {stable_mosaic.version = 11 : i64} {
  func.func @_dec_stage_kernel(%arg0: i32, %arg1: memref<1x2x32xbf16, #tpu.memory_space<vmem>>, %arg2: memref<8x2xbf16, #tpu.memory_space<vmem>>, %arg3: memref<32x128xbf16, #tpu.memory_space<vmem>>, %arg4: memref<5x128x64xbf16, #tpu.memory_space<vmem>>, %arg5: memref<1x64xf32, #tpu.memory_space<vmem>>, %arg6: memref<1x64xf32, #tpu.memory_space<vmem>>, %arg7: memref<1x4x64xbf16, #tpu.memory_space<vmem>>) attributes {dimension_semantics = [#tpu.dimension_semantics<parallel>], iteration_bounds = array<i64: 2>, scalar_prefetch = 0 : i64, scratch_operands = 0 : i64, tpu.core_type = #tpu.core_type<tc>, window_params = [{transform_indices = @transform_0, window_bounds = array<i64: 1, 2, 32>}, {pipeline_mode = #tpu.pipeline_mode<synchronous>, transform_indices = @transform_1, window_bounds = array<i64: 8, 2>}, {pipeline_mode = #tpu.pipeline_mode<synchronous>, transform_indices = @transform_2, window_bounds = array<i64: 32, 128>}, {pipeline_mode = #tpu.pipeline_mode<synchronous>, transform_indices = @transform_3, window_bounds = array<i64: 5, 128, 64>}, {pipeline_mode = #tpu.pipeline_mode<synchronous>, transform_indices = @transform_4, window_bounds = array<i64: 1, 64>}, {pipeline_mode = #tpu.pipeline_mode<synchronous>, transform_indices = @transform_5, window_bounds = array<i64: 1, 64>}, {transform_indices = @transform_6, window_bounds = array<i64: 1, 4, 64>}]} {
    %c0 = arith.constant 0 : index
    %c0_0 = arith.constant 0 : index
    %c0_1 = arith.constant 0 : index
    %0 = vector.load %arg1[%c0, %c0_0, %c0_1] : memref<1x2x32xbf16, #tpu.memory_space<vmem>>, vector<1x2x32xbf16>
    %1 = vector.shape_cast %0 : vector<1x2x32xbf16> to vector<2x32xbf16>
    %c0_2 = arith.constant 0 : index
    %c0_3 = arith.constant 0 : index
    %2 = vector.load %arg2[%c0_2, %c0_3] : memref<8x2xbf16, #tpu.memory_space<vmem>>, vector<8x2xbf16>
    %cst = arith.constant dense<0.000000e+00> : vector<8x32xf32>
    %3 = tpu.matmul %2, %1, %cst {dimension_numbers = #tpu.dot_dimension_numbers<[1], [0], [0], [1], [0, 0, 1, 1], [], []>} : vector<8x2xbf16>, vector<2x32xbf16>, vector<8x32xf32> -> vector<8x32xf32>
    %4 = arith.truncf %3 : vector<8x32xf32> to vector<8x32xbf16>
    %c0_4 = arith.constant 0 : index
    %c0_5 = arith.constant 0 : index
    %5 = vector.load %arg3[%c0_4, %c0_5] : memref<32x128xbf16, #tpu.memory_space<vmem>>, vector<32x128xbf16>
    %cst_6 = arith.constant dense<0.000000e+00> : vector<8x128xf32>
    %6 = tpu.matmul %4, %5, %cst_6 {dimension_numbers = #tpu.dot_dimension_numbers<[1], [0], [0], [1], [0, 0, 1, 1], [], []>} : vector<8x32xbf16>, vector<32x128xbf16>, vector<8x128xf32> -> vector<8x128xf32>
    %7 = arith.truncf %6 : vector<8x128xf32> to vector<8x128xbf16>
    %8 = vector.extract_strided_slice %7 {offsets = [0, 0], sizes = [4, 128], strides = [1, 1]} : vector<8x128xbf16> to vector<4x128xbf16>
    %c0_7 = arith.constant 0 : index
    %c0_8 = arith.constant 0 : index
    %c0_9 = arith.constant 0 : index
    %9 = vector.load %arg4[%c0_7, %c0_8, %c0_9] : memref<5x128x64xbf16, #tpu.memory_space<vmem>>, vector<1x128x64xbf16>
    %10 = vector.shape_cast %9 : vector<1x128x64xbf16> to vector<128x64xbf16>
    %cst_10 = arith.constant dense<0.000000e+00> : vector<4x64xf32>
    %11 = tpu.matmul %8, %10, %cst_10 {dimension_numbers = #tpu.dot_dimension_numbers<[1], [0], [0], [1], [0, 0, 1, 1], [], []>} : vector<4x128xbf16>, vector<128x64xbf16>, vector<4x64xf32> -> vector<4x64xf32>
    %12 = vector.extract_strided_slice %7 {offsets = [1, 0], sizes = [4, 128], strides = [1, 1]} : vector<8x128xbf16> to vector<4x128xbf16>
    %c1 = arith.constant 1 : index
    %c0_11 = arith.constant 0 : index
    %c0_12 = arith.constant 0 : index
    %13 = vector.load %arg4[%c1, %c0_11, %c0_12] : memref<5x128x64xbf16, #tpu.memory_space<vmem>>, vector<1x128x64xbf16>
    %14 = vector.shape_cast %13 : vector<1x128x64xbf16> to vector<128x64xbf16>
    %cst_13 = arith.constant dense<0.000000e+00> : vector<4x64xf32>
    %15 = tpu.matmul %12, %14, %cst_13 {dimension_numbers = #tpu.dot_dimension_numbers<[1], [0], [0], [1], [0, 0, 1, 1], [], []>} : vector<4x128xbf16>, vector<128x64xbf16>, vector<4x64xf32> -> vector<4x64xf32>
    %16 = arith.addf %11, %15 : vector<4x64xf32>
    %17 = vector.extract_strided_slice %7 {offsets = [2, 0], sizes = [4, 128], strides = [1, 1]} : vector<8x128xbf16> to vector<4x128xbf16>
    %c2 = arith.constant 2 : index
    %c0_14 = arith.constant 0 : index
    %c0_15 = arith.constant 0 : index
    %18 = vector.load %arg4[%c2, %c0_14, %c0_15] : memref<5x128x64xbf16, #tpu.memory_space<vmem>>, vector<1x128x64xbf16>
    %19 = vector.shape_cast %18 : vector<1x128x64xbf16> to vector<128x64xbf16>
    %cst_16 = arith.constant dense<0.000000e+00> : vector<4x64xf32>
    %20 = tpu.matmul %17, %19, %cst_16 {dimension_numbers = #tpu.dot_dimension_numbers<[1], [0], [0], [1], [0, 0, 1, 1], [], []>} : vector<4x128xbf16>, vector<128x64xbf16>, vector<4x64xf32> -> vector<4x64xf32>
    %21 = arith.addf %16, %20 : vector<4x64xf32>
    %22 = vector.extract_strided_slice %7 {offsets = [3, 0], sizes = [4, 128], strides = [1, 1]} : vector<8x128xbf16> to vector<4x128xbf16>
    %c3 = arith.constant 3 : index
    %c0_17 = arith.constant 0 : index
    %c0_18 = arith.constant 0 : index
    %23 = vector.load %arg4[%c3, %c0_17, %c0_18] : memref<5x128x64xbf16, #tpu.memory_space<vmem>>, vector<1x128x64xbf16>
    %24 = vector.shape_cast %23 : vector<1x128x64xbf16> to vector<128x64xbf16>
    %cst_19 = arith.constant dense<0.000000e+00> : vector<4x64xf32>
    %25 = tpu.matmul %22, %24, %cst_19 {dimension_numbers = #tpu.dot_dimension_numbers<[1], [0], [0], [1], [0, 0, 1, 1], [], []>} : vector<4x128xbf16>, vector<128x64xbf16>, vector<4x64xf32> -> vector<4x64xf32>
    %26 = arith.addf %21, %25 : vector<4x64xf32>
    %27 = vector.extract_strided_slice %7 {offsets = [4, 0], sizes = [4, 128], strides = [1, 1]} : vector<8x128xbf16> to vector<4x128xbf16>
    %c4 = arith.constant 4 : index
    %c0_20 = arith.constant 0 : index
    %c0_21 = arith.constant 0 : index
    %28 = vector.load %arg4[%c4, %c0_20, %c0_21] : memref<5x128x64xbf16, #tpu.memory_space<vmem>>, vector<1x128x64xbf16>
    %29 = vector.shape_cast %28 : vector<1x128x64xbf16> to vector<128x64xbf16>
    %cst_22 = arith.constant dense<0.000000e+00> : vector<4x64xf32>
    %30 = tpu.matmul %27, %29, %cst_22 {dimension_numbers = #tpu.dot_dimension_numbers<[1], [0], [0], [1], [0, 0, 1, 1], [], []>} : vector<4x128xbf16>, vector<128x64xbf16>, vector<4x64xf32> -> vector<4x64xf32>
    %31 = arith.addf %26, %30 : vector<4x64xf32>
    %c0_23 = arith.constant 0 : index
    %c0_24 = arith.constant 0 : index
    %32 = vector.load %arg5[%c0_23, %c0_24] : memref<1x64xf32, #tpu.memory_space<vmem>>, vector<1x64xf32>
    %33 = vector.broadcast %32 : vector<1x64xf32> to vector<4x64xf32>
    %34 = arith.mulf %31, %33 : vector<4x64xf32>
    %c0_25 = arith.constant 0 : index
    %c0_26 = arith.constant 0 : index
    %35 = vector.load %arg6[%c0_25, %c0_26] : memref<1x64xf32, #tpu.memory_space<vmem>>, vector<1x64xf32>
    %36 = vector.broadcast %35 : vector<1x64xf32> to vector<4x64xf32>
    %37 = arith.addf %34, %36 : vector<4x64xf32>
    %38 = arith.truncf %37 : vector<4x64xf32> to vector<4x64xbf16>
    %c0_27 = arith.constant 0 : index
    %c0_28 = arith.constant 0 : index
    %c0_29 = arith.constant 0 : index
    %39 = vector.load %arg7[%c0_27, %c0_28, %c0_29] : memref<1x4x64xbf16, #tpu.memory_space<vmem>>, vector<1x4x64xbf16>
    %40 = vector.shape_cast %39 : vector<1x4x64xbf16> to vector<4x64xbf16>
    %41 = vector.shape_cast %38 : vector<4x64xbf16> to vector<1x4x64xbf16>
    tpu.vector_store %arg7[%c0_27, %c0_28, %c0_29], %41 {strides = array<i32>} : memref<1x4x64xbf16, #tpu.memory_space<vmem>>, vector<1x4x64xbf16>,
    return
  }
  func.func @transform_0(%arg0: i32) -> (i32, i32, i32) {
    %c0_i32 = arith.constant 0 : i32
    %c0_i32_0 = arith.constant 0 : i32
    %c0_i32_1 = arith.constant 0 : i32
    return %arg0, %c0_i32, %c0_i32_0 : i32, i32, i32
  }
  func.func @transform_1(%arg0: i32) -> (i32, i32) {
    %c0_i32 = arith.constant 0 : i32
    %c0_i32_0 = arith.constant 0 : i32
    %c0_i32_1 = arith.constant 0 : i32
    return %c0_i32, %c0_i32_0 : i32, i32
  }
  func.func @transform_2(%arg0: i32) -> (i32, i32) {
    %c0_i32 = arith.constant 0 : i32
    %c0_i32_0 = arith.constant 0 : i32
    %c0_i32_1 = arith.constant 0 : i32
    return %c0_i32, %c0_i32_0 : i32, i32
  }
  func.func @transform_3(%arg0: i32) -> (i32, i32, i32) {
    %c0_i32 = arith.constant 0 : i32
    %c0_i32_0 = arith.constant 0 : i32
    %c0_i32_1 = arith.constant 0 : i32
    %c0_i32_2 = arith.constant 0 : i32
    return %c0_i32, %c0_i32_0, %c0_i32_1 : i32, i32, i32
  }
  func.func @transform_4(%arg0: i32) -> (i32, i32) {
    %c0_i32 = arith.constant 0 : i32
    %c0_i32_0 = arith.constant 0 : i32
    %c0_i32_1 = arith.constant 0 : i32
    return %c0_i32, %c0_i32_0 : i32, i32
  }
  func.func @transform_5(%arg0: i32) -> (i32, i32) {
    %c0_i32 = arith.constant 0 : i32
    %c0_i32_0 = arith.constant 0 : i32
    %c0_i32_1 = arith.constant 0 : i32
    return %c0_i32, %c0_i32_0 : i32, i32
  }
  func.func @transform_6(%arg0: i32) -> (i32, i32, i32) {
    %c0_i32 = arith.constant 0 : i32
    %c0_i32_0 = arith.constant 0 : i32
    %c0_i32_1 = arith.constant 0 : i32
    return %arg0, %c0_i32, %c0_i32_0 : i32, i32, i32
  }
}

module attributes {stable_mosaic.version = 11 : i64} {
  func.func @_dec_stage_kernel(%arg0: i32, %arg1: memref<1x4x64xbf16, #tpu.memory_space<vmem>>, %arg2: memref<12x4xbf16, #tpu.memory_space<vmem>>, %arg3: memref<64x192xbf16, #tpu.memory_space<vmem>>, %arg4: memref<5x192x64xbf16, #tpu.memory_space<vmem>>, %arg5: memref<1x64xf32, #tpu.memory_space<vmem>>, %arg6: memref<1x64xf32, #tpu.memory_space<vmem>>, %arg7: memref<1x8x64xbf16, #tpu.memory_space<vmem>>) attributes {dimension_semantics = [#tpu.dimension_semantics<parallel>], iteration_bounds = array<i64: 2>, scalar_prefetch = 0 : i64, scratch_operands = 0 : i64, tpu.core_type = #tpu.core_type<tc>, window_params = [{transform_indices = @transform_0, window_bounds = array<i64: 1, 4, 64>}, {pipeline_mode = #tpu.pipeline_mode<synchronous>, transform_indices = @transform_1, window_bounds = array<i64: 12, 4>}, {pipeline_mode = #tpu.pipeline_mode<synchronous>, transform_indices = @transform_2, window_bounds = array<i64: 64, 192>}, {pipeline_mode = #tpu.pipeline_mode<synchronous>, transform_indices = @transform_3, window_bounds = array<i64: 5, 192, 64>}, {pipeline_mode = #tpu.pipeline_mode<synchronous>, transform_indices = @transform_4, window_bounds = array<i64: 1, 64>}, {pipeline_mode = #tpu.pipeline_mode<synchronous>, transform_indices = @transform_5, window_bounds = array<i64: 1, 64>}, {transform_indices = @transform_6, window_bounds = array<i64: 1, 8, 64>}]} {
    %c0 = arith.constant 0 : index
    %c0_0 = arith.constant 0 : index
    %c0_1 = arith.constant 0 : index
    %0 = vector.load %arg1[%c0, %c0_0, %c0_1] : memref<1x4x64xbf16, #tpu.memory_space<vmem>>, vector<1x4x64xbf16>
    %1 = vector.shape_cast %0 : vector<1x4x64xbf16> to vector<4x64xbf16>
    %c0_2 = arith.constant 0 : index
    %c0_3 = arith.constant 0 : index
    %2 = vector.load %arg2[%c0_2, %c0_3] : memref<12x4xbf16, #tpu.memory_space<vmem>>, vector<12x4xbf16>
    %cst = arith.constant dense<0.000000e+00> : vector<12x64xf32>
    %3 = tpu.matmul %2, %1, %cst {dimension_numbers = #tpu.dot_dimension_numbers<[1], [0], [0], [1], [0, 0, 1, 1], [], []>} : vector<12x4xbf16>, vector<4x64xbf16>, vector<12x64xf32> -> vector<12x64xf32>
    %4 = arith.truncf %3 : vector<12x64xf32> to vector<12x64xbf16>
    %c0_4 = arith.constant 0 : index
    %c0_5 = arith.constant 0 : index
    %5 = vector.load %arg3[%c0_4, %c0_5] : memref<64x192xbf16, #tpu.memory_space<vmem>>, vector<64x192xbf16>
    %cst_6 = arith.constant dense<0.000000e+00> : vector<12x192xf32>
    %6 = tpu.matmul %4, %5, %cst_6 {dimension_numbers = #tpu.dot_dimension_numbers<[1], [0], [0], [1], [0, 0, 1, 1], [], []>} : vector<12x64xbf16>, vector<64x192xbf16>, vector<12x192xf32> -> vector<12x192xf32>
    %7 = arith.truncf %6 : vector<12x192xf32> to vector<12x192xbf16>
    %8 = vector.extract_strided_slice %7 {offsets = [0, 0], sizes = [8, 192], strides = [1, 1]} : vector<12x192xbf16> to vector<8x192xbf16>
    %c0_7 = arith.constant 0 : index
    %c0_8 = arith.constant 0 : index
    %c0_9 = arith.constant 0 : index
    %9 = vector.load %arg4[%c0_7, %c0_8, %c0_9] : memref<5x192x64xbf16, #tpu.memory_space<vmem>>, vector<1x192x64xbf16>
    %10 = vector.shape_cast %9 : vector<1x192x64xbf16> to vector<192x64xbf16>
    %cst_10 = arith.constant dense<0.000000e+00> : vector<8x64xf32>
    %11 = tpu.matmul %8, %10, %cst_10 {dimension_numbers = #tpu.dot_dimension_numbers<[1], [0], [0], [1], [0, 0, 1, 1], [], []>} : vector<8x192xbf16>, vector<192x64xbf16>, vector<8x64xf32> -> vector<8x64xf32>
    %12 = vector.extract_strided_slice %7 {offsets = [1, 0], sizes = [8, 192], strides = [1, 1]} : vector<12x192xbf16> to vector<8x192xbf16>
    %c1 = arith.constant 1 : index
    %c0_11 = arith.constant 0 : index
    %c0_12 = arith.constant 0 : index
    %13 = vector.load %arg4[%c1, %c0_11, %c0_12] : memref<5x192x64xbf16, #tpu.memory_space<vmem>>, vector<1x192x64xbf16>
    %14 = vector.shape_cast %13 : vector<1x192x64xbf16> to vector<192x64xbf16>
    %cst_13 = arith.constant dense<0.000000e+00> : vector<8x64xf32>
    %15 = tpu.matmul %12, %14, %cst_13 {dimension_numbers = #tpu.dot_dimension_numbers<[1], [0], [0], [1], [0, 0, 1, 1], [], []>} : vector<8x192xbf16>, vector<192x64xbf16>, vector<8x64xf32> -> vector<8x64xf32>
    %16 = arith.addf %11, %15 : vector<8x64xf32>
    %17 = vector.extract_strided_slice %7 {offsets = [2, 0], sizes = [8, 192], strides = [1, 1]} : vector<12x192xbf16> to vector<8x192xbf16>
    %c2 = arith.constant 2 : index
    %c0_14 = arith.constant 0 : index
    %c0_15 = arith.constant 0 : index
    %18 = vector.load %arg4[%c2, %c0_14, %c0_15] : memref<5x192x64xbf16, #tpu.memory_space<vmem>>, vector<1x192x64xbf16>
    %19 = vector.shape_cast %18 : vector<1x192x64xbf16> to vector<192x64xbf16>
    %cst_16 = arith.constant dense<0.000000e+00> : vector<8x64xf32>
    %20 = tpu.matmul %17, %19, %cst_16 {dimension_numbers = #tpu.dot_dimension_numbers<[1], [0], [0], [1], [0, 0, 1, 1], [], []>} : vector<8x192xbf16>, vector<192x64xbf16>, vector<8x64xf32> -> vector<8x64xf32>
    %21 = arith.addf %16, %20 : vector<8x64xf32>
    %22 = vector.extract_strided_slice %7 {offsets = [3, 0], sizes = [8, 192], strides = [1, 1]} : vector<12x192xbf16> to vector<8x192xbf16>
    %c3 = arith.constant 3 : index
    %c0_17 = arith.constant 0 : index
    %c0_18 = arith.constant 0 : index
    %23 = vector.load %arg4[%c3, %c0_17, %c0_18] : memref<5x192x64xbf16, #tpu.memory_space<vmem>>, vector<1x192x64xbf16>
    %24 = vector.shape_cast %23 : vector<1x192x64xbf16> to vector<192x64xbf16>
    %cst_19 = arith.constant dense<0.000000e+00> : vector<8x64xf32>
    %25 = tpu.matmul %22, %24, %cst_19 {dimension_numbers = #tpu.dot_dimension_numbers<[1], [0], [0], [1], [0, 0, 1, 1], [], []>} : vector<8x192xbf16>, vector<192x64xbf16>, vector<8x64xf32> -> vector<8x64xf32>
    %26 = arith.addf %21, %25 : vector<8x64xf32>
    %27 = vector.extract_strided_slice %7 {offsets = [4, 0], sizes = [8, 192], strides = [1, 1]} : vector<12x192xbf16> to vector<8x192xbf16>
    %c4 = arith.constant 4 : index
    %c0_20 = arith.constant 0 : index
    %c0_21 = arith.constant 0 : index
    %28 = vector.load %arg4[%c4, %c0_20, %c0_21] : memref<5x192x64xbf16, #tpu.memory_space<vmem>>, vector<1x192x64xbf16>
    %29 = vector.shape_cast %28 : vector<1x192x64xbf16> to vector<192x64xbf16>
    %cst_22 = arith.constant dense<0.000000e+00> : vector<8x64xf32>
    %30 = tpu.matmul %27, %29, %cst_22 {dimension_numbers = #tpu.dot_dimension_numbers<[1], [0], [0], [1], [0, 0, 1, 1], [], []>} : vector<8x192xbf16>, vector<192x64xbf16>, vector<8x64xf32> -> vector<8x64xf32>
    %31 = arith.addf %26, %30 : vector<8x64xf32>
    %c0_23 = arith.constant 0 : index
    %c0_24 = arith.constant 0 : index
    %32 = vector.load %arg5[%c0_23, %c0_24] : memref<1x64xf32, #tpu.memory_space<vmem>>, vector<1x64xf32>
    %33 = vector.broadcast %32 : vector<1x64xf32> to vector<8x64xf32>
    %34 = arith.mulf %31, %33 : vector<8x64xf32>
    %c0_25 = arith.constant 0 : index
    %c0_26 = arith.constant 0 : index
    %35 = vector.load %arg6[%c0_25, %c0_26] : memref<1x64xf32, #tpu.memory_space<vmem>>, vector<1x64xf32>
    %36 = vector.broadcast %35 : vector<1x64xf32> to vector<8x64xf32>
    %37 = arith.addf %34, %36 : vector<8x64xf32>
    %38 = arith.truncf %37 : vector<8x64xf32> to vector<8x64xbf16>
    %c0_27 = arith.constant 0 : index
    %c0_28 = arith.constant 0 : index
    %c0_29 = arith.constant 0 : index
    %39 = vector.load %arg7[%c0_27, %c0_28, %c0_29] : memref<1x8x64xbf16, #tpu.memory_space<vmem>>, vector<1x8x64xbf16>
    %40 = vector.shape_cast %39 : vector<1x8x64xbf16> to vector<8x64xbf16>
    %41 = vector.shape_cast %38 : vector<8x64xbf16> to vector<1x8x64xbf16>
    tpu.vector_store %arg7[%c0_27, %c0_28, %c0_29], %41 {strides = array<i32>} : memref<1x8x64xbf16, #tpu.memory_space<vmem>>, vector<1x8x64xbf16>,
    return
  }
  func.func @transform_0(%arg0: i32) -> (i32, i32, i32) {
    %c0_i32 = arith.constant 0 : i32
    %c0_i32_0 = arith.constant 0 : i32
    %c0_i32_1 = arith.constant 0 : i32
    return %arg0, %c0_i32, %c0_i32_0 : i32, i32, i32
  }
  func.func @transform_1(%arg0: i32) -> (i32, i32) {
    %c0_i32 = arith.constant 0 : i32
    %c0_i32_0 = arith.constant 0 : i32
    %c0_i32_1 = arith.constant 0 : i32
    return %c0_i32, %c0_i32_0 : i32, i32
  }
  func.func @transform_2(%arg0: i32) -> (i32, i32) {
    %c0_i32 = arith.constant 0 : i32
    %c0_i32_0 = arith.constant 0 : i32
    %c0_i32_1 = arith.constant 0 : i32
    return %c0_i32, %c0_i32_0 : i32, i32
  }
  func.func @transform_3(%arg0: i32) -> (i32, i32, i32) {
    %c0_i32 = arith.constant 0 : i32
    %c0_i32_0 = arith.constant 0 : i32
    %c0_i32_1 = arith.constant 0 : i32
    %c0_i32_2 = arith.constant 0 : i32
    return %c0_i32, %c0_i32_0, %c0_i32_1 : i32, i32, i32
  }
  func.func @transform_4(%arg0: i32) -> (i32, i32) {
    %c0_i32 = arith.constant 0 : i32
    %c0_i32_0 = arith.constant 0 : i32
    %c0_i32_1 = arith.constant 0 : i32
    return %c0_i32, %c0_i32_0 : i32, i32
  }
  func.func @transform_5(%arg0: i32) -> (i32, i32) {
    %c0_i32 = arith.constant 0 : i32
    %c0_i32_0 = arith.constant 0 : i32
    %c0_i32_1 = arith.constant 0 : i32
    return %c0_i32, %c0_i32_0 : i32, i32
  }
  func.func @transform_6(%arg0: i32) -> (i32, i32, i32) {
    %c0_i32 = arith.constant 0 : i32
    %c0_i32_0 = arith.constant 0 : i32
    %c0_i32_1 = arith.constant 0 : i32
    return %arg0, %c0_i32, %c0_i32_0 : i32, i32, i32
  }
}

module attributes {stable_mosaic.version = 11 : i64} {
  func.func @_dec_stage_kernel(%arg0: i32, %arg1: memref<1x8x64xbf16, #tpu.memory_space<vmem>>, %arg2: memref<20x8xbf16, #tpu.memory_space<vmem>>, %arg3: memref<64x160xbf16, #tpu.memory_space<vmem>>, %arg4: memref<5x160x128xbf16, #tpu.memory_space<vmem>>, %arg5: memref<1x128xf32, #tpu.memory_space<vmem>>, %arg6: memref<1x128xf32, #tpu.memory_space<vmem>>, %arg7: memref<128x64xbf16, #tpu.memory_space<vmem>>, %arg8: memref<1x64xf32, #tpu.memory_space<vmem>>, %arg9: memref<1x16x64xf32, #tpu.memory_space<vmem>>) attributes {dimension_semantics = [#tpu.dimension_semantics<parallel>], iteration_bounds = array<i64: 2>, scalar_prefetch = 0 : i64, scratch_operands = 0 : i64, tpu.core_type = #tpu.core_type<tc>, window_params = [{transform_indices = @transform_0, window_bounds = array<i64: 1, 8, 64>}, {pipeline_mode = #tpu.pipeline_mode<synchronous>, transform_indices = @transform_1, window_bounds = array<i64: 20, 8>}, {pipeline_mode = #tpu.pipeline_mode<synchronous>, transform_indices = @transform_2, window_bounds = array<i64: 64, 160>}, {pipeline_mode = #tpu.pipeline_mode<synchronous>, transform_indices = @transform_3, window_bounds = array<i64: 5, 160, 128>}, {pipeline_mode = #tpu.pipeline_mode<synchronous>, transform_indices = @transform_4, window_bounds = array<i64: 1, 128>}, {pipeline_mode = #tpu.pipeline_mode<synchronous>, transform_indices = @transform_5, window_bounds = array<i64: 1, 128>}, {pipeline_mode = #tpu.pipeline_mode<synchronous>, transform_indices = @transform_6, window_bounds = array<i64: 128, 64>}, {pipeline_mode = #tpu.pipeline_mode<synchronous>, transform_indices = @transform_7, window_bounds = array<i64: 1, 64>}, {transform_indices = @transform_8, window_bounds = array<i64: 1, 16, 64>}]} {
    %c0 = arith.constant 0 : index
    %c0_0 = arith.constant 0 : index
    %c0_1 = arith.constant 0 : index
    %0 = vector.load %arg1[%c0, %c0_0, %c0_1] : memref<1x8x64xbf16, #tpu.memory_space<vmem>>, vector<1x8x64xbf16>
    %1 = vector.shape_cast %0 : vector<1x8x64xbf16> to vector<8x64xbf16>
    %c0_2 = arith.constant 0 : index
    %c0_3 = arith.constant 0 : index
    %2 = vector.load %arg2[%c0_2, %c0_3] : memref<20x8xbf16, #tpu.memory_space<vmem>>, vector<20x8xbf16>
    %cst = arith.constant dense<0.000000e+00> : vector<20x64xf32>
    %3 = tpu.matmul %2, %1, %cst {dimension_numbers = #tpu.dot_dimension_numbers<[1], [0], [0], [1], [0, 0, 1, 1], [], []>} : vector<20x8xbf16>, vector<8x64xbf16>, vector<20x64xf32> -> vector<20x64xf32>
    %4 = arith.truncf %3 : vector<20x64xf32> to vector<20x64xbf16>
    %c0_4 = arith.constant 0 : index
    %c0_5 = arith.constant 0 : index
    %5 = vector.load %arg3[%c0_4, %c0_5] : memref<64x160xbf16, #tpu.memory_space<vmem>>, vector<64x160xbf16>
    %cst_6 = arith.constant dense<0.000000e+00> : vector<20x160xf32>
    %6 = tpu.matmul %4, %5, %cst_6 {dimension_numbers = #tpu.dot_dimension_numbers<[1], [0], [0], [1], [0, 0, 1, 1], [], []>} : vector<20x64xbf16>, vector<64x160xbf16>, vector<20x160xf32> -> vector<20x160xf32>
    %7 = arith.truncf %6 : vector<20x160xf32> to vector<20x160xbf16>
    %8 = vector.extract_strided_slice %7 {offsets = [0, 0], sizes = [16, 160], strides = [1, 1]} : vector<20x160xbf16> to vector<16x160xbf16>
    %c0_7 = arith.constant 0 : index
    %c0_8 = arith.constant 0 : index
    %c0_9 = arith.constant 0 : index
    %9 = vector.load %arg4[%c0_7, %c0_8, %c0_9] : memref<5x160x128xbf16, #tpu.memory_space<vmem>>, vector<1x160x128xbf16>
    %10 = vector.shape_cast %9 : vector<1x160x128xbf16> to vector<160x128xbf16>
    %cst_10 = arith.constant dense<0.000000e+00> : vector<16x128xf32>
    %11 = tpu.matmul %8, %10, %cst_10 {dimension_numbers = #tpu.dot_dimension_numbers<[1], [0], [0], [1], [0, 0, 1, 1], [], []>} : vector<16x160xbf16>, vector<160x128xbf16>, vector<16x128xf32> -> vector<16x128xf32>
    %12 = vector.extract_strided_slice %7 {offsets = [1, 0], sizes = [16, 160], strides = [1, 1]} : vector<20x160xbf16> to vector<16x160xbf16>
    %c1 = arith.constant 1 : index
    %c0_11 = arith.constant 0 : index
    %c0_12 = arith.constant 0 : index
    %13 = vector.load %arg4[%c1, %c0_11, %c0_12] : memref<5x160x128xbf16, #tpu.memory_space<vmem>>, vector<1x160x128xbf16>
    %14 = vector.shape_cast %13 : vector<1x160x128xbf16> to vector<160x128xbf16>
    %cst_13 = arith.constant dense<0.000000e+00> : vector<16x128xf32>
    %15 = tpu.matmul %12, %14, %cst_13 {dimension_numbers = #tpu.dot_dimension_numbers<[1], [0], [0], [1], [0, 0, 1, 1], [], []>} : vector<16x160xbf16>, vector<160x128xbf16>, vector<16x128xf32> -> vector<16x128xf32>
    %16 = arith.addf %11, %15 : vector<16x128xf32>
    %17 = vector.extract_strided_slice %7 {offsets = [2, 0], sizes = [16, 160], strides = [1, 1]} : vector<20x160xbf16> to vector<16x160xbf16>
    %c2 = arith.constant 2 : index
    %c0_14 = arith.constant 0 : index
    %c0_15 = arith.constant 0 : index
    %18 = vector.load %arg4[%c2, %c0_14, %c0_15] : memref<5x160x128xbf16, #tpu.memory_space<vmem>>, vector<1x160x128xbf16>
    %19 = vector.shape_cast %18 : vector<1x160x128xbf16> to vector<160x128xbf16>
    %cst_16 = arith.constant dense<0.000000e+00> : vector<16x128xf32>
    %20 = tpu.matmul %17, %19, %cst_16 {dimension_numbers = #tpu.dot_dimension_numbers<[1], [0], [0], [1], [0, 0, 1, 1], [], []>} : vector<16x160xbf16>, vector<160x128xbf16>, vector<16x128xf32> -> vector<16x128xf32>
    %21 = arith.addf %16, %20 : vector<16x128xf32>
    %22 = vector.extract_strided_slice %7 {offsets = [3, 0], sizes = [16, 160], strides = [1, 1]} : vector<20x160xbf16> to vector<16x160xbf16>
    %c3 = arith.constant 3 : index
    %c0_17 = arith.constant 0 : index
    %c0_18 = arith.constant 0 : index
    %23 = vector.load %arg4[%c3, %c0_17, %c0_18] : memref<5x160x128xbf16, #tpu.memory_space<vmem>>, vector<1x160x128xbf16>
    %24 = vector.shape_cast %23 : vector<1x160x128xbf16> to vector<160x128xbf16>
    %cst_19 = arith.constant dense<0.000000e+00> : vector<16x128xf32>
    %25 = tpu.matmul %22, %24, %cst_19 {dimension_numbers = #tpu.dot_dimension_numbers<[1], [0], [0], [1], [0, 0, 1, 1], [], []>} : vector<16x160xbf16>, vector<160x128xbf16>, vector<16x128xf32> -> vector<16x128xf32>
    %26 = arith.addf %21, %25 : vector<16x128xf32>
    %27 = vector.extract_strided_slice %7 {offsets = [4, 0], sizes = [16, 160], strides = [1, 1]} : vector<20x160xbf16> to vector<16x160xbf16>
    %c4 = arith.constant 4 : index
    %c0_20 = arith.constant 0 : index
    %c0_21 = arith.constant 0 : index
    %28 = vector.load %arg4[%c4, %c0_20, %c0_21] : memref<5x160x128xbf16, #tpu.memory_space<vmem>>, vector<1x160x128xbf16>
    %29 = vector.shape_cast %28 : vector<1x160x128xbf16> to vector<160x128xbf16>
    %cst_22 = arith.constant dense<0.000000e+00> : vector<16x128xf32>
    %30 = tpu.matmul %27, %29, %cst_22 {dimension_numbers = #tpu.dot_dimension_numbers<[1], [0], [0], [1], [0, 0, 1, 1], [], []>} : vector<16x160xbf16>, vector<160x128xbf16>, vector<16x128xf32> -> vector<16x128xf32>
    %31 = arith.addf %26, %30 : vector<16x128xf32>
    %c0_23 = arith.constant 0 : index
    %c0_24 = arith.constant 0 : index
    %32 = vector.load %arg5[%c0_23, %c0_24] : memref<1x128xf32, #tpu.memory_space<vmem>>, vector<1x128xf32>
    %33 = vector.broadcast %32 : vector<1x128xf32> to vector<16x128xf32>
    %34 = arith.mulf %31, %33 : vector<16x128xf32>
    %c0_25 = arith.constant 0 : index
    %c0_26 = arith.constant 0 : index
    %35 = vector.load %arg6[%c0_25, %c0_26] : memref<1x128xf32, #tpu.memory_space<vmem>>, vector<1x128xf32>
    %36 = vector.broadcast %35 : vector<1x128xf32> to vector<16x128xf32>
    %37 = arith.addf %34, %36 : vector<16x128xf32>
    %38 = arith.truncf %37 : vector<16x128xf32> to vector<16x128xbf16>
    %c0_27 = arith.constant 0 : index
    %c0_28 = arith.constant 0 : index
    %39 = vector.load %arg7[%c0_27, %c0_28] : memref<128x64xbf16, #tpu.memory_space<vmem>>, vector<128x64xbf16>
    %cst_29 = arith.constant dense<0.000000e+00> : vector<16x64xf32>
    %40 = tpu.matmul %38, %39, %cst_29 {dimension_numbers = #tpu.dot_dimension_numbers<[1], [0], [0], [1], [0, 0, 1, 1], [], []>} : vector<16x128xbf16>, vector<128x64xbf16>, vector<16x64xf32> -> vector<16x64xf32>
    %c0_30 = arith.constant 0 : index
    %c0_31 = arith.constant 0 : index
    %41 = vector.load %arg8[%c0_30, %c0_31] : memref<1x64xf32, #tpu.memory_space<vmem>>, vector<1x64xf32>
    %42 = vector.broadcast %41 : vector<1x64xf32> to vector<16x64xf32>
    %43 = arith.addf %40, %42 : vector<16x64xf32>
    %44 = arith.negf %43 : vector<16x64xf32>
    %45 = math.exp %44 : vector<16x64xf32>
    %cst_32 = arith.constant 1.000000e+00 : f32
    %46 = vector.broadcast %cst_32 : f32 to vector<16x64xf32>
    %47 = arith.addf %46, %45 : vector<16x64xf32>
    %48 = arith.divf %46, %47 : vector<16x64xf32>
    %c0_33 = arith.constant 0 : index
    %c0_34 = arith.constant 0 : index
    %c0_35 = arith.constant 0 : index
    %49 = vector.load %arg9[%c0_33, %c0_34, %c0_35] : memref<1x16x64xf32, #tpu.memory_space<vmem>>, vector<1x16x64xf32>
    %50 = vector.shape_cast %49 : vector<1x16x64xf32> to vector<16x64xf32>
    %51 = vector.shape_cast %48 : vector<16x64xf32> to vector<1x16x64xf32>
    tpu.vector_store %arg9[%c0_33, %c0_34, %c0_35], %51 {strides = array<i32>} : memref<1x16x64xf32, #tpu.memory_space<vmem>>, vector<1x16x64xf32>,
    return
  }
  func.func @transform_0(%arg0: i32) -> (i32, i32, i32) {
    %c0_i32 = arith.constant 0 : i32
    %c0_i32_0 = arith.constant 0 : i32
    %c0_i32_1 = arith.constant 0 : i32
    return %arg0, %c0_i32, %c0_i32_0 : i32, i32, i32
  }
  func.func @transform_1(%arg0: i32) -> (i32, i32) {
    %c0_i32 = arith.constant 0 : i32
    %c0_i32_0 = arith.constant 0 : i32
    %c0_i32_1 = arith.constant 0 : i32
    return %c0_i32, %c0_i32_0 : i32, i32
  }
  func.func @transform_2(%arg0: i32) -> (i32, i32) {
    %c0_i32 = arith.constant 0 : i32
    %c0_i32_0 = arith.constant 0 : i32
    %c0_i32_1 = arith.constant 0 : i32
    return %c0_i32, %c0_i32_0 : i32, i32
  }
  func.func @transform_3(%arg0: i32) -> (i32, i32, i32) {
    %c0_i32 = arith.constant 0 : i32
    %c0_i32_0 = arith.constant 0 : i32
    %c0_i32_1 = arith.constant 0 : i32
    %c0_i32_2 = arith.constant 0 : i32
    return %c0_i32, %c0_i32_0, %c0_i32_1 : i32, i32, i32
  }
  func.func @transform_4(%arg0: i32) -> (i32, i32) {
    %c0_i32 = arith.constant 0 : i32
    %c0_i32_0 = arith.constant 0 : i32
    %c0_i32_1 = arith.constant 0 : i32
    return %c0_i32, %c0_i32_0 : i32, i32
  }
  func.func @transform_5(%arg0: i32) -> (i32, i32) {
    %c0_i32 = arith.constant 0 : i32
    %c0_i32_0 = arith.constant 0 : i32
    %c0_i32_1 = arith.constant 0 : i32
    return %c0_i32, %c0_i32_0 : i32, i32
  }
  func.func @transform_6(%arg0: i32) -> (i32, i32) {
    %c0_i32 = arith.constant 0 : i32
    %c0_i32_0 = arith.constant 0 : i32
    %c0_i32_1 = arith.constant 0 : i32
    return %c0_i32, %c0_i32_0 : i32, i32
  }
  func.func @transform_7(%arg0: i32) -> (i32, i32) {
    %c0_i32 = arith.constant 0 : i32
    %c0_i32_0 = arith.constant 0 : i32
    %c0_i32_1 = arith.constant 0 : i32
    return %c0_i32, %c0_i32_0 : i32, i32
  }
  func.func @transform_8(%arg0: i32) -> (i32, i32, i32) {
    %c0_i32 = arith.constant 0 : i32
    %c0_i32_0 = arith.constant 0 : i32
    %c0_i32_1 = arith.constant 0 : i32
    return %arg0, %c0_i32, %c0_i32_0 : i32, i32, i32
  }
}

</mosaic_0001>

<bundles_post_ra>
// kernel: tile.78
= control target key start
LH: loop header
LB: loop body
LE: loop exit
PB: predicated region body
PF: predicated region fallthrough
CT: control target
= control target key end

     0   :  { %s34_s0 = inlined_call_operand.vmem [shape: f32[8], index: 0, kind: input, shape index: {}]   ;;  %s35_s1 = inlined_call_operand.vmem [shape: f32[20,8], index: 1, kind: output, shape index: {}]  }
   0x1   :  { %v4_v0 = vld [vmem:[%s34_s0] ss:$0 sm:$0xff] }
   0x2   :  { %5 = vst [vmem:[%s35_s1] sm:$0xff] %v4_v0  ;;  %10 = vst [vmem:[%s35_s1 + $0x8] sm:$0xff] %v4_v0 }
   0x3   :  { %11 = vst [vmem:[%s35_s1 + $0x10] sm:$0xff] %v4_v0 }

// kernel: tile.79
= control target key start
LH: loop header
LB: loop body
LE: loop exit
PB: predicated region body
PF: predicated region fallthrough
CT: control target
= control target key end

     0   :  { %s141_s10 = smov 120   ;;  %s142_s11 = smov 104   ;;  %vm4_vm0 = vcmask 64512   ;;  %vm10_vm1 = vcmask 1048512   ;;  %vm16_vm2 = vcmask 982912   ;;  %vm22_vm3 = vcmask 917312   ;;  %s220_s0 = inlined_call_operand.vmem [shape: f32[20,8], index: 0, kind: input, shape index: {}]   ;;  %s221_s1 = inlined_call_operand.vmem [shape: f32[1,160], index: 1, kind: output, shape index: {}]  }
   0x1   :  { %v110_v0 = vld [vmem:[%s220_s0 + $0xf] sm:$0x1]   ;;  %v112_v1 = vld [vmem:[%s220_s0 + $0xd] sm:$0x1]   ;;  %v111_v2 = vld [vmem:[%s220_s0 + $0xe] sm:$0x1]  }
   0x2   :  { %8 = vrot.lane.b32.xlu0 %v110_v0, %s141_s10  ;;  %20 = vrot.lane.b32.xlu1 %v112_v1, %s142_s11  ;;  %v113_v3 = vld [vmem:[%s220_s0 + $0xc] sm:$0x1]   ;;  %s143_s16 = smov 112   ;;  %s144_s17 = smov 96   ;;  %v114_v4 = vld [vmem:[%s220_s0 + $0xb] sm:$0x1]  }
   0x3   :  { %v115_v5 = vld [vmem:[%s220_s0 + $0xa] sm:$0x1]   ;;  %s145_s22 = smov 88   ;;  %s146_s23 = smov 80   ;;  %v116_v6 = vld [vmem:[%s220_s0 + $0x9] sm:$0x1]  }
   0x4   :  { %s2_s26 = smov 3  ;;  %v117_v7 = vld [vmem:[%s220_s0 + $0x8] sm:$0x1]   ;;  %s147_s2 = smov 72   ;;  %v118_v9 = vld [vmem:[%s220_s0 + $0x7] sm:$0x1]  }
   0x5   :  { %v3_v8 = vld [vmem:[%s220_s0] ss:$16 sm:%s2_s26]   ;;  %s148_s3 = smov 64   ;;  %v119_v10 = vld [vmem:[%s220_s0 + $0x6] sm:$0x1]   ;;  %s149_s8 = smov 56  }
   0x6   :  { %14 = vrot.lane.b32.xlu0 %v111_v2, %s143_s16  ;;  %26 = vrot.lane.b32.xlu1 %v113_v3, %s144_s17  ;;  %5 = vst.msk [vmem:[#allocation0] ss:$8 sm:$0x3] %vm4_vm0, %v3_v8   ;;  %s150_s9 = smov 48   ;;  %v120_v11 = vld [vmem:[%s220_s0 + $0x5] sm:$0x1]  }
   0x7   :  { %v121_v12 = vld [vmem:[%s220_s0 + $0x4] sm:$0x1]   ;;  %s79_s14 = smov 3  ;;  %s86_s15 = smov 3  ;;  %vm28_vm4 = vcmask 851712   ;;  %vm34_vm5 = vcmask 786112  }
   0x8   :  { %s151_s16 = smov 40   ;;  %s152_s17 = smov 32   ;;  %v122_v13 = vld [vmem:[%s220_s0 + $0x3] ss:$16 sm:%s79_s14]   ;;  %v123_v14 = vld [vmem:[%s220_s0 + $0x2] ss:$16 sm:%s86_s15]  }
   0x9   :  { %s154_s24 = smov 16   ;;  %vm40_vm6 = vcmask 720512   ;;  %vm46_vm7 = vcmask 654912   ;;  %vm52_vm8 = vcmask 589312   ;;  %vm58_vm9 = vcmask 523712  }
   0xa   :  { %32 = vrot.lane.b32.xlu0 %v114_v4, %s145_s22  ;;  %38 = vrot.lane.b32.xlu1 %v115_v5, %s146_s23  ;;  %s93_s22 = smov 3  ;;  %s153_s23 = smov 24   ;;  %vm64_vm10 = vcmask 458112   ;;  %vm70_vm11 = vcmask 392512   ;;  %vm76_vm12 = vcmask 326912   ;;  %vm83_vm13 = vcmask 261312  }
   0xb   :  { %v124_v15 = vld [vmem:[%s220_s0 + $0x1] ss:$16 sm:%s93_s22]   ;;  %s155_s0 = smov 8   ;;  %vm90_vm14 = vcmask 195712   ;;  %vm97_vm15 = vcmask 130112  }
   0xe   :  { %44 = vrot.lane.b32.xlu0 %v116_v6, %s147_s2  ;;  %50 = vrot.lane.b32.xlu1 %v117_v7, %s148_s3 }
  0x12   :  { %56 = vrot.lane.b32.xlu0 %v118_v9, %s149_s8  ;;  %62 = vrot.lane.b32.xlu1 %v119_v10, %s150_s9 }
  0x16   :  { %68 = vrot.lane.b32.xlu0 %v120_v11, %s151_s16  ;;  %74 = vrot.lane.b32.xlu1 %v121_v12, %s152_s17 }
  0x1a   :  { %81 = vrot.lane.b32.xlu0 %v122_v13, %s153_s23  ;;  %88 = vrot.lane.b32.xlu1 %v123_v14, %s154_s24 }
  0x1e   :  { %95 = vrot.lane.b32.xlu0 %v124_v15, %s155_s0 }
  0x74   :  { %v9_v16 = vpop.permute.xlu0 %8   ;;  %v21_v17 = vpop.permute.xlu1 %20  }
  0x75   :  { %11 = vst.msk [vmem:[#allocation0] sm:$0x1] %vm10_vm1, %v9_v16  }
  0x78   :  { %v15_v18 = vpop.permute.xlu0 %14   ;;  %v27_v19 = vpop.permute.xlu1 %26  }
  0x79   :  { %17 = vst.msk [vmem:[#allocation0] sm:$0x1] %vm16_vm2, %v15_v18  }
  0x7a   :  { %23 = vst.msk [vmem:[#allocation0] sm:$0x1] %vm22_vm3, %v21_v17  }
  0x7b   :  { %29 = vst.msk [vmem:[#allocation0] sm:$0x1] %vm28_vm4, %v27_v19  }
  0x7c   :  { %v33_v20 = vpop.permute.xlu0 %32   ;;  %v39_v21 = vpop.permute.xlu1 %38  }
  0x7d   :  { %35 = vst.msk [vmem:[#allocation0] sm:$0x1] %vm34_vm5, %v33_v20  }
  0x7e   :  { %41 = vst.msk [vmem:[#allocation0] sm:$0x1] %vm40_vm6, %v39_v21  }
  0x80   :  { %v45_v22 = vpop.permute.xlu0 %44   ;;  %v51_v23 = vpop.permute.xlu1 %50  }
  0x81   :  { %47 = vst.msk [vmem:[#allocation0] sm:$0x1] %vm46_vm7, %v45_v22  }
  0x82   :  { %53 = vst.msk [vmem:[#allocation0] sm:$0x1] %vm52_vm8, %v51_v23  }
  0x84   :  { %v57_v24 = vpop.permute.xlu0 %56   ;;  %v63_v25 = vpop.permute.xlu1 %62  }
  0x85   :  { %59 = vst.msk [vmem:[#allocation0] sm:$0x1] %vm58_vm9, %v57_v24  }
  0x86   :  { %65 = vst.msk [vmem:[#allocation0] sm:$0x1] %vm64_vm10, %v63_v25  }
  0x88   :  { %v69_v26 = vpop.permute.xlu0 %68   ;;  %v75_v27 = vpop.permute.xlu1 %74  }
  0x89   :  { %71 = vst.msk [vmem:[#allocation0] sm:$0x1] %vm70_vm11, %v69_v26  }
  0x8a   :  { %77 = vst.msk [vmem:[#allocation0] sm:$0x1] %vm76_vm12, %v75_v27  }
  0x8c   :  { %v82_v28 = vpop.permute.xlu0 %81   ;;  %v89_v29 = vpop.permute.xlu1 %88  }
  0x8d   :  { %84 = vst.msk [vmem:[#allocation0] ss:$8 sm:$0x3] %vm83_vm13, %v82_v28  }
  0x8e   :  { %91 = vst.msk [vmem:[#allocation0] ss:$8 sm:$0x3] %vm90_vm14, %v89_v29  }
  0x90   :  { %v96_v30 = vpop.permute.xlu0 %95  }
  0x91   :  { %98 = vst.msk [vmem:[#allocation0] ss:$8 sm:$0x3] %vm97_vm15, %v96_v30  }
  0x98   :  { %v102_v31 = vld [vmem:[#allocation0] sm:$0x1]  ;;  %v106_v32 = vld [vmem:[#allocation0 + $0x8] sm:$0x1] }
  0x99   :  { %104 = vst [vmem:[%s221_s1] sm:$0x1] %v102_v31  ;;  %125 = vst [vmem:[%s221_s1 + $0x1] sm:$0x1] %v106_v32 }

// kernel: tile.83
= control target key start
LH: loop header
LB: loop body
LE: loop exit
PB: predicated region body
PF: predicated region fallthrough
CT: control target
= control target key end

     0   :  { %s28_s0 = inlined_call_operand.vmem [shape: f32[8], index: 0, kind: input, shape index: {}]   ;;  %s29_s1 = inlined_call_operand.vmem [shape: f32[16,8], index: 1, kind: output, shape index: {}]  }
   0x1   :  { %v4_v0 = vld [vmem:[%s28_s0] ss:$0 sm:$0xff] }
   0x2   :  { %5 = vst [vmem:[%s29_s1] sm:$0xff] %v4_v0  ;;  %8 = vst [vmem:[%s29_s1 + $0x8] sm:$0xff] %v4_v0 }

// kernel: tile.84
= control target key start
LH: loop header
LB: loop body
LE: loop exit
PB: predicated region body
PF: predicated region fallthrough
CT: control target
= control target key end

     0   :  { %s131_s10 = smov 120   ;;  %s132_s11 = smov 104   ;;  %vm3_vm0 = vcmask 64512   ;;  %vm9_vm1 = vcmask 1048512   ;;  %vm15_vm2 = vcmask 982912   ;;  %vm21_vm3 = vcmask 917312   ;;  %s207_s0 = inlined_call_operand.vmem [shape: f32[16,8], index: 0, kind: input, shape index: {}]   ;;  %s208_s1 = inlined_call_operand.vmem [shape: f32[128], index: 1, kind: output, shape index: {}]  }
   0x1   :  { %v101_v0 = vld [vmem:[%s207_s0 + $0xf] sm:$0x1]   ;;  %v103_v1 = vld [vmem:[%s207_s0 + $0xd] sm:$0x1]   ;;  %v102_v2 = vld [vmem:[%s207_s0 + $0xe] sm:$0x1]  }
   0x2   :  { %7 = vrot.lane.b32.xlu0 %v101_v0, %s131_s10  ;;  %19 = vrot.lane.b32.xlu1 %v103_v1, %s132_s11  ;;  %v104_v3 = vld [vmem:[%s207_s0 + $0xc] sm:$0x1]   ;;  %s133_s16 = smov 112   ;;  %s134_s17 = smov 96   ;;  %v105_v4 = vld [vmem:[%s207_s0 + $0xb] sm:$0x1]  }
   0x3   :  { %v106_v5 = vld [vmem:[%s207_s0 + $0xa] sm:$0x1]   ;;  %v2_v6 = vld [vmem:[%s207_s0] sm:$0x1]   ;;  %s135_s24 = smov 88   ;;  %s136_s25 = smov 80  }
   0x4   :  { %4 = vst.msk [vmem:[#allocation0] sm:$0x1] %vm3_vm0, %v2_v6   ;;  %v107_v7 = vld [vmem:[%s207_s0 + $0x9] sm:$0x1]   ;;  %v108_v8 = vld [vmem:[%s207_s0 + $0x8] sm:$0x1]  }
   0x5   :  { %s137_s30 = smov 72   ;;  %s138_s2 = smov 64   ;;  %v109_v9 = vld [vmem:[%s207_s0 + $0x7] sm:$0x1]   ;;  %v110_v10 = vld [vmem:[%s207_s0 + $0x6] sm:$0x1]  }
   0x6   :  { %13 = vrot.lane.b32.xlu0 %v102_v2, %s133_s16  ;;  %25 = vrot.lane.b32.xlu1 %v104_v3, %s134_s17  ;;  %s139_s7 = smov 56   ;;  %s140_s8 = smov 48   ;;  %v111_v11 = vld [vmem:[%s207_s0 + $0x5] sm:$0x1]   ;;  %v112_v12 = vld [vmem:[%s207_s0 + $0x4] sm:$0x1]  }
   0x7   :  { %s141_s13 = smov 40   ;;  %s142_s14 = smov 32   ;;  %v113_v13 = vld [vmem:[%s207_s0 + $0x3] sm:$0x1]   ;;  %v114_v14 = vld [vmem:[%s207_s0 + $0x2] sm:$0x1]  }
   0x8   :  { %s143_s19 = smov 24   ;;  %s144_s20 = smov 16   ;;  %v115_v15 = vld [vmem:[%s207_s0 + $0x1] sm:$0x1]   ;;  %vm27_vm4 = vcmask 851712   ;;  %vm33_vm5 = vcmask 786112  }
   0x9   :  { %s145_s0 = smov 8   ;;  %vm39_vm6 = vcmask 720512   ;;  %vm45_vm7 = vcmask 654912   ;;  %vm51_vm8 = vcmask 589312   ;;  %vm57_vm9 = vcmask 523712  }
   0xa   :  { %31 = vrot.lane.b32.xlu0 %v105_v4, %s135_s24  ;;  %37 = vrot.lane.b32.xlu1 %v106_v5, %s136_s25  ;;  %vm63_vm10 = vcmask 458112   ;;  %vm69_vm11 = vcmask 392512   ;;  %vm75_vm12 = vcmask 326912   ;;  %vm81_vm13 = vcmask 261312  }
   0xb   :  { %vm87_vm14 = vcmask 195712   ;;  %vm93_vm15 = vcmask 130112  }
   0xe   :  { %43 = vrot.lane.b32.xlu0 %v107_v7, %s137_s30  ;;  %49 = vrot.lane.b32.xlu1 %v108_v8, %s138_s2 }
  0x12   :  { %55 = vrot.lane.b32.xlu0 %v109_v9, %s139_s7  ;;  %61 = vrot.lane.b32.xlu1 %v110_v10, %s140_s8 }
  0x16   :  { %67 = vrot.lane.b32.xlu0 %v111_v11, %s141_s13  ;;  %73 = vrot.lane.b32.xlu1 %v112_v12, %s142_s14 }
  0x1a   :  { %79 = vrot.lane.b32.xlu0 %v113_v13, %s143_s19  ;;  %85 = vrot.lane.b32.xlu1 %v114_v14, %s144_s20 }
  0x1e   :  { %91 = vrot.lane.b32.xlu0 %v115_v15, %s145_s0 }
  0x74   :  { %v8_v16 = vpop.permute.xlu0 %7   ;;  %v20_v17 = vpop.permute.xlu1 %19  }
  0x75   :  { %10 = vst.msk [vmem:[#allocation0] sm:$0x1] %vm9_vm1, %v8_v16  }
  0x78   :  { %v14_v18 = vpop.permute.xlu0 %13   ;;  %v26_v19 = vpop.permute.xlu1 %25  }
  0x79   :  { %16 = vst.msk [vmem:[#allocation0] sm:$0x1] %vm15_vm2, %v14_v18  }
  0x7a   :  { %22 = vst.msk [vmem:[#allocation0] sm:$0x1] %vm21_vm3, %v20_v17  }
  0x7b   :  { %28 = vst.msk [vmem:[#allocation0] sm:$0x1] %vm27_vm4, %v26_v19  }
  0x7c   :  { %v32_v20 = vpop.permute.xlu0 %31   ;;  %v38_v21 = vpop.permute.xlu1 %37  }
  0x7d   :  { %34 = vst.msk [vmem:[#allocation0] sm:$0x1] %vm33_vm5, %v32_v20  }
  0x7e   :  { %40 = vst.msk [vmem:[#allocation0] sm:$0x1] %vm39_vm6, %v38_v21  }
  0x80   :  { %v44_v22 = vpop.permute.xlu0 %43   ;;  %v50_v23 = vpop.permute.xlu1 %49  }
  0x81   :  { %46 = vst.msk [vmem:[#allocation0] sm:$0x1] %vm45_vm7, %v44_v22  }
  0x82   :  { %52 = vst.msk [vmem:[#allocation0] sm:$0x1] %vm51_vm8, %v50_v23  }
  0x84   :  { %v56_v24 = vpop.permute.xlu0 %55   ;;  %v62_v25 = vpop.permute.xlu1 %61  }
  0x85   :  { %58 = vst.msk [vmem:[#allocation0] sm:$0x1] %vm57_vm9, %v56_v24  }
  0x86   :  { %64 = vst.msk [vmem:[#allocation0] sm:$0x1] %vm63_vm10, %v62_v25  }
  0x88   :  { %v68_v26 = vpop.permute.xlu0 %67   ;;  %v74_v27 = vpop.permute.xlu1 %73  }
  0x89   :  { %70 = vst.msk [vmem:[#allocation0] sm:$0x1] %vm69_vm11, %v68_v26  }
  0x8a   :  { %76 = vst.msk [vmem:[#allocation0] sm:$0x1] %vm75_vm12, %v74_v27  }
  0x8c   :  { %v80_v28 = vpop.permute.xlu0 %79   ;;  %v86_v29 = vpop.permute.xlu1 %85  }
  0x8d   :  { %82 = vst.msk [vmem:[#allocation0] sm:$0x1] %vm81_vm13, %v80_v28  }
  0x8e   :  { %88 = vst.msk [vmem:[#allocation0] sm:$0x1] %vm87_vm14, %v86_v29  }
  0x90   :  { %v92_v30 = vpop.permute.xlu0 %91  }
  0x91   :  { %94 = vst.msk [vmem:[#allocation0] sm:$0x1] %vm93_vm15, %v92_v30  }
  0x98   :  { %v98_v31 = vld [vmem:[#allocation0] sm:$0x1] }
  0x99   :  { %100 = vst [vmem:[%s208_s1] sm:$0x1] %v98_v31 }

// kernel: tile.93
= control target key start
LH: loop header
LB: loop body
LE: loop exit
PB: predicated region body
PF: predicated region fallthrough
CT: control target
= control target key end

     0   :  { %s22_s0 = inlined_call_operand.vmem [shape: f32[16], index: 0, kind: input, shape index: {}]   ;;  %s23_s1 = inlined_call_operand.vmem [shape: f32[8,16], index: 1, kind: output, shape index: {}]  }
   0x1   :  { %v4_v0 = vld [vmem:[%s22_s0] ss:$0 sm:$0xff] }
   0x2   :  { %5 = vst [vmem:[%s23_s1] sm:$0xff] %v4_v0 }

// kernel: tile.94
= control target key start
LH: loop header
LB: loop body
LE: loop exit
PB: predicated region body
PF: predicated region fallthrough
CT: control target
= control target key end

     0   :  { %s67_s10 = smov 112   ;;  %s68_s11 = smov 80   ;;  %vm3_vm0 = vcmask 130048   ;;  %vm9_vm1 = vcmask 1048448   ;;  %vm15_vm2 = vcmask 917248   ;;  %vm21_vm3 = vcmask 786048   ;;  %s111_s0 = inlined_call_operand.vmem [shape: f32[8,16], index: 0, kind: input, shape index: {}]   ;;  %s112_s1 = inlined_call_operand.vmem [shape: f32[128], index: 1, kind: output, shape index: {}]  }
   0x1   :  { %v53_v0 = vld [vmem:[%s111_s0 + $0x7] sm:$0x1]   ;;  %v55_v1 = vld [vmem:[%s111_s0 + $0x5] sm:$0x1]   ;;  %v54_v2 = vld [vmem:[%s111_s0 + $0x6] sm:$0x1]  }
   0x2   :  { %7 = vrot.lane.b32.xlu0 %v53_v0, %s67_s10  ;;  %19 = vrot.lane.b32.xlu1 %v55_v1, %s68_s11  ;;  %v56_v3 = vld [vmem:[%s111_s0 + $0x4] sm:$0x1]   ;;  %v2_v4 = vld [vmem:[%s111_s0] sm:$0x1]   ;;  %s69_s18 = smov 96   ;;  %s70_s19 = smov 64  }
   0x3   :  { %4 = vst.msk [vmem:[#allocation0] sm:$0x1] %vm3_vm0, %v2_v4   ;;  %v57_v5 = vld [vmem:[%s111_s0 + $0x3] sm:$0x1]   ;;  %v58_v6 = vld [vmem:[%s111_s0 + $0x2] sm:$0x1]  }
   0x4   :  { %s71_s24 = smov 48   ;;  %s72_s25 = smov 32   ;;  %v59_v7 = vld [vmem:[%s111_s0 + $0x1] sm:$0x1]   ;;  %vm27_vm4 = vcmask 654848   ;;  %vm33_vm5 = vcmask 523648  }
   0x5   :  { %s73_s0 = smov 16   ;;  %vm39_vm6 = vcmask 392448   ;;  %vm45_vm7 = vcmask 261248  }
   0x6   :  { %13 = vrot.lane.b32.xlu0 %v54_v2, %s69_s18  ;;  %25 = vrot.lane.b32.xlu1 %v56_v3, %s70_s19 }
   0xa   :  { %31 = vrot.lane.b32.xlu0 %v57_v5, %s71_s24  ;;  %37 = vrot.lane.b32.xlu1 %v58_v6, %s72_s25 }
   0xe   :  { %43 = vrot.lane.b32.xlu0 %v59_v7, %s73_s0 }
  0x74   :  { %v8_v8 = vpop.permute.xlu0 %7   ;;  %v20_v9 = vpop.permute.xlu1 %19  }
  0x75   :  { %10 = vst.msk [vmem:[#allocation0] sm:$0x1] %vm9_vm1, %v8_v8  }
  0x78   :  { %v14_v10 = vpop.permute.xlu0 %13   ;;  %v26_v11 = vpop.permute.xlu1 %25  }
  0x79   :  { %16 = vst.msk [vmem:[#allocation0] sm:$0x1] %vm15_vm2, %v14_v10  }
  0x7a   :  { %22 = vst.msk [vmem:[#allocation0] sm:$0x1] %vm21_vm3, %v20_v9  }
  0x7b   :  { %28 = vst.msk [vmem:[#allocation0] sm:$0x1] %vm27_vm4, %v26_v11  }
  0x7c   :  { %v32_v12 = vpop.permute.xlu0 %31   ;;  %v38_v13 = vpop.permute.xlu1 %37  }
  0x7d   :  { %34 = vst.msk [vmem:[#allocation0] sm:$0x1] %vm33_vm5, %v32_v12  }
  0x7e   :  { %40 = vst.msk [vmem:[#allocation0] sm:$0x1] %vm39_vm6, %v38_v13  }
  0x80   :  { %v44_v14 = vpop.permute.xlu0 %43  }
  0x81   :  { %46 = vst.msk [vmem:[#allocation0] sm:$0x1] %vm45_vm7, %v44_v14  }
  0x88   :  { %v50_v15 = vld [vmem:[#allocation0] sm:$0x1] }
  0x89   :  { %52 = vst [vmem:[%s112_s1] sm:$0x1] %v50_v15 }

// kernel: tile.88
= control target key start
LH: loop header
LB: loop body
LE: loop exit
PB: predicated region body
PF: predicated region fallthrough
CT: control target
= control target key end

     0   :  { %s28_s0 = inlined_call_operand.vmem [shape: f32[16], index: 0, kind: input, shape index: {}]   ;;  %s29_s1 = inlined_call_operand.vmem [shape: f32[12,16], index: 1, kind: output, shape index: {}]  }
   0x1   :  { %v4_v0 = vld [vmem:[%s28_s0] ss:$0 sm:$0xff] }
   0x2   :  { %5 = vst [vmem:[%s29_s1] sm:$0xff] %v4_v0  ;;  %8 = vst [vmem:[%s29_s1 + $0x8] sm:$0xff] %v4_v0 }

// kernel: tile.89
= control target key start
LH: loop header
LB: loop body
LE: loop exit
PB: predicated region body
PF: predicated region fallthrough
CT: control target
= control target key end

     0   :  { %s77_s10 = smov 112   ;;  %s78_s11 = smov 80   ;;  %vm4_vm0 = vcmask 130048   ;;  %vm10_vm1 = vcmask 1048448   ;;  %vm16_vm2 = vcmask 917248   ;;  %vm22_vm3 = vcmask 786048   ;;  %s124_s0 = inlined_call_operand.vmem [shape: f32[12,16], index: 0, kind: input, shape index: {}]   ;;  %s125_s1 = inlined_call_operand.vmem [shape: f32[1,192], index: 1, kind: output, shape index: {}]  }
   0x1   :  { %v62_v0 = vld [vmem:[%s124_s0 + $0x7] sm:$0x1]   ;;  %v64_v1 = vld [vmem:[%s124_s0 + $0x5] sm:$0x1]   ;;  %v63_v2 = vld [vmem:[%s124_s0 + $0x6] sm:$0x1]  }
   0x2   :  { %8 = vrot.lane.b32.xlu0 %v62_v0, %s77_s10  ;;  %20 = vrot.lane.b32.xlu1 %v64_v1, %s78_s11  ;;  %v65_v3 = vld [vmem:[%s124_s0 + $0x4] sm:$0x1]   ;;  %s31_s16 = smov 3  ;;  %s38_s17 = smov 3  ;;  %vm28_vm4 = vcmask 654848   ;;  %vm35_vm5 = vcmask 523648  }
   0x3   :  { %s79_s18 = smov 96   ;;  %s80_s19 = smov 64   ;;  %v66_v4 = vld [vmem:[%s124_s0 + $0x3] ss:$8 sm:%s31_s16]   ;;  %v67_v5 = vld [vmem:[%s124_s0 + $0x2] ss:$8 sm:%s38_s17]  }
   0x4   :  { %s2_s22 = smov 3  ;;  %s45_s27 = smov 3  ;;  %vm42_vm6 = vcmask 392448   ;;  %vm49_vm7 = vcmask 261248  }
   0x5   :  { %v3_v6 = vld [vmem:[%s124_s0] ss:$8 sm:%s2_s22]   ;;  %s81_s28 = smov 48   ;;  %s82_s29 = smov 32   ;;  %v68_v7 = vld [vmem:[%s124_s0 + $0x1] ss:$8 sm:%s45_s27]  }
   0x6   :  { %14 = vrot.lane.b32.xlu0 %v63_v2, %s79_s18  ;;  %26 = vrot.lane.b32.xlu1 %v65_v3, %s80_s19  ;;  %5 = vst.msk [vmem:[#allocation0] ss:$8 sm:$0x3] %vm4_vm0, %v3_v6   ;;  %s83_s0 = smov 16  }
   0xa   :  { %33 = vrot.lane.b32.xlu0 %v66_v4, %s81_s28  ;;  %40 = vrot.lane.b32.xlu1 %v67_v5, %s82_s29 }
   0xe   :  { %47 = vrot.lane.b32.xlu0 %v68_v7, %s83_s0 }
  0x74   :  { %v9_v8 = vpop.permute.xlu0 %8   ;;  %v21_v9 = vpop.permute.xlu1 %20  }
  0x75   :  { %11 = vst.msk [vmem:[#allocation0] sm:$0x1] %vm10_vm1, %v9_v8  }
  0x78   :  { %v15_v10 = vpop.permute.xlu0 %14   ;;  %v27_v11 = vpop.permute.xlu1 %26  }
  0x79   :  { %17 = vst.msk [vmem:[#allocation0] sm:$0x1] %vm16_vm2, %v15_v10  }
  0x7a   :  { %23 = vst.msk [vmem:[#allocation0] sm:$0x1] %vm22_vm3, %v21_v9  }
  0x7b   :  { %29 = vst.msk [vmem:[#allocation0] sm:$0x1] %vm28_vm4, %v27_v11  }
  0x7c   :  { %v34_v12 = vpop.permute.xlu0 %33   ;;  %v41_v13 = vpop.permute.xlu1 %40  }
  0x7d   :  { %36 = vst.msk [vmem:[#allocation0] ss:$8 sm:$0x3] %vm35_vm5, %v34_v12  }
  0x7e   :  { %43 = vst.msk [vmem:[#allocation0] ss:$8 sm:$0x3] %vm42_vm6, %v41_v13  }
  0x80   :  { %v48_v14 = vpop.permute.xlu0 %47  }
  0x81   :  { %50 = vst.msk [vmem:[#allocation0] ss:$8 sm:$0x3] %vm49_vm7, %v48_v14  }
  0x88   :  { %v54_v15 = vld [vmem:[#allocation0] sm:$0x1]  ;;  %v58_v16 = vld [vmem:[#allocation0 + $0x8] sm:$0x1] }
  0x89   :  { %56 = vst [vmem:[%s125_s1] sm:$0x1] %v54_v15  ;;  %69 = vst [vmem:[%s125_s1 + $0x1] sm:$0x1] %v58_v16 }

// kernel: forward.7
= control target key start
LH: loop header
LB: loop body
LE: loop exit
PB: predicated region body
PF: predicated region fallthrough
CT: control target
= control target key end

     0   :  { %s1602_s21 = smov 0   ;;  %s1867_s0 = inlined_call_operand.vmem [shape: bf16[2,20,80], index: 0, kind: input, shape index: {}]   ;;  %s1868_s1 = inlined_call_operand.vmem [shape: bf16[5,80,160], index: 1, kind: input, shape index: {}]   ;;  %s1869_s2 = inlined_call_operand.vmem [shape: f32[1,160], index: 2, kind: input, shape index: {}]   ;;  %s1870_s3 = inlined_call_operand.vmem [shape: f32[1,160], index: 3, kind: input, shape index: {}]   ;;  %s1871_s4 = inlined_call_operand.vmem [shape: f32[8,16], index: 4, kind: input, shape index: {}]   ;;  %s1872_s5 = inlined_call_operand.vmem [shape: f32[128,64], index: 5, kind: input, shape index: {}]   ;;  %s1873_s6 = inlined_call_operand.vmem [shape: bf16[2,8,64], index: 6, kind: output, shape index: {}]  }
   0x1 LB: > { %s1205_s22 = sadd.s32 4294967295, %s1557_s21   ;;  %p1209_p0 = scmp.ge.s32.totalorder %s1557_s21, 1  ;;  %s1557_s21 = sphi %s1602_s21, %s16_s21  }
   0x2   : > { %p212_p1 = scmp.lt.s32.totalorder %s1557_s21, 3 }
   0x4   : > { %p213_p2 = pnand %p1209_p0, %p212_p1 }
   0x5   : > { %v1474_v0 = vld [vmem:[%s1868_s1 + $0x54] ss:$8 sps:$4 sm:$0xff] (!%p213_p2)   ;;  %v1476_v1 = vld [vmem:[%s1868_s1 + $0xa4] ss:$8 sps:$4 sm:$0xff] (!%p213_p2)   ;;  %v1559_v2 = vmov (!%p213_p2), 0   ;;  %p241_p3 = scmp.lt.s32.totalorder (!%p213_p2), %s1205_s22, 1 }
   0x6   : > { %216 = sbr.rel (%p213_p2) target bundleno = 866 (0x362), region = 44  ;;  %382 = vmatprep.mubr.bf16.mxu1 (!%p213_p2), %v1559_v2  ;;  %588 = vmatprep.mubr.bf16.mxu0 (!%p213_p2), %v1559_v2  ;;  %v1478_v3 = vld [vmem:[%s1868_s1 + $0x50] ss:$8 sps:$4 sm:$0xff] (!%p213_p2)   ;;  %v1479_v4 = vld [vmem:[%s1868_s1 + $0xa0] ss:$8 sps:$4 sm:$0xff] (!%p213_p2)   ;;  %vm499_vm0 = vcmask (!%p213_p2), 1046528  }
   0x7   : > { %350 = vmatprep.subr.bf16.mxu1 (!%p213_p2), %v1474_v0  ;;  %556 = vmatprep.subr.bf16.mxu0 (!%p213_p2), %v1476_v1  ;;  %v1480_v5 = vld [vmem:[%s1868_s1 + $0x64] ss:$8 sps:$4 sm:$0xff] (!%p213_p2)   ;;  %v1482_v6 = vld [vmem:[%s1868_s1 + $0xb4] ss:$8 sps:$4 sm:$0xff] (!%p213_p2)   ;;  %v1484_v7 = vld [vmem:[%s1868_s1 + $0x60] ss:$8 sps:$4 sm:$0xff] (!%p213_p2)  }
   0x8   : > { %351 = vmatpush1.bf16.msra.mxu1 (!%p213_p2), %v1478_v3  ;;  %557 = vmatpush1.bf16.msra.mxu0 (!%p213_p2), %v1479_v4  ;;  %v1485_v8 = vld [vmem:[%s1868_s1 + $0xb0] ss:$8 sps:$4 sm:$0xff] (!%p213_p2)   ;;  %v1486_v9 = vld [vmem:[%s1868_s1 + $0x74] ss:$8 sps:$4 sm:$0xff] (!%p213_p2)   ;;  %v1488_v10 = vld [vmem:[%s1868_s1 + $0xc4] ss:$8 sps:$4 sm:$0xff] (!%p213_p2)  }
   0x9   : > { %352 = vmatprep.subr.bf16.mxu1 (!%p213_p2), %v1480_v5  ;;  %558 = vmatprep.subr.bf16.mxu0 (!%p213_p2), %v1482_v6  ;;  %v1490_v11 = vld [vmem:[%s1868_s1 + $0x70] ss:$8 sps:$4 sm:$0xff] (!%p213_p2)   ;;  %v1491_v12 = vld [vmem:[%s1868_s1 + $0xc0] ss:$8 sps:$4 sm:$0xff] (!%p213_p2)   ;;  %v1492_v13 = vld [vmem:[%s1868_s1 + $0x84] ss:$8 sps:$4 sm:$0xff] (!%p213_p2)  }
   0xa   : > { %v1494_v14 = vld [vmem:[%s1868_s1 + $0xd4] ss:$8 sps:$4 sm:$0xff] (!%p213_p2)   ;;  %v1496_v15 = vld [vmem:[%s1868_s1 + $0x80] ss:$8 sps:$4 sm:$0xff] (!%p213_p2)   ;;  %v1497_v16 = vld [vmem:[%s1868_s1 + $0xd0] ss:$8 sps:$4 sm:$0xff] (!%p213_p2)  }
   0xb   : > { %v1498_v17 = vld [vmem:[%s1868_s1 + $0x94] ss:$8 sps:$4 sm:$0xff] (!%p213_p2)   ;;  %v1500_v18 = vld [vmem:[%s1868_s1 + $0xe4] ss:$8 sps:$4 sm:$0xff] (!%p213_p2)   ;;  %v1502_v19 = vld [vmem:[%s1868_s1 + $0x90] ss:$8 sps:$4 sm:$0xff] (!%p213_p2)  }
   0xc   : > { %353 = vmatpush1.bf16.msra.mxu1 (!%p213_p2), %v1484_v7  ;;  %559 = vmatpush1.bf16.msra.mxu0 (!%p213_p2), %v1485_v8  ;;  %v1503_v20 = vld [vmem:[%s1868_s1 + $0xe0] ss:$8 sps:$4 sm:$0xff] (!%p213_p2)   ;;  %v1506_v21 = vld [vmem:[%s1868_s1 + $0x4] ss:$8 sps:$4 sm:$0xff] (!%p213_p2)   ;;  %v1509_v22 = vld [vmem:[%s1868_s1 + $0xf4] ss:$8 sps:$4 sm:$0xff] (!%p213_p2)  }
   0xd   : > { %s1875_s22 = smov (!%p241_p3, %s1205_s22), 1  ;;  %354 = vmatprep.subr.bf16.mxu1 %v1486_v9  ;;  %560 = vmatprep.subr.bf16.mxu0 %v1488_v10  ;;  %v1507_v29 = vld [vmem:[%s1868_s1 + $0xf0] ss:$8 sps:$4 sm:$0xff]   ;;  %vm346_vm1 = vcmask 654336   ;;  %v1517_v33 = vld [vmem:[%s1868_s1 + $0x104] ss:$8 sps:$4 sm:$0xff]  }
   0xe   : > { %s1417_s29 = smul.u32 12, %s1875_s22  ;;  %vm283_vm2 = vsmask.f32 7424  ;;  %v1504_v35 = vld [vmem:[%s1868_s1] ss:$8 sps:$4 sm:$0xff]   ;;  %vm735_vm4 = vcmask 1045504  }
   0xf   : > { %v1514_v37 = vld [vmem:[%s1868_s1 + $0x14] ss:$8 sps:$4 sm:$0xff]   ;;  %v1515_v38 = vld [vmem:[%s1868_s1 + $0x100] ss:$8 sps:$4 sm:$0xff]   ;;  %v1512_v41 = vld [vmem:[%s1868_s1 + $0x10] ss:$8 sps:$4 sm:$0xff]  }
  0x10   : > { %355 = vmatpush1.bf16.msra.mxu1 %v1490_v11  ;;  %561 = vmatpush1.bf16.msra.mxu0 %v1491_v12  ;;  %s245_s20 = scalar_lea.vmem %s1867_s0, %s1417_s29  ;;  %v1523_v40 = vld [vmem:[%s1868_s1 + $0x114] ss:$8 sps:$4 sm:$0xff]   ;;  %v1520_v42 = vld [vmem:[%s1868_s1 + $0x24] ss:$8 sps:$4 sm:$0xff]   ;;  %v1521_v43 = vld [vmem:[%s1868_s1 + $0x110] ss:$8 sps:$4 sm:$0xff]  }
  0x11   : > { %356 = vmatprep.subr.bf16.mxu1 %v1492_v13  ;;  %562 = vmatprep.subr.bf16.mxu0 %v1494_v14  ;;  %v1684_v23 = vld [vmem:[%s245_s20] sm:$0xff]   ;;  %v1686_v24 = vld [vmem:[%s245_s20 + $0x8] ss:$0 sps:$4 sm:$0x33]   ;;  %v1526_v50 = vld [vmem:[%s1868_s1 + $0x34] ss:$8 sps:$4 sm:$0xff]   ;;  %v841_v14 = vlaneseq }
  0x12   : > { %v285_v25 = vshrl.u32 %v1684_v23, 16  ;;  %v287_v26 = vshll.u32 %v1684_v23, 16  ;;  %v292_v27 = vshll.u32 %v1686_v24, 16  ;;  %v500_v28 = vrot.slane %v1684_v23, 1  ;;  %v1529_v45 = vld [vmem:[%s1868_s1 + $0x124] ss:$8 sps:$4 sm:$0xff]  }
  0x13   : > { %v501_v30 = vrot.slane %v1686_v24, 1  ;;  %v618_v44 = vshrl.u32 %v1686_v24, 16  ;;  %v1518_v48 = vld [vmem:[%s1868_s1 + $0x20] ss:$8 sps:$4 sm:$0xff]   ;;  %v1535_v53 = vld [vmem:[%s1868_s1 + $0x134] ss:$8 sps:$4 sm:$0xff]  }
  0x14   : > { %357 = vmatpush1.bf16.msra.mxu1 %v1496_v15  ;;  %563 = vmatpush1.bf16.msra.mxu0 %v1497_v16  ;;  %v289_v31 = vrot.slane %v287_v26, 1  ;;  %v294_v32 = vrot.slane %v292_v27, 1  ;;  %v615_v46 = vrot.slane %v285_v25, 1  ;;  %v621_v47 = vrot.slane %v292_v27, 2  ;;  %v1527_v51 = vld [vmem:[%s1868_s1 + $0x120] ss:$8 sps:$4 sm:$0xff]  }
  0x15   : > { %358 = vmatprep.subr.bf16.mxu1 %v1498_v17  ;;  %564 = vmatprep.subr.bf16.mxu0 %v1500_v18  ;;  %v502_v34 = vsel %vm499_vm0, %v500_v28, %v501_v30  ;;  %v616_v49 = vrot.slane %v287_v26, 2  ;;  %v620_v52 = vrot.slane %v618_v44, 1  ;;  %v1524_v54 = vld [vmem:[%s1868_s1 + $0x30] ss:$8 sps:$4 sm:$0xff]   ;;  %v1532_v55 = vld [vmem:[%s1868_s1 + $0x44] ss:$8 sps:$4 sm:$0xff]  }
  0x16   : > { %v290_v36 = vor.u32 %v289_v31, %v285_v25  ;;  %v1533_v56 = vld [vmem:[%s1868_s1 + $0x130] ss:$8 sps:$4 sm:$0xff]   ;;  %v1538_v59 = vld [vmem:[%s1868_s1 + $0x144] ss:$8 sps:$4 sm:$0xff]   ;;  %vm614_vm3 = vsmask.f32 6400 }
  0x17   : > { %v617_v57 = vor.u32 %v616_v49, %v615_v46  ;;  %v622_v58 = vor.u32 %v621_v47, %v620_v52  ;;  %v1530_v60 = vld [vmem:[%s1868_s1 + $0x40] ss:$8 sps:$4 sm:$0xff]   ;;  %v1541_v63 = vld [vmem:[%s1868_s1 + $0x154] ss:$8 sps:$4 sm:$0xff]   ;;  %v1539_v0 = vld [vmem:[%s1868_s1 + $0x150] ss:$8 sps:$4 sm:$0xff]  }
  0x18   : > { %359 = vmatpush1.bf16.msra.mxu1 %v1502_v19  ;;  %565 = vmatpush1.bf16.msra.mxu0 %v1503_v20  ;;  %v295_v39 = vsel %vm283_vm2, %v290_v36, %v294_v32  ;;  %v1536_v61 = vld [vmem:[%s1868_s1 + $0x140] ss:$8 sps:$4 sm:$0xff]   ;;  %v1544_v1 = vld [vmem:[%s1868_s1 + $0x164] ss:$8 sps:$4 sm:$0xff]   ;;  %v1547_v4 = vld [vmem:[%s1868_s1 + $0x174] ss:$8 sps:$4 sm:$0xff]  }
  0x19   : > { %445 = vmatprep.subr.bf16.mxu1 %v1506_v21  ;;  %677 = vmatprep.subr.bf16.mxu0 %v1509_v22  ;;  %v623_v62 = vsel %vm614_vm3, %v617_v57, %v622_v58  ;;  %v1542_v3 = vld [vmem:[%s1868_s1 + $0x160] ss:$8 sps:$4 sm:$0xff]   ;;  %v1550_v5 = vld [vmem:[%s1868_s1 + $0x184] ss:$8 sps:$4 sm:$0xff]   ;;  %v736_v7 = vrot.slane %v1684_v23, 2  ;;  %v737_v8 = vrot.slane %v1686_v24, 2 }
  0x1a   : > { %v1548_v6 = vld [vmem:[%s1868_s1 + $0x180] ss:$8 sps:$4 sm:$0xff]   ;;  %v842_v15 = vshrl.u32 %v841_v14, 7  ;;  %s1560_s19 = smov 112   ;;  %s1561_s20 = smov 120   ;;  %vm1565_vm5 = vmmov 0  }
  0x1b   : > { %1266 = vmatmul.mubr.msk.bf16.vlgmr.msra.gmra.mrb[0].mxu0 %vm346_vm1, %v502_v34  ;;  %1234 = vmatmul.mubr.msk.bf16.vlgmr.msra.gmra.mrb[0].mxu1 %vm346_vm1, %v295_v39  ;;  %v738_v9 = vsel %vm735_vm4, %v736_v7, %v737_v8  ;;  %v839_v17 = vld [vmem:[%s1869_s2] sm:$0x3]  ;;  %s1562_s23 = smov 104   ;;  %s1563_s24 = smov 96   ;;  %v1065_v46 = vld [vmem:[%s1872_s5 + $0x10] sm:$0xff]  ;;  %v1072_v57 = vld [vmem:[%s1872_s5 + $0x48] sm:$0xff] }
  0x1c   : > { %678 = vmatpush1.bf16.msra.mxu0 %v1507_v29  ;;  %709 = vmatprep.mubr.bf16.mxu0 %v1559_v2  ;;  %v843_v16 = vsub.s32 0, %v842_v15  ;;  %v847_v18 = vsub.s32 1, %v842_v15  ;;  %v855_v19 = vld [vmem:[%s1870_s3] sm:$0x3]  ;;  %vm883_vm6 = vcmask 982016   ;;  %vm898_vm7 = vcmask 916480  }
  0x1d   : > { %679 = vmatprep.subr.bf16.mxu0 %v1517_v33  ;;  %446 = vmatpush1.bf16.msra.mxu1 %v1504_v35  ;;  %v1063_v44 = vld [vmem:[%s1872_s5] sm:$0xff]  ;;  %vm913_vm8 = vcmask 850944   ;;  %vm928_vm9 = vcmask 785408   ;;  %vm937_vm10 = vcmask 1041408   ;;  %vm968_vm11 = vcmask 1044480   ;;  %s1211_s13 = sshll.u32 %s1875_s22, 2 }
  0x1e   : > { %477 = vmatprep.mubr.bf16.mxu1 %v1559_v2  ;;  %447 = vmatprep.subr.bf16.mxu1 %v1514_v37  ;;  %v844_v20 = vrot.slane %v839_v17, %v843_v16  ;;  %v848_v22 = vrot.slane %v839_v17, %v847_v18  ;;  %v860_v24 = vrot.slane %v855_v19, %v843_v16  ;;  %vm978_vm12 = vcmask 1043456   ;;  %s249_s16 = scalar_lea.vmem %s1873_s6, %s1211_s13 }
  0x1f   : > { %v864_v27 = vrot.slane %v855_v19, %v847_v18  ;;  %vm989_vm13 = vcmask 130048   ;;  %vm1150_vm14 = vcmask 519168  }
  0x20   : > { %680 = vmatpush1.bf16.msra.mxu0 %v1515_v38 }
  0x21   : > { %681 = vmatprep.subr.bf16.mxu0 %v1523_v40  ;;  %448 = vmatpush1.bf16.msra.mxu1 %v1512_v41 }
  0x22   : > { %449 = vmatprep.subr.bf16.mxu1 %v1520_v42  ;;  %v1564_v42 = vmov 0.0|0.0  }
  0x24   : > { %682 = vmatpush1.bf16.msra.mxu0 %v1521_v43  ;;  %v1566_v43 = vmov 0.0  }
  0x25   : > { %683 = vmatprep.subr.bf16.mxu0 %v1529_v45  ;;  %450 = vmatpush1.bf16.msra.mxu1 %v1518_v48  ;;  %v1064_v45 = vld [vmem:[%s1872_s5 + $0x8] sm:$0xff]  ;;  %v1066_v48 = vld [vmem:[%s1872_s5 + $0x18] sm:$0xff] }
  0x26   : > { %451 = vmatprep.subr.bf16.mxu1 %v1526_v50  ;;  %v1378_v47 = vpack.c.bf16 %v1064_v45, %v1063_v44  ;;  %v1381_v49 = vpack.c.bf16 %v1066_v48, %v1065_v46  ;;  %v1067_v50 = vld [vmem:[%s1872_s5 + $0x20] sm:$0xff] }
  0x28   : > { %684 = vmatpush1.bf16.msra.mxu0 %v1527_v51  ;;  %v1068_v51 = vld [vmem:[%s1872_s5 + $0x28] sm:$0xff] }
  0x29   : > { %685 = vmatprep.subr.bf16.mxu0 %v1535_v53  ;;  %452 = vmatpush1.bf16.msra.mxu1 %v1524_v54  ;;  %v1384_v52 = vpack.c.bf16 %v1068_v51, %v1067_v50  ;;  %v1069_v53 = vld [vmem:[%s1872_s5 + $0x30] sm:$0xff]  ;;  %v1070_v54 = vld [vmem:[%s1872_s5 + $0x38] sm:$0xff] }
  0x2a   : > { %453 = vmatprep.subr.bf16.mxu1 %v1532_v55  ;;  %v1387_v55 = vpack.c.bf16 %v1070_v54, %v1069_v53 }
  0x2c   : > { %686 = vmatpush1.bf16.msra.mxu0 %v1533_v56  ;;  %v1071_v56 = vld [vmem:[%s1872_s5 + $0x40] sm:$0xff] }
  0x2d   : > { %792 = vmatprep.subr.bf16.mxu0 %v1538_v59  ;;  %454 = vmatpush1.bf16.msra.mxu1 %v1530_v60  ;;  %v1390_v58 = vpack.c.bf16 %v1072_v57, %v1071_v56  ;;  %v1073_v59 = vld [vmem:[%s1872_s5 + $0x50] sm:$0xff]  ;;  %v1074_v60 = vld [vmem:[%s1872_s5 + $0x58] sm:$0xff] }
  0x2e   : > { %1377 = vmatprep.subr.bf16.mxu1 %v1564_v42 }
  0x2f   : > { %1287 = vmatmul.mubr.msk.bf16.vlgmr.msra.gmra.mrb[0].mxu0 %vm346_vm1, %v623_v62  ;;  %v1075_v62 = vld [vmem:[%s1872_s5 + $0x60] sm:$0xff] }
  0x30   : > { %793 = vmatpush1.bf16.msra.mxu0 %v1536_v61  ;;  %824 = vmatprep.mubr.bf16.mxu0 %v1559_v2  ;;  %v1545_v2 = vld [vmem:[%s1868_s1 + $0x170] ss:$8 sps:$4 sm:$0xff]   ;;  %v1393_v61 = vpack.c.bf16 %v1074_v60, %v1073_v59 }
  0x31   : > { %794 = vmatprep.subr.bf16.mxu0 %v1541_v63  ;;  %1245 = vmatmul.mubr.msk.bf16.vlgmr.msra.gmra.mrb[0].mxu1 %vm346_vm1, %v1684_v23  ;;  %v1076_v63 = vld [vmem:[%s1872_s5 + $0x68] sm:$0xff] }
  0x32   : > { %1371 = vmatprep.mubr.msk.f32.mxu1 %vm1565_vm5, %v1566_v43  ;;  %1379 = vmatpush3.bf16.msra.mxu1 %v1378_v47 }
  0x33   : > { %1380 = vmatprep.subr.bf16.mxu1 %v1564_v42 }
  0x34   : > { %795 = vmatpush1.bf16.msra.mxu0 %v1539_v0  ;;  %v1396_v0 = vpack.c.bf16 %v1076_v63, %v1075_v62 }
  0x35   : > { %796 = vmatprep.subr.bf16.mxu0 %v1544_v1  ;;  %v1077_v1 = vld [vmem:[%s1872_s5 + $0x70] sm:$0xff] }
  0x36   : > { %1382 = vmatpush3.bf16.msra.mxu1 %v1381_v49 }
  0x37   : > { %1383 = vmatprep.subr.bf16.mxu1 %v1564_v42 }
  0x38   : > { %797 = vmatpush1.bf16.msra.mxu0 %v1542_v3  ;;  %v1078_v3 = vld [vmem:[%s1872_s5 + $0x78] sm:$0xff] }
  0x39   : > { %798 = vmatprep.subr.bf16.mxu0 %v1547_v4  ;;  %v1399_v4 = vpack.c.bf16 %v1078_v3, %v1077_v1 }
  0x3a   : > { %1385 = vmatpush3.bf16.msra.mxu1 %v1384_v52 }
  0x3b   : > { %1386 = vmatprep.subr.bf16.mxu1 %v1564_v42 }
  0x3c   : > { %799 = vmatpush1.bf16.msra.mxu0 %v1545_v2 }
  0x3d   : > { %800 = vmatprep.subr.bf16.mxu0 %v1550_v5 }
  0x3e   : > { %1388 = vmatpush3.bf16.msra.mxu1 %v1387_v55 }
  0x3f   : > { %1389 = vmatprep.subr.bf16.mxu1 %v1564_v42 }
  0x40   : > { %801 = vmatpush1.bf16.msra.mxu0 %v1548_v6 }
  0x41   : > { %1374 = vmatprep.subr.bf16.mxu0 %v1564_v42 }
  0x42   : > { %1391 = vmatpush3.bf16.msra.mxu1 %v1390_v58 }
  0x43   : > { %1308 = vmatmul.mubr.msk.bf16.vlgmr.msra.gmra.mrb[0].mxu0 %vm346_vm1, %v738_v9  ;;  %1392 = vmatprep.subr.bf16.mxu1 %v1564_v42 }
  0x44   : > { %1336 = vmatprep.mubr.msk.f32.mxu0 %vm1565_vm5, %v1566_v43 }
  0x46   : > { %1394 = vmatpush3.bf16.msra.mxu1 %v1393_v61 }
  0x47   : > { %1395 = vmatprep.subr.bf16.mxu1 %v1564_v42 }
  0x4a   : > { %1397 = vmatpush3.bf16.msra.mxu1 %v1396_v0 }
  0x4b   : > { %1398 = vmatprep.subr.bf16.mxu1 %v1564_v42 }
  0x4e   : > { %1400 = vmatpush3.bf16.msra.mxu1 %v1399_v4 }
 0x104   : > { %v479_v10 = vpop.f32.mrb[0].mxu1 }
 0x105   : > { %v481_v11 = vpop.f32.mrb[1].mxu1 }
 0x106   : > { %v483_v12 = vpop.f32.mrb[2].mxu1 }
 0x107   : > { %v485_v13 = vpop.f32.mrb[3].mxu1 }
 0x116   : > { %v826_v21 = vpop.f32.mrb[0].mxu0 }
 0x117   : > { %v1401_v23 = vadd.f32 %v826_v21, %v479_v10  ;;  %v828_v25 = vpop.f32.mrb[1].mxu0 }
 0x118   : > { %v1402_v26 = vadd.f32 %v828_v25, %v481_v11  ;;  %v830_v28 = vpop.f32.mrb[2].mxu0 }
 0x119   : > { %v851_v29 = vmul.f32 %v1401_v23, %v844_v20  ;;  %v1403_v30 = vadd.f32 %v830_v28, %v483_v12  ;;  %v832_v31 = vpop.f32.mrb[3].mxu0 }
 0x11a   : > { %v852_v32 = vmul.f32 %v1402_v26, %v848_v22  ;;  %v1404_v33 = vadd.f32 %v832_v31, %v485_v13 }
 0x11b   : > { %v1797_v34 = vadd.f32 %v860_v24, %v851_v29  ;;  %v853_v35 = vmul.f32 %v1403_v30, %v844_v20 }
 0x11c   : > { %v868_v36 = vadd.f32 %v864_v27, %v852_v32  ;;  %v854_v37 = vmul.f32 %v1404_v33, %v848_v22 }
 0x11d   : > { %v1799_v38 = vadd.f32 %v860_v24, %v853_v35 }
 0x11e   : > { %v870_v39 = vadd.f32 %v864_v27, %v854_v37  ;;  %v1439_v40 = vpack.i.bf16 %v868_v36, %v1797_v34 }
 0x120   : > { %1440 = vrot.lane.b32.xlu1 %v1439_v40, %s1560_s19  ;;  %1435 = vrot.lane.b32.xlu0 %v1439_v40, %s1561_s20  ;;  %v1454_v41 = vpack.i.bf16 %v870_v39, %v1799_v38 }
 0x124   : > { %1455 = vrot.lane.b32.xlu1 %v1454_v41, %s1560_s19  ;;  %1445 = vrot.lane.b32.xlu0 %v1454_v41, %s1561_s20 }
 0x128   : > { %1460 = vrot.lane.b32.xlu1 %v1454_v41, %s1562_s23  ;;  %1450 = vrot.lane.b32.xlu0 %v1439_v40, %s1562_s23 }
 0x12c   : > { %1470 = vrot.lane.b32.xlu1 %v1454_v41, %s1563_s24  ;;  %1465 = vrot.lane.b32.xlu0 %v1439_v40, %s1563_s24 }
 0x192   : > { %v1441_v2 = vpop.permute.xlu1 %1440  ;;  %v1436_v5 = vpop.permute.xlu0 %1435 }
 0x193   : > { %v1438_v6 = vunpack.i.h.bf16 %v1436_v5  ;;  %v1437_v7 = vunpack.i.l.bf16 %v1436_v5  ;;  %v1443_v15 = vunpack.i.h.bf16 %v1441_v2  ;;  %v1442_v16 = vunpack.i.l.bf16 %v1441_v2 }
 0x195   : > { %v884_v8 = vsel %vm883_vm6, %v1437_v7, %v1438_v6  ;;  %v899_v28 = vsel %vm898_vm7, %v1442_v16, %v1443_v15 }
 0x196   : > { %v1456_v9 = vpop.permute.xlu1 %1455  ;;  %v1446_v10 = vpop.permute.xlu0 %1445  ;;  %v888_v18 = vmax.f32 %v1797_v34, %v884_v8 }
 0x197   : > { %v1458_v11 = vunpack.i.h.bf16 %v1456_v9  ;;  %v1457_v12 = vunpack.i.l.bf16 %v1456_v9  ;;  %v1448_v13 = vunpack.i.h.bf16 %v1446_v10  ;;  %v1447_v14 = vunpack.i.l.bf16 %v1446_v10 }
 0x198   : > { %v903_v31 = vmax.f32 %v888_v18, %v899_v28 }
 0x199   : > { %v885_v17 = vsel %vm883_vm6, %v1447_v14, %v1448_v13  ;;  %v900_v19 = vsel %vm898_vm7, %v1457_v12, %v1458_v11  ;;  %v988_v14 = vld [vmem:[%s1871_s4] sm:$0xff] }
 0x19a   : > { %v889_v20 = vmax.f32 %v1799_v38, %v885_v17  ;;  %v1461_v21 = vpop.permute.xlu1 %1460  ;;  %v1451_v22 = vpop.permute.xlu0 %1450 }
 0x19b   : > { %v1463_v23 = vunpack.i.h.bf16 %v1461_v21  ;;  %v1462_v24 = vunpack.i.l.bf16 %v1461_v21  ;;  %v1453_v25 = vunpack.i.h.bf16 %v1451_v22  ;;  %v1452_v26 = vunpack.i.l.bf16 %v1451_v22 }
 0x19c   : > { %v904_v27 = vmax.f32 %v889_v20, %v900_v19 }
 0x19d   : > { %v915_v29 = vsel %vm913_vm8, %v1462_v24, %v1463_v23  ;;  %v914_v30 = vsel %vm913_vm8, %v1452_v26, %v1453_v25 }
 0x19e   : > { %v1471_v32 = vpop.permute.xlu1 %1470  ;;  %v1466_v33 = vpop.permute.xlu0 %1465  ;;  %v919_v38 = vmax.f32 %v904_v27, %v915_v29  ;;  %v918_v39 = vmax.f32 %v903_v31, %v914_v30 }
 0x19f   : > { %v1473_v35 = vunpack.i.h.bf16 %v1471_v32  ;;  %v1472_v34 = vunpack.i.l.bf16 %v1471_v32  ;;  %v1468_v36 = vunpack.i.h.bf16 %v1466_v33  ;;  %v1467_v37 = vunpack.i.l.bf16 %v1466_v33 }
 0x1a1   : > { %v930_v40 = vsel %vm928_vm9, %v1472_v34, %v1473_v35  ;;  %v929_v41 = vsel %vm928_vm9, %v1467_v37, %v1468_v36 }
 0x1a2   : > { %v934_v42 = vmax.f32 %v919_v38, %v930_v40  ;;  %v933_v43 = vmax.f32 %v918_v39, %v929_v41 }
 0x1a4   : > { %v939_v44 = vrot.slane %v934_v42, 6  ;;  %v938_v45 = vrot.slane %v933_v43, 6 }
 0x1a6   : > { %v945_v46 = vsel %vm937_vm10, %v939_v44, -1e+30  ;;  %v940_v47 = vsel %vm937_vm10, %v938_v45, %v939_v44  ;;  %v944_v48 = vsel %vm937_vm10, -1e+30, %v938_v45 }
 0x1a7   : > { %v952_v49 = vrot.slane %v945_v46, 1  ;;  %v962_v50 = vrot.slane %v945_v46, 2  ;;  %v949_v51 = vrot.slane %v944_v48, 1  ;;  %v950_v52 = vrot.slane %v940_v47, 1 }
 0x1a8   : > { %v959_v53 = vrot.slane %v944_v48, 2  ;;  %v960_v54 = vrot.slane %v940_v47, 2  ;;  %v972_v55 = vrot.slane %v945_v46, 3  ;;  %v969_v57 = vrot.slane %v944_v48, 3 }
 0x1a9   : > { %v951_v56 = vsel %vm499_vm0, %v949_v51, %v950_v52  ;;  %v953_v58 = vsel %vm499_vm0, %v950_v52, %v952_v49  ;;  %v970_v59 = vrot.slane %v940_v47, 3  ;;  %v982_v60 = vrot.slane %v945_v46, 4 }
 0x1aa   : > { %v956_v61 = vmax.f32 %v944_v48, %v951_v56  ;;  %v957_v62 = vmax.f32 %v940_v47, %v953_v58  ;;  %v979_v63 = vrot.slane %v944_v48, 4  ;;  %v961_v0 = vsel %vm735_vm4, %v959_v53, %v960_v54 }
 0x1ab   : > { %v963_v1 = vsel %vm735_vm4, %v960_v54, %v962_v50  ;;  %v980_v3 = vrot.slane %v940_v47, 4  ;;  %v971_v5 = vsel %vm968_vm11, %v969_v57, %v970_v59  ;;  %v973_v6 = vsel %vm968_vm11, %v970_v59, %v972_v55 }
 0x1ac   : > { %v966_v4 = vmax.f32 %v956_v61, %v961_v0  ;;  %v967_v2 = vmax.f32 %v957_v62, %v963_v1 }
 0x1ad   : > { %v981_v9 = vsel %vm978_vm12, %v979_v63, %v980_v3  ;;  %v983_v10 = vsel %vm978_vm12, %v980_v3, %v982_v60 }
 0x1ae   : > { %v976_v7 = vmax.f32 %v966_v4, %v971_v5  ;;  %v977_v8 = vmax.f32 %v967_v2, %v973_v6 }
 0x1b0   : > { %v986_v11 = vmax.f32 %v976_v7, %v981_v9  ;;  %v987_v12 = vmax.f32 %v977_v8, %v983_v10 }
 0x1b2   : > { %v1375_v13 = vpack.c.bf16 %v987_v12, %v986_v11 }
 0x1b4   : > { %1376 = vmatpush3.bf16.msra.mxu0 %v1375_v13 }
 0x1b7   : > { %1337 = vmatmul.mubr.msk.f32.vlgmr.msra.gmra.mrb[4].mxu0 %vm989_vm13, %v988_v14 }
 0x28a   : > { %v1059_v15 = vpop.f32.mrb[4].mxu0 }
 0x28b   : > { %v1338_v16 = vpop.f32.mrb[5].mxu0  ;;  %1372 = vmatmul.mubr.f32.vlgmr.msra.gmra.mrb[4].mxu1 %v1059_v15 }
 0x35e   : > { %v1145_v17 = vpop.f32.mrb[4].mxu1 }
 0x35f   : > { %v1149_v18 = vpack.c.bf16 %v1145_v17, %v1145_v17  ;;  %v1373_v19 = vpop.f32.mrb[5].mxu1 }
 0x361   : > { %1151 = vst.msk [vmem:[%s249_s16] sm:$0xf] %vm1150_vm14, %v1149_v18 }
 0x362 PF: > { %s16_s21 = sadd.s32 1, %s1557_s21  }
 0x363   : > { %p13_p4 = scmp.ge.s32.totalorder %s16_s21, 4  }
 0x365   :  { %15 = sbr.rel (!%p13_p4) target bundleno = 1 (0x1), region = 78 }

// kernel: tile.103
= control target key start
LH: loop header
LB: loop body
LE: loop exit
PB: predicated region body
PF: predicated region fallthrough
CT: control target
= control target key end

     0   :  { %s22_s0 = inlined_call_operand.vmem [shape: f32[16], index: 0, kind: input, shape index: {}]   ;;  %s23_s1 = inlined_call_operand.vmem [shape: f32[4,16], index: 1, kind: output, shape index: {}]  }
   0x1   :  { %v4_v0 = vld [vmem:[%s22_s0] ss:$0 sm:$0xff] }
   0x2   :  { %5 = vst [vmem:[%s23_s1] sm:$0xf] %v4_v0 }

// kernel: tile.104
= control target key start
LH: loop header
LB: loop body
LE: loop exit
PB: predicated region body
PF: predicated region fallthrough
CT: control target
= control target key end

     0   :  { %vm7_vm0 = vcmask 130048   ;;  %s37_s8 = smov 16   ;;  %s38_s9 = smov 32   ;;  %vm13_vm1 = vcmask 523648   ;;  %vm19_vm2 = vcmask 392448   ;;  %vm25_vm3 = vcmask 261248   ;;  %s55_s0 = inlined_call_operand.vmem [shape: f32[4,16], index: 0, kind: input, shape index: {}]   ;;  %s56_s1 = inlined_call_operand.vmem [shape: f32[64], index: 1, kind: output, shape index: {}]  }
   0x1   :  { %v4_v0 = vld [vmem:[%s55_s0] sm:$0xf]  ;;  %s36_s0 = smov 48  }
   0x2   :  { %5 = vst [vmem:[#allocation1] sm:$0xf] %v4_v0 }
   0x9   :  { %v10_v1 = vld [vmem:[#allocation1 + $0x3] sm:$0x1]   ;;  %v22_v2 = vld [vmem:[#allocation1 + $0x1] sm:$0x1]   ;;  %v6_v3 = vld [vmem:[#allocation1] sm:$0x1]  }
   0xa   :  { %11 = vrot.lane.b32.xlu0 %v10_v1, %s36_s0  ;;  %23 = vrot.lane.b32.xlu1 %v22_v2, %s37_s8  ;;  %v16_v4 = vld [vmem:[#allocation1 + $0x2] sm:$0x1]   ;;  %8 = vst.msk [vmem:[#allocation0] sm:$0x1] %vm7_vm0, %v6_v3  }
   0xe   :  { %17 = vrot.lane.b32.xlu0 %v16_v4, %s38_s9 }
  0x7c   :  { %v12_v5 = vpop.permute.xlu0 %11   ;;  %v24_v6 = vpop.permute.xlu1 %23  }
  0x7d   :  { %14 = vst.msk [vmem:[#allocation0] sm:$0x1] %vm13_vm1, %v12_v5  }
  0x80   :  { %v18_v7 = vpop.permute.xlu0 %17  }
  0x81   :  { %20 = vst.msk [vmem:[#allocation0] sm:$0x1] %vm19_vm2, %v18_v7  }
  0x82   :  { %26 = vst.msk [vmem:[#allocation0] sm:$0x1] %vm25_vm3, %v24_v6  }
  0x89   :  { %v30_v8 = vld [vmem:[#allocation0] sm:$0x1] }
  0x8a   :  { %32 = vst [vmem:[%s56_s1] sm:$0x1] %v30_v8 }

// kernel: forward.8
= control target key start
LH: loop header
LB: loop body
LE: loop exit
PB: predicated region body
PF: predicated region fallthrough
CT: control target
= control target key end

     0   :  { %s1552_s21 = smov 0   ;;  %s1842_s0 = inlined_call_operand.vmem [shape: bf16[2,12,96], index: 0, kind: input, shape index: {}]   ;;  %s1843_s1 = inlined_call_operand.vmem [shape: bf16[5,96,192], index: 1, kind: input, shape index: {}]   ;;  %s1844_s2 = inlined_call_operand.vmem [shape: f32[1,192], index: 2, kind: input, shape index: {}]   ;;  %s1845_s3 = inlined_call_operand.vmem [shape: f32[1,192], index: 3, kind: input, shape index: {}]   ;;  %s1846_s4 = inlined_call_operand.vmem [shape: f32[4,8], index: 4, kind: input, shape index: {}]   ;;  %s1847_s5 = inlined_call_operand.vmem [shape: f32[128,64], index: 5, kind: input, shape index: {}]   ;;  %s1848_s6 = inlined_call_operand.vmem [shape: bf16[2,4,64], index: 6, kind: output, shape index: {}]  }
   0x1 LB: > { %s1171_s22 = sadd.s32 4294967295, %s1507_s21   ;;  %p1175_p0 = scmp.ge.s32.totalorder %s1507_s21, 1  ;;  %s1507_s21 = sphi %s1552_s21, %s16_s21  }
   0x2   : > { %p212_p1 = scmp.lt.s32.totalorder %s1507_s21, 3 }
   0x4   : > { %p213_p2 = pnand %p1175_p0, %p212_p1 }
   0x5   : > { %v1410_v0 = vld [vmem:[%s1843_s1 + $0x64] ss:$8 sps:$4 sm:$0xff] (!%p213_p2)   ;;  %v1509_v2 = vmov (!%p213_p2), 0   ;;  %v1414_v3 = vld [vmem:[%s1843_s1 + $0x60] ss:$8 sps:$4 sm:$0xff] (!%p213_p2)   ;;  %p241_p3 = scmp.lt.s32.totalorder (!%p213_p2), %s1171_s22, 1 }
   0x6   : > { %216 = sbr.rel (%p213_p2) target bundleno = 869 (0x365), region = 44  ;;  %v1412_v1 = vld [vmem:[%s1843_s1 + $0xc4] ss:$8 sps:$4 sm:$0xff] (!%p213_p2)   ;;  %386 = vmatprep.mubr.bf16.mxu1 (!%p213_p2), %v1509_v2  ;;  %608 = vmatprep.mubr.bf16.mxu0 (!%p213_p2), %v1509_v2  ;;  %v1415_v4 = vld [vmem:[%s1843_s1 + $0xc0] ss:$8 sps:$4 sm:$0xff] (!%p213_p2)   ;;  %vm350_vm0 = vcmask (!%p213_p2), 785408  }
   0x7   : > { %354 = vmatprep.subr.bf16.mxu1 (!%p213_p2), %v1410_v0  ;;  %576 = vmatprep.subr.bf16.mxu0 (!%p213_p2), %v1412_v1  ;;  %v1416_v5 = vld [vmem:[%s1843_s1 + $0x74] ss:$8 sps:$4 sm:$0xff] (!%p213_p2)   ;;  %v1420_v7 = vld [vmem:[%s1843_s1 + $0x70] ss:$8 sps:$4 sm:$0xff] (!%p213_p2)   ;;  %v1422_v9 = vld [vmem:[%s1843_s1 + $0x84] ss:$8 sps:$4 sm:$0xff] (!%p213_p2)  }
   0x8   : > { %355 = vmatpush1.bf16.msra.mxu1 (!%p213_p2), %v1414_v3  ;;  %577 = vmatpush1.bf16.msra.mxu0 (!%p213_p2), %v1415_v4  ;;  %v1418_v6 = vld [vmem:[%s1843_s1 + $0xd4] ss:$8 sps:$4 sm:$0xff] (!%p213_p2)   ;;  %v1421_v8 = vld [vmem:[%s1843_s1 + $0xd0] ss:$8 sps:$4 sm:$0xff] (!%p213_p2)   ;;  %v1424_v10 = vld [vmem:[%s1843_s1 + $0xe4] ss:$8 sps:$4 sm:$0xff] (!%p213_p2)  }
   0x9   : > { %356 = vmatprep.subr.bf16.mxu1 (!%p213_p2), %v1416_v5  ;;  %578 = vmatprep.subr.bf16.mxu0 (!%p213_p2), %v1418_v6  ;;  %v1426_v11 = vld [vmem:[%s1843_s1 + $0x80] ss:$8 sps:$4 sm:$0xff] (!%p213_p2)   ;;  %v1428_v13 = vld [vmem:[%s1843_s1 + $0x94] ss:$8 sps:$4 sm:$0xff] (!%p213_p2)   ;;  %v1432_v15 = vld [vmem:[%s1843_s1 + $0x90] ss:$8 sps:$4 sm:$0xff] (!%p213_p2)  }
   0xa   : > { %v1427_v12 = vld [vmem:[%s1843_s1 + $0xe0] ss:$8 sps:$4 sm:$0xff] (!%p213_p2)   ;;  %v1430_v14 = vld [vmem:[%s1843_s1 + $0xf4] ss:$8 sps:$4 sm:$0xff] (!%p213_p2)   ;;  %v1433_v16 = vld [vmem:[%s1843_s1 + $0xf0] ss:$8 sps:$4 sm:$0xff] (!%p213_p2)  }
   0xb   : > { %v1434_v17 = vld [vmem:[%s1843_s1 + $0xa4] ss:$8 sps:$4 sm:$0xff] (!%p213_p2)   ;;  %v1438_v19 = vld [vmem:[%s1843_s1 + $0xa0] ss:$8 sps:$4 sm:$0xff] (!%p213_p2)   ;;  %v1440_v21 = vld [vmem:[%s1843_s1 + $0xb4] ss:$8 sps:$4 sm:$0xff] (!%p213_p2)  }
   0xc   : > { %357 = vmatpush1.bf16.msra.mxu1 (!%p213_p2), %v1420_v7  ;;  %579 = vmatpush1.bf16.msra.mxu0 (!%p213_p2), %v1421_v8  ;;  %v1436_v18 = vld [vmem:[%s1843_s1 + $0x104] ss:$8 sps:$4 sm:$0xff] (!%p213_p2)   ;;  %v1439_v20 = vld [vmem:[%s1843_s1 + $0x100] ss:$8 sps:$4 sm:$0xff] (!%p213_p2)   ;;  %v1442_v22 = vld [vmem:[%s1843_s1 + $0x114] ss:$8 sps:$4 sm:$0xff] (!%p213_p2)  }
   0xd   : > { %s1850_s22 = smov (!%p241_p3, %s1171_s22), 1  ;;  %358 = vmatprep.subr.bf16.mxu1 %v1422_v9  ;;  %580 = vmatprep.subr.bf16.mxu0 %v1424_v10  ;;  %v1444_v25 = vld [vmem:[%s1843_s1 + $0xb0] ss:$8 sps:$4 sm:$0xff]   ;;  %v1448_v28 = vld [vmem:[%s1843_s1 + $0x4] ss:$8 sps:$4 sm:$0xff]   ;;  %s1510_s17 = smov 96  }
   0xe   : > { %s1296_s11 = sshll.u32 %s1850_s22, 3  ;;  %v1445_v26 = vld [vmem:[%s1843_s1 + $0x110] ss:$8 sps:$4 sm:$0xff]   ;;  %v1451_v29 = vld [vmem:[%s1843_s1 + $0x124] ss:$8 sps:$4 sm:$0xff]   ;;  %s1511_s18 = smov 112  }
   0xf   : > { %s245_s20 = scalar_lea.vmem %s1842_s0, %s1296_s11  ;;  %v1449_v33 = vld [vmem:[%s1843_s1 + $0x120] ss:$8 sps:$4 sm:$0xff]   ;;  %v1458_v36 = vld [vmem:[%s1843_s1 + $0x134] ss:$8 sps:$4 sm:$0xff]   ;;  %v1453_v39 = vld [vmem:[%s1843_s1 + $0x10] ss:$8 sps:$4 sm:$0xff]  }
  0x10   : > { %359 = vmatpush1.bf16.msra.mxu1 %v1426_v11  ;;  %581 = vmatpush1.bf16.msra.mxu0 %v1427_v12  ;;  %v1638_v23 = vld [vmem:[%s245_s20] sm:$0xf]  ;;  %v252_v24 = vld [vmem:[%s245_s20 + $0x4] sm:$0x3]  ;;  %v1455_v38 = vld [vmem:[%s1843_s1 + $0x14] ss:$8 sps:$4 sm:$0xff]  }
  0x11   : > { %360 = vmatprep.subr.bf16.mxu1 %v1428_v13  ;;  %582 = vmatprep.subr.bf16.mxu0 %v1430_v14  ;;  %v1647_v27 = vcombine.low %v1638_v23, %v252_v24  ;;  %v1446_v35 = vld [vmem:[%s1843_s1] ss:$8 sps:$4 sm:$0xff]   ;;  %v1456_v40 = vld [vmem:[%s1843_s1 + $0x130] ss:$8 sps:$4 sm:$0xff]   ;;  %v1464_v41 = vld [vmem:[%s1843_s1 + $0x144] ss:$8 sps:$4 sm:$0xff]   ;;  %v863_v13 = vlaneseq }
  0x12   : > { %v1461_v42 = vld [vmem:[%s1843_s1 + $0x24] ss:$8 sps:$4 sm:$0xff]   ;;  %v1459_v43 = vld [vmem:[%s1843_s1 + $0x20] ss:$8 sps:$4 sm:$0xff]   ;;  %v1470_v45 = vld [vmem:[%s1843_s1 + $0x154] ss:$8 sps:$4 sm:$0xff]  }
  0x13   : > { %v284_v30 = vshrl.u32 %v1647_v27, 16  ;;  %v286_v31 = vshll.u32 %v1647_v27, 16  ;;  %v512_v32 = vrot.slane %v1647_v27, 1  ;;  %v1462_v44 = vld [vmem:[%s1843_s1 + $0x140] ss:$8 sps:$4 sm:$0xff]   ;;  %v754_v8 = vrot.slane %v1647_v27, 2 }
  0x14   : > { %361 = vmatpush1.bf16.msra.mxu1 %v1432_v15  ;;  %583 = vmatpush1.bf16.msra.mxu0 %v1433_v16  ;;  %v1467_v46 = vld [vmem:[%s1843_s1 + $0x34] ss:$8 sps:$4 sm:$0xff]   ;;  %v1465_v47 = vld [vmem:[%s1843_s1 + $0x30] ss:$8 sps:$4 sm:$0xff]   ;;  %v1476_v49 = vld [vmem:[%s1843_s1 + $0x164] ss:$8 sps:$4 sm:$0xff]  }
  0x15   : > { %362 = vmatprep.subr.bf16.mxu1 %v1434_v17  ;;  %584 = vmatprep.subr.bf16.mxu0 %v1436_v18  ;;  %v288_v34 = vrot.slane %v286_v31, 1  ;;  %v1468_v48 = vld [vmem:[%s1843_s1 + $0x150] ss:$8 sps:$4 sm:$0xff]   ;;  %v1473_v50 = vld [vmem:[%s1843_s1 + $0x44] ss:$8 sps:$4 sm:$0xff]   ;;  %v632_v55 = vrot.slane %v284_v30, 1 }
  0x16   : > { %v1474_v51 = vld [vmem:[%s1843_s1 + $0x160] ss:$8 sps:$4 sm:$0xff]   ;;  %v1482_v53 = vld [vmem:[%s1843_s1 + $0x174] ss:$8 sps:$4 sm:$0xff]   ;;  %v633_v56 = vrot.slane %v286_v31, 2  ;;  %v864_v14 = vshrl.u32 %v863_v13, 7 }
  0x17   : > { %v289_v37 = vor.u32 %v288_v34, %v284_v30  ;;  %v1471_v52 = vld [vmem:[%s1843_s1 + $0x40] ss:$8 sps:$4 sm:$0xff]   ;;  %v1479_v54 = vld [vmem:[%s1843_s1 + $0x54] ss:$8 sps:$4 sm:$0xff]   ;;  %v1480_v57 = vld [vmem:[%s1843_s1 + $0x170] ss:$8 sps:$4 sm:$0xff]  }
  0x18   : > { %363 = vmatpush1.bf16.msra.mxu1 %v1438_v19  ;;  %585 = vmatpush1.bf16.msra.mxu0 %v1439_v20  ;;  %v1477_v58 = vld [vmem:[%s1843_s1 + $0x50] ss:$8 sps:$4 sm:$0xff]   ;;  %v1485_v59 = vld [vmem:[%s1843_s1 + $0x184] ss:$8 sps:$4 sm:$0xff]   ;;  %v634_v60 = vor.u32 %v633_v56, %v632_v55  ;;  %v1483_v61 = vld [vmem:[%s1843_s1 + $0x180] ss:$8 sps:$4 sm:$0xff]  }
  0x19   : > { %364 = vmatprep.subr.bf16.mxu1 %v1440_v21  ;;  %586 = vmatprep.subr.bf16.mxu0 %v1442_v22  ;;  %v1488_v62 = vld [vmem:[%s1843_s1 + $0x194] ss:$8 sps:$4 sm:$0xff]   ;;  %v1486_v63 = vld [vmem:[%s1843_s1 + $0x190] ss:$8 sps:$4 sm:$0xff]   ;;  %v1491_v0 = vld [vmem:[%s1843_s1 + $0x1a4] ss:$8 sps:$4 sm:$0xff]  }
  0x1a   : > { %v1489_v1 = vld [vmem:[%s1843_s1 + $0x1a0] ss:$8 sps:$4 sm:$0xff]   ;;  %v1494_v3 = vld [vmem:[%s1843_s1 + $0x1b4] ss:$8 sps:$4 sm:$0xff]   ;;  %v1492_v4 = vld [vmem:[%s1843_s1 + $0x1b0] ss:$8 sps:$4 sm:$0xff]  }
  0x1b   : > { %v1495_v5 = vld [vmem:[%s1843_s1 + $0x1c0] ss:$8 sps:$4 sm:$0xff]   ;;  %v1500_v6 = vld [vmem:[%s1843_s1 + $0x1d4] ss:$8 sps:$4 sm:$0xff]   ;;  %v1498_v7 = vld [vmem:[%s1843_s1 + $0x1d0] ss:$8 sps:$4 sm:$0xff]  }
  0x1c   : > { %365 = vmatpush1.bf16.msra.mxu1 %v1444_v25  ;;  %587 = vmatpush1.bf16.msra.mxu0 %v1445_v26  ;;  %v865_v15 = vsub.s32 0, %v864_v14  ;;  %v861_v16 = vld [vmem:[%s1844_s2] sm:$0x3]  ;;  %v869_v17 = vsub.s32 1, %v864_v14  ;;  %s1512_s19 = smov 80   ;;  %s1514_s20 = smov 64  }
  0x1d   : > { %458 = vmatprep.subr.bf16.mxu1 %v1448_v28  ;;  %698 = vmatprep.subr.bf16.mxu0 %v1451_v29  ;;  %v875_v18 = vld [vmem:[%s1845_s3] sm:$0x3]  ;;  %vm1515_vm1 = vmmov 0   ;;  %v1043_v56 = vld [vmem:[%s1847_s5 + $0x70] sm:$0xff]  ;;  %vm895_vm2 = vcmask 916480   ;;  %vm910_vm3 = vcmask 654336  }
  0x1e   : > { %v866_v19 = vrot.slane %v861_v16, %v865_v15  ;;  %v880_v22 = vrot.slane %v875_v18, %v865_v15  ;;  %v870_v24 = vrot.slane %v861_v16, %v869_v17  ;;  %v884_v31 = vrot.slane %v875_v18, %v869_v17  ;;  %v1029_v34 = vld [vmem:[%s1847_s5] sm:$0xff]  ;;  %s1178_s11 = sshll.u32 %s1850_s22, 1 }
  0x1f   : > { %1242 = vmatmul.mubr.msk.bf16.vlgmr.msra.gmra.mrb[0].mxu0 %vm350_vm0, %v512_v32  ;;  %1204 = vmatmul.mubr.msk.bf16.vlgmr.msra.gmra.mrb[0].mxu1 %vm350_vm0, %v289_v37  ;;  %v1516_v37 = vmov 0.0|0.0   ;;  %vm918_vm4 = vcmask 523264   ;;  %vm925_vm5 = vcmask 1041408   ;;  %vm930_vm6 = vcmask 1046528   ;;  %s249_s14 = scalar_lea.vmem %s1848_s6, %s1178_s11 }
  0x20   : > { %699 = vmatpush1.bf16.msra.mxu0 %v1449_v33  ;;  %459 = vmatpush1.bf16.msra.mxu1 %v1446_v35  ;;  %v1513_v33 = vmov 0.0   ;;  %v1030_v35 = vld [vmem:[%s1847_s5 + $0x8] sm:$0xff]  ;;  %vm936_vm7 = vcmask 1045504   ;;  %vm942_vm8 = vcmask 1044480   ;;  %vm948_vm9 = vcmask 1043456  }
  0x21   : > { %700 = vmatprep.subr.bf16.mxu0 %v1458_v36  ;;  %460 = vmatprep.subr.bf16.mxu1 %v1455_v38  ;;  %v1031_v36 = vld [vmem:[%s1847_s5 + $0x10] sm:$0xff]  ;;  %v1357_v38 = vpack.c.bf16 %v1030_v35, %v1029_v34  ;;  %vm955_vm10 = vcmask 64512   ;;  %vm1116_vm11 = vcmask 517120  }
  0x22   : > { %490 = vmatprep.mubr.bf16.mxu1 %v1509_v2  ;;  %730 = vmatprep.mubr.bf16.mxu0 %v1509_v2 }
  0x24   : > { %701 = vmatpush1.bf16.msra.mxu0 %v1456_v40  ;;  %461 = vmatpush1.bf16.msra.mxu1 %v1453_v39  ;;  %v1032_v39 = vld [vmem:[%s1847_s5 + $0x18] sm:$0xff] }
  0x25   : > { %702 = vmatprep.subr.bf16.mxu0 %v1464_v41  ;;  %462 = vmatprep.subr.bf16.mxu1 %v1461_v42  ;;  %v1360_v40 = vpack.c.bf16 %v1032_v39, %v1031_v36  ;;  %v1033_v41 = vld [vmem:[%s1847_s5 + $0x20] sm:$0xff]  ;;  %v1034_v42 = vld [vmem:[%s1847_s5 + $0x28] sm:$0xff] }
  0x28   : > { %703 = vmatpush1.bf16.msra.mxu0 %v1462_v44  ;;  %463 = vmatpush1.bf16.msra.mxu1 %v1459_v43  ;;  %v1363_v43 = vpack.c.bf16 %v1034_v42, %v1033_v41  ;;  %v1035_v44 = vld [vmem:[%s1847_s5 + $0x30] sm:$0xff] }
  0x29   : > { %704 = vmatprep.subr.bf16.mxu0 %v1470_v45  ;;  %464 = vmatprep.subr.bf16.mxu1 %v1467_v46  ;;  %v1036_v45 = vld [vmem:[%s1847_s5 + $0x38] sm:$0xff] }
  0x2a   : > { %v1366_v46 = vpack.c.bf16 %v1036_v45, %v1035_v44 }
  0x2c   : > { %705 = vmatpush1.bf16.msra.mxu0 %v1468_v48  ;;  %465 = vmatpush1.bf16.msra.mxu1 %v1465_v47  ;;  %v1037_v47 = vld [vmem:[%s1847_s5 + $0x40] sm:$0xff]  ;;  %v1038_v48 = vld [vmem:[%s1847_s5 + $0x48] sm:$0xff] }
  0x2d   : > { %706 = vmatprep.subr.bf16.mxu0 %v1476_v49  ;;  %466 = vmatprep.subr.bf16.mxu1 %v1473_v50  ;;  %v1369_v49 = vpack.c.bf16 %v1038_v48, %v1037_v47  ;;  %v1039_v50 = vld [vmem:[%s1847_s5 + $0x50] sm:$0xff] }
  0x30   : > { %707 = vmatpush1.bf16.msra.mxu0 %v1474_v51  ;;  %467 = vmatpush1.bf16.msra.mxu1 %v1471_v52  ;;  %v1040_v51 = vld [vmem:[%s1847_s5 + $0x58] sm:$0xff] }
  0x31   : > { %708 = vmatprep.subr.bf16.mxu0 %v1482_v53  ;;  %468 = vmatprep.subr.bf16.mxu1 %v1479_v54  ;;  %v1372_v52 = vpack.c.bf16 %v1040_v51, %v1039_v50  ;;  %v1041_v53 = vld [vmem:[%s1847_s5 + $0x60] sm:$0xff]  ;;  %v1042_v54 = vld [vmem:[%s1847_s5 + $0x68] sm:$0xff] }
  0x32   : > { %v1375_v55 = vpack.c.bf16 %v1042_v54, %v1041_v53 }
  0x34   : > { %709 = vmatpush1.bf16.msra.mxu0 %v1480_v57  ;;  %469 = vmatpush1.bf16.msra.mxu1 %v1477_v58  ;;  %v1044_v57 = vld [vmem:[%s1847_s5 + $0x78] sm:$0xff] }
  0x35   : > { %818 = vmatprep.subr.bf16.mxu0 %v1485_v59  ;;  %1356 = vmatprep.subr.bf16.mxu1 %v1516_v37  ;;  %v1378_v58 = vpack.c.bf16 %v1044_v57, %v1043_v56 }
  0x37   : > { %1267 = vmatmul.mubr.msk.bf16.vlgmr.msra.gmra.mrb[0].mxu0 %vm350_vm0, %v634_v60  ;;  %1217 = vmatmul.mubr.msk.bf16.vlgmr.msra.gmra.mrb[0].mxu1 %vm350_vm0, %v1638_v23 }
  0x38   : > { %819 = vmatpush1.bf16.msra.mxu0 %v1483_v61  ;;  %850 = vmatprep.mubr.bf16.mxu0 %v1509_v2  ;;  %v1497_v2 = vld [vmem:[%s1843_s1 + $0x1c4] ss:$8 sps:$4 sm:$0xff]  }
  0x39   : > { %820 = vmatprep.subr.bf16.mxu0 %v1488_v62  ;;  %1353 = vmatprep.mubr.msk.f32.mxu1 %vm1515_vm1, %v1513_v33 }
  0x3a   : > { %1358 = vmatpush3.bf16.msra.mxu1 %v1357_v38 }
  0x3b   : > { %1359 = vmatprep.subr.bf16.mxu1 %v1516_v37 }
  0x3c   : > { %821 = vmatpush1.bf16.msra.mxu0 %v1486_v63 }
  0x3d   : > { %822 = vmatprep.subr.bf16.mxu0 %v1491_v0 }
  0x3e   : > { %1361 = vmatpush3.bf16.msra.mxu1 %v1360_v40 }
  0x3f   : > { %1362 = vmatprep.subr.bf16.mxu1 %v1516_v37 }
  0x40   : > { %823 = vmatpush1.bf16.msra.mxu0 %v1489_v1 }
  0x41   : > { %824 = vmatprep.subr.bf16.mxu0 %v1494_v3 }
  0x42   : > { %1364 = vmatpush3.bf16.msra.mxu1 %v1363_v43 }
  0x43   : > { %1365 = vmatprep.subr.bf16.mxu1 %v1516_v37 }
  0x44   : > { %825 = vmatpush1.bf16.msra.mxu0 %v1492_v4 }
  0x45   : > { %826 = vmatprep.subr.bf16.mxu0 %v1497_v2 }
  0x46   : > { %1367 = vmatpush3.bf16.msra.mxu1 %v1366_v46 }
  0x47   : > { %1368 = vmatprep.subr.bf16.mxu1 %v1516_v37 }
  0x48   : > { %827 = vmatpush1.bf16.msra.mxu0 %v1495_v5 }
  0x49   : > { %828 = vmatprep.subr.bf16.mxu0 %v1500_v6 }
  0x4a   : > { %1370 = vmatpush3.bf16.msra.mxu1 %v1369_v49 }
  0x4b   : > { %1371 = vmatprep.subr.bf16.mxu1 %v1516_v37 }
  0x4c   : > { %829 = vmatpush1.bf16.msra.mxu0 %v1498_v7 }
  0x4d   : > { %1316 = vmatprep.subr.mxu0 %v1513_v33 }
  0x4e   : > { %1373 = vmatpush3.bf16.msra.mxu1 %v1372_v52 }
  0x4f   : > { %1292 = vmatmul.mubr.msk.bf16.vlgmr.msra.gmra.mrb[0].mxu0 %vm350_vm0, %v754_v8  ;;  %1374 = vmatprep.subr.bf16.mxu1 %v1516_v37 }
  0x50   : > { %1318 = vmatprep.mubr.msk.f32.mxu0 %vm1515_vm1, %v1513_v33 }
  0x52   : > { %1376 = vmatpush3.bf16.msra.mxu1 %v1375_v55 }
  0x53   : > { %1377 = vmatprep.subr.bf16.mxu1 %v1516_v37 }
  0x56   : > { %1379 = vmatpush3.bf16.msra.mxu1 %v1378_v58 }
 0x10a   : > { %v492_v9 = vpop.f32.mrb[0].mxu1 }
 0x10b   : > { %v494_v10 = vpop.f32.mrb[1].mxu1 }
 0x10c   : > { %v496_v11 = vpop.f32.mrb[2].mxu1 }
 0x10d   : > { %v497_v12 = vpop.f32.mrb[3].mxu1 }
 0x122   : > { %v852_v20 = vpop.f32.mrb[0].mxu0 }
 0x123   : > { %v1380_v21 = vadd.f32 %v852_v20, %v492_v9  ;;  %v854_v23 = vpop.f32.mrb[1].mxu0 }
 0x124   : > { %v1381_v25 = vadd.f32 %v854_v23, %v494_v10  ;;  %v856_v26 = vpop.f32.mrb[2].mxu0 }
 0x125   : > { %v873_v27 = vmul.f32 %v1380_v21, %v866_v19  ;;  %v857_v28 = vpop.f32.mrb[3].mxu0 }
 0x126   : > { %v874_v30 = vmul.f32 %v1381_v25, %v870_v24 }
 0x127   : > { %v1776_v29 = vadd.f32 %v880_v22, %v873_v27 }
 0x128   : > { %v888_v32 = vadd.f32 %v884_v31, %v874_v30  ;;  %v954_v30 = vld [vmem:[%s1846_s4] sm:$0xf] }
 0x129   : > { %899 = vrot.lane.b32.xlu1 %v1776_v29, %s1510_s17  ;;  %891 = vrot.lane.b32.xlu0 %v1776_v29, %s1511_s18 }
 0x12d   : > { %901 = vrot.lane.b32.xlu1 %v888_v32, %s1510_s17  ;;  %893 = vrot.lane.b32.xlu0 %v888_v32, %s1511_s18 }
 0x131   : > { %908 = vrot.lane.b32.xlu1 %v888_v32, %s1512_s19  ;;  %906 = vrot.lane.b32.xlu0 %v1776_v29, %s1512_s19 }
 0x135   : > { %916 = vrot.lane.b32.xlu1 %v888_v32, %s1514_s20  ;;  %914 = vrot.lane.b32.xlu0 %v1776_v29, %s1514_s20 }
 0x19b   : > { %v900_v59 = vpop.permute.xlu1 %899  ;;  %v892_v60 = vpop.permute.xlu0 %891 }
 0x19f   : > { %v902_v61 = vpop.permute.xlu1 %901  ;;  %v894_v62 = vpop.permute.xlu0 %893 }
 0x1a0   : > { %v896_v63 = vsel %vm895_vm2, %v892_v60, %v894_v62  ;;  %v903_v1 = vsel %vm350_vm0, %v900_v59, %v902_v61 }
 0x1a1   : > { %v898_v0 = vmax.f32 %v1776_v29, %v896_v63 }
 0x1a3   : > { %v909_v3 = vpop.permute.xlu1 %908  ;;  %v905_v4 = vmax.f32 %v898_v0, %v903_v1  ;;  %v907_v2 = vpop.permute.xlu0 %906 }
 0x1a4   : > { %v911_v5 = vsel %vm910_vm3, %v907_v2, %v909_v3 }
 0x1a5   : > { %v913_v6 = vmax.f32 %v905_v4, %v911_v5 }
 0x1a7   : > { %v917_v7 = vpop.permute.xlu1 %916  ;;  %v915_v8 = vpop.permute.xlu0 %914 }
 0x1a8   : > { %v919_v9 = vsel %vm918_vm4, %v915_v8, %v917_v7 }
 0x1a9   : > { %v921_v10 = vmax.f32 %v913_v6, %v919_v9 }
 0x1ab   : > { %v923_v11 = vrot.slane %v921_v10, 6 }
 0x1ad   : > { %v926_v12 = vsel %vm925_vm5, -1e+30, %v923_v11  ;;  %v927_v13 = vsel %vm925_vm5, %v923_v11, -1e+30 }
 0x1ae   : > { %v931_v14 = vrot.slane %v926_v12, 1  ;;  %v932_v15 = vrot.slane %v927_v13, 1  ;;  %v937_v16 = vrot.slane %v926_v12, 2  ;;  %v938_v17 = vrot.slane %v927_v13, 2 }
 0x1af   : > { %v943_v19 = vrot.slane %v926_v12, 3  ;;  %v944_v20 = vrot.slane %v927_v13, 3  ;;  %v949_v22 = vrot.slane %v926_v12, 4  ;;  %v950_v23 = vrot.slane %v927_v13, 4 }
 0x1b0   : > { %v933_v18 = vsel %vm930_vm6, %v931_v14, %v932_v15  ;;  %v939_v24 = vsel %vm936_vm7, %v937_v16, %v938_v17 }
 0x1b1   : > { %v935_v21 = vmax.f32 %v926_v12, %v933_v18  ;;  %v945_v26 = vsel %vm942_vm8, %v943_v19, %v944_v20  ;;  %v951_v28 = vsel %vm948_vm9, %v949_v22, %v950_v23 }
 0x1b3   : > { %v941_v25 = vmax.f32 %v935_v21, %v939_v24 }
 0x1b5   : > { %v947_v27 = vmax.f32 %v941_v25, %v945_v26 }
 0x1b7   : > { %v953_v29 = vmax.f32 %v947_v27, %v951_v28 }
 0x1b9   : > { %1317 = vmatpush3.msra.mxu0 %v953_v29 }
 0x1ba   : > { %1319 = vmatmul.mubr.msk.f32.vlgmr.msra.gmra.mrb[4].mxu0 %vm955_vm10, %v954_v30 }
 0x28d   : > { %v1025_v31 = vpop.f32.mrb[4].mxu0 }
 0x28e   : > { %v1320_v32 = vpop.f32.mrb[5].mxu0  ;;  %1354 = vmatmul.mubr.f32.vlgmr.msra.gmra.mrb[4].mxu1 %v1025_v31 }
 0x361   : > { %v1111_v33 = vpop.f32.mrb[4].mxu1 }
 0x362   : > { %v1115_v34 = vpack.c.bf16 %v1111_v33, %v1111_v33  ;;  %v1355_v35 = vpop.f32.mrb[5].mxu1 }
 0x364   : > { %1117 = vst.msk [vmem:[%s249_s14] sm:$0x3] %vm1116_vm11, %v1115_v34 }
 0x365 PF: > { %s16_s21 = sadd.s32 1, %s1507_s21  }
 0x366   : > { %p13_p4 = scmp.ge.s32.totalorder %s16_s21, 4  }
 0x368   :  { %15 = sbr.rel (!%p13_p4) target bundleno = 1 (0x1), region = 78 }

// kernel: tile.99
= control target key start
LH: loop header
LB: loop body
LE: loop exit
PB: predicated region body
PF: predicated region fallthrough
CT: control target
= control target key end

     0   :  { %s67_s10 = smov 112   ;;  %s68_s11 = smov 80   ;;  %vm3_vm0 = vcmask 130048   ;;  %vm9_vm1 = vcmask 1048448   ;;  %vm15_vm2 = vcmask 917248   ;;  %vm21_vm3 = vcmask 786048   ;;  %s111_s0 = inlined_call_operand.vmem [shape: f32[8,16], index: 0, kind: input, shape index: {}]   ;;  %s112_s1 = inlined_call_operand.vmem [shape: f32[1,128], index: 1, kind: output, shape index: {}]  }
   0x1   :  { %v53_v0 = vld [vmem:[%s111_s0 + $0x7] sm:$0x1]   ;;  %v55_v1 = vld [vmem:[%s111_s0 + $0x5] sm:$0x1]   ;;  %v54_v2 = vld [vmem:[%s111_s0 + $0x6] sm:$0x1]  }
   0x2   :  { %7 = vrot.lane.b32.xlu0 %v53_v0, %s67_s10  ;;  %19 = vrot.lane.b32.xlu1 %v55_v1, %s68_s11  ;;  %v56_v3 = vld [vmem:[%s111_s0 + $0x4] sm:$0x1]   ;;  %v2_v4 = vld [vmem:[%s111_s0] sm:$0x1]   ;;  %s69_s18 = smov 96   ;;  %s70_s19 = smov 64  }
   0x3   :  { %4 = vst.msk [vmem:[#allocation0] sm:$0x1] %vm3_vm0, %v2_v4   ;;  %v57_v5 = vld [vmem:[%s111_s0 + $0x3] sm:$0x1]   ;;  %v58_v6 = vld [vmem:[%s111_s0 + $0x2] sm:$0x1]  }
   0x4   :  { %s71_s24 = smov 48   ;;  %s72_s25 = smov 32   ;;  %v59_v7 = vld [vmem:[%s111_s0 + $0x1] sm:$0x1]   ;;  %vm27_vm4 = vcmask 654848   ;;  %vm33_vm5 = vcmask 523648  }
   0x5   :  { %s73_s0 = smov 16   ;;  %vm39_vm6 = vcmask 392448   ;;  %vm45_vm7 = vcmask 261248  }
   0x6   :  { %13 = vrot.lane.b32.xlu0 %v54_v2, %s69_s18  ;;  %25 = vrot.lane.b32.xlu1 %v56_v3, %s70_s19 }
   0xa   :  { %31 = vrot.lane.b32.xlu0 %v57_v5, %s71_s24  ;;  %37 = vrot.lane.b32.xlu1 %v58_v6, %s72_s25 }
   0xe   :  { %43 = vrot.lane.b32.xlu0 %v59_v7, %s73_s0 }
  0x74   :  { %v8_v8 = vpop.permute.xlu0 %7   ;;  %v20_v9 = vpop.permute.xlu1 %19  }
  0x75   :  { %10 = vst.msk [vmem:[#allocation0] sm:$0x1] %vm9_vm1, %v8_v8  }
  0x78   :  { %v14_v10 = vpop.permute.xlu0 %13   ;;  %v26_v11 = vpop.permute.xlu1 %25  }
  0x79   :  { %16 = vst.msk [vmem:[#allocation0] sm:$0x1] %vm15_vm2, %v14_v10  }
  0x7a   :  { %22 = vst.msk [vmem:[#allocation0] sm:$0x1] %vm21_vm3, %v20_v9  }
  0x7b   :  { %28 = vst.msk [vmem:[#allocation0] sm:$0x1] %vm27_vm4, %v26_v11  }
  0x7c   :  { %v32_v12 = vpop.permute.xlu0 %31   ;;  %v38_v13 = vpop.permute.xlu1 %37  }
  0x7d   :  { %34 = vst.msk [vmem:[#allocation0] sm:$0x1] %vm33_vm5, %v32_v12  }
  0x7e   :  { %40 = vst.msk [vmem:[#allocation0] sm:$0x1] %vm39_vm6, %v38_v13  }
  0x80   :  { %v44_v14 = vpop.permute.xlu0 %43  }
  0x81   :  { %46 = vst.msk [vmem:[#allocation0] sm:$0x1] %vm45_vm7, %v44_v14  }
  0x88   :  { %v50_v15 = vld [vmem:[#allocation0] sm:$0x1] }
  0x89   :  { %52 = vst [vmem:[%s112_s1] sm:$0x1] %v50_v15 }

// kernel: tile.108
= control target key start
LH: loop header
LB: loop body
LE: loop exit
PB: predicated region body
PF: predicated region fallthrough
CT: control target
= control target key end

     0   :  { %s22_s0 = inlined_call_operand.vmem [shape: f32[64], index: 0, kind: input, shape index: {}]   ;;  %s23_s1 = inlined_call_operand.vmem [shape: f32[4,64], index: 1, kind: output, shape index: {}]  }
   0x1   :  { %v4_v0 = vld [vmem:[%s22_s0] ss:$0 sm:$0xff] }
   0x2   :  { %5 = vst [vmem:[%s23_s1] sm:$0xf] %v4_v0 }

// kernel: tile.114
= control target key start
LH: loop header
LB: loop body
LE: loop exit
PB: predicated region body
PF: predicated region fallthrough
CT: control target
= control target key end

     0   :  { %vm7_vm0 = vcmask 130048   ;;  %s37_s8 = smov 16   ;;  %s38_s9 = smov 32   ;;  %vm13_vm1 = vcmask 523648   ;;  %vm19_vm2 = vcmask 392448   ;;  %vm25_vm3 = vcmask 261248   ;;  %s55_s0 = inlined_call_operand.vmem [shape: f32[4,16], index: 0, kind: input, shape index: {}]   ;;  %s56_s1 = inlined_call_operand.vmem [shape: f32[1,64], index: 1, kind: output, shape index: {}]  }
   0x1   :  { %v4_v0 = vld [vmem:[%s55_s0] sm:$0xf]  ;;  %s36_s0 = smov 48  }
   0x2   :  { %5 = vst [vmem:[#allocation1] sm:$0xf] %v4_v0 }
   0x9   :  { %v10_v1 = vld [vmem:[#allocation1 + $0x3] sm:$0x1]   ;;  %v22_v2 = vld [vmem:[#allocation1 + $0x1] sm:$0x1]   ;;  %v6_v3 = vld [vmem:[#allocation1] sm:$0x1]  }
   0xa   :  { %11 = vrot.lane.b32.xlu0 %v10_v1, %s36_s0  ;;  %23 = vrot.lane.b32.xlu1 %v22_v2, %s37_s8  ;;  %v16_v4 = vld [vmem:[#allocation1 + $0x2] sm:$0x1]   ;;  %8 = vst.msk [vmem:[#allocation0] sm:$0x1] %vm7_vm0, %v6_v3  }
   0xe   :  { %17 = vrot.lane.b32.xlu0 %v16_v4, %s38_s9 }
  0x7c   :  { %v12_v5 = vpop.permute.xlu0 %11   ;;  %v24_v6 = vpop.permute.xlu1 %23  }
  0x7d   :  { %14 = vst.msk [vmem:[#allocation0] sm:$0x1] %vm13_vm1, %v12_v5  }
  0x80   :  { %v18_v7 = vpop.permute.xlu0 %17  }
  0x81   :  { %20 = vst.msk [vmem:[#allocation0] sm:$0x1] %vm19_vm2, %v18_v7  }
  0x82   :  { %26 = vst.msk [vmem:[#allocation0] sm:$0x1] %vm25_vm3, %v24_v6  }
  0x89   :  { %v30_v8 = vld [vmem:[#allocation0] sm:$0x1] }
  0x8a   :  { %32 = vst [vmem:[%s56_s1] sm:$0x1] %v30_v8 }

// kernel: forward.9
= control target key start
LH: loop header
LB: loop body
LE: loop exit
PB: predicated region body
PF: predicated region fallthrough
CT: control target
= control target key end

     0   :  { %s1486_s21 = smov 0   ;;  %s1730_s0 = inlined_call_operand.vmem [shape: bf16[2,8,128], index: 0, kind: input, shape index: {}]   ;;  %s1731_s1 = inlined_call_operand.vmem [shape: bf16[5,128,128], index: 1, kind: input, shape index: {}]   ;;  %s1732_s2 = inlined_call_operand.vmem [shape: f32[1,128], index: 2, kind: input, shape index: {}]   ;;  %s1733_s3 = inlined_call_operand.vmem [shape: f32[1,128], index: 3, kind: input, shape index: {}]   ;;  %s1734_s4 = inlined_call_operand.vmem [shape: f32[2,4], index: 4, kind: input, shape index: {}]   ;;  %s1735_s5 = inlined_call_operand.vmem [shape: f32[64,32], index: 5, kind: input, shape index: {}]   ;;  %s1736_s6 = inlined_call_operand.vmem [shape: bf16[2,2,32], index: 6, kind: output, shape index: {}]  }
   0x1 LB: > { %s1057_s22 = sadd.s32 4294967295, %s1442_s21   ;;  %p1061_p0 = scmp.ge.s32.totalorder %s1442_s21, 1  ;;  %s1442_s21 = sphi %s1486_s21, %s16_s21  }
   0x2   : > { %p211_p1 = scmp.lt.s32.totalorder %s1442_s21, 3 }
   0x4   : > { %p212_p2 = pnand %p1061_p0, %p211_p1 }
   0x5   : > { %v1395_v0 = vld [vmem:[%s1731_s1 + $0x40] sm:$0xff] (!%p212_p2)   ;;  %v1444_v1 = vmov (!%p212_p2), 0.0   ;;  %v1397_v3 = vld [vmem:[%s1731_s1 + $0x48] sm:$0xff] (!%p212_p2)   ;;  %vm1445_vm0 = vmmov (!%p212_p2), 0   ;;  %p238_p3 = scmp.lt.s32.totalorder (!%p212_p2), %s1057_s22, 1  ;;  %v1399_v5 = vld [vmem:[%s1731_s1 + $0x50] sm:$0xff] (!%p212_p2)  }
   0x6   : > { %215 = sbr.rel (%p212_p2) target bundleno = 888 (0x378), region = 44  ;;  %1231 = vmatprep.subr.bf16.mxu1 (!%p212_p2), %v1444_v1  ;;  %1271 = vmatprep.subr.bf16.mxu0 (!%p212_p2), %v1444_v1  ;;  %v1396_v2 = vld [vmem:[%s1731_s1 + $0x80] sm:$0xff] (!%p212_p2)   ;;  %v1398_v4 = vld [vmem:[%s1731_s1 + $0x88] sm:$0xff] (!%p212_p2)   ;;  %v1400_v6 = vld [vmem:[%s1731_s1 + $0x90] sm:$0xff] (!%p212_p2)   ;;  %s1446_s23 = smov (!%p212_p2), 80   ;;  %vm829_vm1 = vcmask (!%p212_p2), 1041408  }
   0x7   : > { %1232 = vmatpush3.bf16.msra.mxu1 (!%p212_p2), %v1395_v0  ;;  %1247 = vmatprep.mubr.msk.bf16.mxu1 (!%p212_p2), %vm1445_vm0, %v1444_v1  ;;  %v1401_v7 = vld [vmem:[%s1731_s1 + $0x58] sm:$0xff] (!%p212_p2)   ;;  %v1403_v9 = vld [vmem:[%s1731_s1 + $0x60] sm:$0xff] (!%p212_p2)   ;;  %v1405_v13 = vld [vmem:[%s1731_s1 + $0x68] sm:$0xff] (!%p212_p2)   ;;  %s1447_s24 = smov (!%p212_p2), 112   ;;  %s1448_s25 = smov (!%p212_p2), 64   ;;  %vm831_vm2 = vcmask (!%p212_p2), 1045504  }
   0x8   : > { %1272 = vmatpush3.bf16.msra.mxu0 (!%p212_p2), %v1396_v2  ;;  %1233 = vmatprep.subr.bf16.mxu1 (!%p212_p2), %v1444_v1  ;;  %v1402_v8 = vld [vmem:[%s1731_s1 + $0x98] sm:$0xff] (!%p212_p2)   ;;  %v1404_v10 = vld [vmem:[%s1731_s1 + $0xa0] sm:$0xff] (!%p212_p2)   ;;  %v1406_v14 = vld [vmem:[%s1731_s1 + $0xa8] sm:$0xff] (!%p212_p2)   ;;  %s1449_s26 = smov (!%p212_p2), 96   ;;  %vm851_vm3 = vcmask (!%p212_p2), 1043456   ;;  %vm847_vm4 = vcmask (!%p212_p2), 31744  }
   0x9   : > { %1273 = vmatprep.subr.bf16.mxu0 (!%p212_p2), %v1444_v1  ;;  %1287 = vmatprep.mubr.msk.bf16.mxu0 (!%p212_p2), %vm1445_vm0, %v1444_v1  ;;  %v1407_v15 = vld [vmem:[%s1731_s1 + $0x70] sm:$0xff] (!%p212_p2)   ;;  %v1409_v20 = vld [vmem:[%s1731_s1 + $0x78] sm:$0xff] (!%p212_p2)   ;;  %v1412_v23 = vld [vmem:[%s1731_s1] sm:$0xff] (!%p212_p2)   ;;  %vm933_vm5 = vcmask (!%p212_p2), 523264   ;;  %vm1008_vm6 = vcmask (!%p212_p2), 253952  }
   0xa   : > { %v1408_v17 = vld [vmem:[%s1731_s1 + $0xb0] sm:$0xff] (!%p212_p2)   ;;  %v1410_v21 = vld [vmem:[%s1731_s1 + $0xb8] sm:$0xff] (!%p212_p2)   ;;  %v1413_v25 = vld [vmem:[%s1731_s1 + $0xc0] sm:$0xff] (!%p212_p2)  }
   0xb   : > { %1234 = vmatpush3.bf16.msra.mxu1 (!%p212_p2), %v1397_v3  ;;  %v1414_v26 = vld [vmem:[%s1731_s1 + $0x8] sm:$0xff] (!%p212_p2)   ;;  %v1416_v28 = vld [vmem:[%s1731_s1 + $0x10] sm:$0xff] (!%p212_p2)   ;;  %v1418_v30 = vld [vmem:[%s1731_s1 + $0x18] sm:$0xff] (!%p212_p2)  }
   0xc   : > { %1274 = vmatpush3.bf16.msra.mxu0 (!%p212_p2), %v1398_v4  ;;  %1235 = vmatprep.subr.bf16.mxu1 (!%p212_p2), %v1444_v1  ;;  %v1415_v27 = vld [vmem:[%s1731_s1 + $0xc8] sm:$0xff] (!%p212_p2)   ;;  %v1417_v29 = vld [vmem:[%s1731_s1 + $0xd0] sm:$0xff] (!%p212_p2)   ;;  %v1419_v31 = vld [vmem:[%s1731_s1 + $0xd8] sm:$0xff] (!%p212_p2)  }
   0xd   : > { %s1738_s22 = smov (!%p238_p3, %s1057_s22), 1  ;;  %1275 = vmatprep.subr.bf16.mxu0 %v1444_v1  ;;  %v1420_v32 = vld [vmem:[%s1731_s1 + $0x20] sm:$0xff]   ;;  %v1422_v34 = vld [vmem:[%s1731_s1 + $0x28] sm:$0xff]   ;;  %v1424_v36 = vld [vmem:[%s1731_s1 + $0x30] sm:$0xff]  }
   0xe   : > { %s1062_s13 = sshll.u32 %s1738_s22, 2  ;;  %v1421_v33 = vld [vmem:[%s1731_s1 + $0xe0] sm:$0xff]   ;;  %v1423_v35 = vld [vmem:[%s1731_s1 + $0xe8] sm:$0xff]   ;;  %v1425_v37 = vld [vmem:[%s1731_s1 + $0xf0] sm:$0xff]  }
   0xf   : > { %1236 = vmatpush3.bf16.msra.mxu1 %v1399_v5  ;;  %s241_s18 = scalar_lea.vmem %s1730_s0, %s1062_s13  ;;  %v1426_v39 = vld [vmem:[%s1731_s1 + $0x38] sm:$0xff]   ;;  %v1428_v43 = vld [vmem:[%s1731_s1 + $0x100] sm:$0xff]   ;;  %v1429_v44 = vld [vmem:[%s1731_s1 + $0x108] sm:$0xff]  }
  0x10   : > { %1276 = vmatpush3.bf16.msra.mxu0 %v1400_v6  ;;  %1237 = vmatprep.subr.bf16.mxu1 %v1444_v1  ;;  %v1544_v11 = vld [vmem:[%s241_s18] sm:$0xf]  ;;  %v1427_v41 = vld [vmem:[%s1731_s1 + $0xf8] sm:$0xff]   ;;  %v1430_v45 = vld [vmem:[%s1731_s1 + $0x110] sm:$0xff]  }
  0x11   : > { %1277 = vmatprep.subr.bf16.mxu0 %v1444_v1  ;;  %v1548_v12 = vcombine.low %v1544_v11, %v1544_v11  ;;  %v1431_v46 = vld [vmem:[%s1731_s1 + $0x118] sm:$0xff]   ;;  %v1432_v47 = vld [vmem:[%s1731_s1 + $0x120] sm:$0xff]   ;;  %v1433_v48 = vld [vmem:[%s1731_s1 + $0x128] sm:$0xff]  }
  0x12   : > { %v1434_v49 = vld [vmem:[%s1731_s1 + $0x130] sm:$0xff]   ;;  %v1435_v50 = vld [vmem:[%s1731_s1 + $0x138] sm:$0xff]   ;;  %v1168_v57 = vld [vmem:[%s1732_s2] ss:$0 sm:$0xff] }
  0x13   : > { %1238 = vmatpush3.bf16.msra.mxu1 %v1401_v7  ;;  %v286_v16 = vshll.u32 %v1548_v12, 16  ;;  %v284_v18 = vshrl.u32 %v1548_v12, 16  ;;  %v484_v24 = vrot.slane %v1548_v12, 1  ;;  %v702_v51 = vrot.slane %v1548_v12, 2  ;;  %v1169_v60 = vld [vmem:[%s1733_s3] ss:$0 sm:$0xff] }
  0x14   : > { %1278 = vmatpush3.bf16.msra.mxu0 %v1402_v8  ;;  %1239 = vmatprep.subr.bf16.mxu1 %v1444_v1 }
  0x15   : > { %1279 = vmatprep.subr.bf16.mxu0 %v1444_v1  ;;  %v288_v19 = vrot.slane %v286_v16, 1  ;;  %v592_v38 = vrot.slane %v284_v18, 1  ;;  %v593_v40 = vrot.slane %v286_v16, 2 }
  0x17   : > { %1240 = vmatpush3.bf16.msra.mxu1 %v1403_v9  ;;  %v289_v22 = vor.u32 %v288_v19, %v284_v18  ;;  %v594_v42 = vor.u32 %v593_v40, %v592_v38  ;;  %v925_v18 = vld [vmem:[%s1735_s5] sm:$0xff]  ;;  %v926_v19 = vld [vmem:[%s1735_s5 + $0x8] sm:$0xff] }
  0x18   : > { %1280 = vmatpush3.bf16.msra.mxu0 %v1404_v10  ;;  %1241 = vmatprep.subr.bf16.mxu1 %v1444_v1 }
  0x19   : > { %1281 = vmatprep.subr.bf16.mxu0 %v1444_v1 }
  0x1b   : > { %1242 = vmatpush3.bf16.msra.mxu1 %v1405_v13 }
  0x1c   : > { %1282 = vmatpush3.bf16.msra.mxu0 %v1406_v14  ;;  %1243 = vmatprep.subr.bf16.mxu1 %v1444_v1 }
  0x1d   : > { %1283 = vmatprep.subr.bf16.mxu0 %v1444_v1 }
  0x1f   : > { %1244 = vmatpush3.bf16.msra.mxu1 %v1407_v15 }
  0x20   : > { %1284 = vmatpush3.bf16.msra.mxu0 %v1408_v17  ;;  %1245 = vmatprep.subr.bf16.mxu1 %v1444_v1 }
  0x21   : > { %1285 = vmatprep.subr.bf16.mxu0 %v1444_v1 }
  0x23   : > { %1246 = vmatpush3.bf16.msra.mxu1 %v1409_v20 }
  0x24   : > { %1286 = vmatpush3.bf16.msra.mxu0 %v1410_v21  ;;  %1251 = vmatprep.subr.bf16.mxu1 %v1444_v1 }
  0x25   : > { %1291 = vmatprep.subr.bf16.mxu0 %v1444_v1 }
  0x26   : > { %1248 = vmatmul.mubr.bf16.vlgmr.msra.gmra.mrb[0].mxu1 %v289_v22 }
  0x27   : > { %1252 = vmatpush3.bf16.msra.mxu1 %v1412_v23  ;;  %1288 = vmatmul.mubr.bf16.vlgmr.msra.gmra.mrb[0].mxu0 %v484_v24  ;;  %v846_v23 = vld [vmem:[%s1734_s4] sm:$0x3]  ;;  %v1356_v24 = vpack.c.bf16 %v926_v19, %v925_v18 }
  0x28   : > { %1292 = vmatpush3.bf16.msra.mxu0 %v1413_v25  ;;  %1253 = vmatprep.subr.bf16.mxu1 %v1444_v1  ;;  %v927_v25 = vld [vmem:[%s1735_s5 + $0x10] sm:$0xff] }
  0x29   : > { %1293 = vmatprep.subr.bf16.mxu0 %v1444_v1  ;;  %1267 = vmatprep.mubr.msk.bf16.mxu1 %vm1445_vm0, %v1444_v1 }
  0x2a   : > { %1307 = vmatprep.mubr.msk.bf16.mxu0 %vm1445_vm0, %v1444_v1 }
  0x2b   : > { %1254 = vmatpush3.bf16.msra.mxu1 %v1414_v26  ;;  %v928_v26 = vld [vmem:[%s1735_s5 + $0x18] sm:$0xff] }
  0x2c   : > { %1294 = vmatpush3.bf16.msra.mxu0 %v1415_v27  ;;  %1255 = vmatprep.subr.bf16.mxu1 %v1444_v1  ;;  %v1450_v27 = vmov 0.0|0.0  }
  0x2d   : > { %1295 = vmatprep.subr.bf16.mxu0 %v1444_v1 }
  0x2f   : > { %1256 = vmatpush3.bf16.msra.mxu1 %v1416_v28  ;;  %v1359_v28 = vpack.c.bf16 %v928_v26, %v927_v25 }
  0x30   : > { %1296 = vmatpush3.bf16.msra.mxu0 %v1417_v29  ;;  %1257 = vmatprep.subr.bf16.mxu1 %v1444_v1  ;;  %v929_v29 = vld [vmem:[%s1735_s5 + $0x20] sm:$0xff] }
  0x31   : > { %1297 = vmatprep.subr.bf16.mxu0 %v1444_v1 }
  0x33   : > { %1258 = vmatpush3.bf16.msra.mxu1 %v1418_v30  ;;  %v930_v30 = vld [vmem:[%s1735_s5 + $0x28] sm:$0xff] }
  0x34   : > { %1298 = vmatpush3.bf16.msra.mxu0 %v1419_v31  ;;  %1259 = vmatprep.subr.bf16.mxu1 %v1444_v1  ;;  %v1362_v31 = vpack.c.bf16 %v930_v30, %v929_v29 }
  0x35   : > { %1299 = vmatprep.subr.bf16.mxu0 %v1444_v1 }
  0x37   : > { %1260 = vmatpush3.bf16.msra.mxu1 %v1420_v32  ;;  %v931_v32 = vld [vmem:[%s1735_s5 + $0x30] sm:$0xff] }
  0x38   : > { %1300 = vmatpush3.bf16.msra.mxu0 %v1421_v33  ;;  %1261 = vmatprep.subr.bf16.mxu1 %v1444_v1 }
  0x39   : > { %1301 = vmatprep.subr.bf16.mxu0 %v1444_v1 }
  0x3b   : > { %1262 = vmatpush3.bf16.msra.mxu1 %v1422_v34 }
  0x3c   : > { %1302 = vmatpush3.bf16.msra.mxu0 %v1423_v35  ;;  %1263 = vmatprep.subr.bf16.mxu1 %v1444_v1 }
  0x3d   : > { %1303 = vmatprep.subr.bf16.mxu0 %v1444_v1 }
  0x3f   : > { %1264 = vmatpush3.bf16.msra.mxu1 %v1424_v36 }
  0x40   : > { %1304 = vmatpush3.bf16.msra.mxu0 %v1425_v37  ;;  %1265 = vmatprep.subr.bf16.mxu1 %v1444_v1 }
  0x41   : > { %1305 = vmatprep.subr.bf16.mxu0 %v1444_v1 }
  0x43   : > { %1266 = vmatpush3.bf16.msra.mxu1 %v1426_v39 }
  0x44   : > { %1306 = vmatpush3.bf16.msra.mxu0 %v1427_v41  ;;  %1331 = vmatprep.subr.mxu1 %v1444_v1 }
  0x45   : > { %1311 = vmatprep.subr.bf16.mxu0 %v1444_v1 }
  0x46   : > { %1268 = vmatmul.mubr.bf16.vlgmr.msra.gmra.mrb[0].mxu1 %v1544_v11 }
  0x47   : > { %1308 = vmatmul.mubr.bf16.vlgmr.msra.gmra.mrb[0].mxu0 %v594_v42  ;;  %1333 = vmatprep.mubr.msk.f32.mxu1 %vm1445_vm0, %v1444_v1 }
  0x48   : > { %1312 = vmatpush3.bf16.msra.mxu0 %v1428_v43  ;;  %1327 = vmatprep.mubr.msk.bf16.mxu0 %vm1445_vm0, %v1444_v1 }
  0x49   : > { %1313 = vmatprep.subr.bf16.mxu0 %v1444_v1 }
  0x4c   : > { %1314 = vmatpush3.bf16.msra.mxu0 %v1429_v44 }
  0x4d   : > { %1315 = vmatprep.subr.bf16.mxu0 %v1444_v1 }
  0x50   : > { %1316 = vmatpush3.bf16.msra.mxu0 %v1430_v45 }
  0x51   : > { %1317 = vmatprep.subr.bf16.mxu0 %v1444_v1 }
  0x54   : > { %1318 = vmatpush3.bf16.msra.mxu0 %v1431_v46 }
  0x55   : > { %1319 = vmatprep.subr.bf16.mxu0 %v1444_v1 }
  0x58   : > { %1320 = vmatpush3.bf16.msra.mxu0 %v1432_v47 }
  0x59   : > { %1321 = vmatprep.subr.bf16.mxu0 %v1444_v1 }
  0x5c   : > { %1322 = vmatpush3.bf16.msra.mxu0 %v1433_v48 }
  0x5d   : > { %1323 = vmatprep.subr.bf16.mxu0 %v1444_v1 }
  0x60   : > { %1324 = vmatpush3.bf16.msra.mxu0 %v1434_v49 }
  0x61   : > { %1325 = vmatprep.subr.bf16.mxu0 %v1444_v1 }
  0x64   : > { %1326 = vmatpush3.bf16.msra.mxu0 %v1435_v50 }
  0x67   : > { %1328 = vmatmul.mubr.bf16.vlgmr.msra.gmra.mrb[0].mxu0 %v702_v51 }
 0x119   : > { %v461_v52 = vpop.f32.mrb[0].mxu1 }
 0x11a   : > { %v1269_v53 = vpop.f32.mrb[1].mxu1 }
 0x11b   : > { %v464_v54 = vpop.f32.mrb[2].mxu1 }
 0x11c   : > { %v1270_v55 = vpop.f32.mrb[3].mxu1 }
 0x13a   : > { %v786_v56 = vpop.f32.mrb[0].mxu0 }
 0x13b   : > { %v1367_v58 = vadd.f32 %v786_v56, %v461_v52  ;;  %v1329_v59 = vpop.f32.mrb[1].mxu0 }
 0x13c   : > { %v789_v61 = vpop.f32.mrb[2].mxu0 }
 0x13d   : > { %v800_v62 = vmul.f32 %v1367_v58, %v1168_v57  ;;  %v1330_v63 = vpop.f32.mrb[3].mxu0 }
 0x13f   : > { %v808_v0 = vadd.f32 %v1169_v60, %v800_v62 }
 0x141   : > { %818 = vrot.lane.b32.xlu1 %v808_v0, %s1446_s23  ;;  %810 = vrot.lane.b32.xlu0 %v808_v0, %s1447_s24 }
 0x145   : > { %822 = vrot.lane.b32.xlu1 %v808_v0, %s1448_s25  ;;  %814 = vrot.lane.b32.xlu0 %v808_v0, %s1449_s26  ;;  %s244_s25 = scalar_lea.vmem %s1736_s6, %s1738_s22 }
 0x1b3   : > { %v811_v2 = vpop.permute.xlu0 %810  ;;  %v819_v3 = vpop.permute.xlu1 %818 }
 0x1b4   : > { %v813_v4 = vmax.f32 %v808_v0, %v811_v2 }
 0x1b7   : > { %v815_v5 = vpop.permute.xlu0 %814  ;;  %v823_v8 = vpop.permute.xlu1 %822 }
 0x1b8   : > { %v817_v6 = vmax.f32 %v813_v4, %v815_v5 }
 0x1ba   : > { %v821_v7 = vmax.f32 %v817_v6, %v819_v3 }
 0x1bc   : > { %v825_v9 = vmax.f32 %v821_v7, %v823_v8 }
 0x1be   : > { %v827_v10 = vrot.slane %v825_v9, 6 }
 0x1c0   : > { %v830_v11 = vsel %vm829_vm1, -1e+30, %v827_v10 }
 0x1c1   : > { %v832_v12 = vsel %vm831_vm2, %v830_v11, -1e+30 }
 0x1c2   : > { %v834_v13 = vrot.slane %v832_v12, 1  ;;  %v837_v15 = vrot.slane %v832_v12, 2  ;;  %v840_v16 = vrot.slane %v832_v12, 3  ;;  %v843_v21 = vrot.slane %v832_v12, 4 }
 0x1c4   : > { %v836_v14 = vmax.f32 %v832_v12, %v834_v13 }
 0x1c6   : > { %v839_v17 = vmax.f32 %v836_v14, %v837_v15 }
 0x1c8   : > { %v842_v20 = vmax.f32 %v839_v17, %v840_v16 }
 0x1ca   : > { %v845_v22 = vmax.f32 %v842_v20, %v843_v21 }
 0x1cc   : > { %1332 = vmatpush3.msk.msra.mxu1 %vm851_vm3, %v845_v22 }
 0x1cd   : > { %1334 = vmatmul.mubr.msk.f32.vlgmr.msra.gmra.mrb[4].mxu1 %vm847_vm4, %v846_v23  ;;  %1355 = vmatprep.subr.bf16.mxu1 %v1450_v27 }
 0x1ce   : > { %1357 = vmatpush3.bf16.msra.mxu1 %v1356_v24  ;;  %1352 = vmatprep.mubr.msk.f32.mxu1 %vm1445_vm0, %v1444_v1  ;;  %v932_v1 = vld [vmem:[%s1735_s5 + $0x38] sm:$0xff] }
 0x1cf   : > { %1358 = vmatprep.subr.bf16.mxu1 %v1450_v27  ;;  %v1365_v33 = vpack.c.bf16 %v932_v1, %v931_v32 }
 0x1d2   : > { %1360 = vmatpush3.bf16.msra.mxu1 %v1359_v28 }
 0x1d3   : > { %1361 = vmatprep.subr.bf16.mxu1 %v1450_v27 }
 0x1d6   : > { %1363 = vmatpush3.bf16.msra.mxu1 %v1362_v31 }
 0x1d7   : > { %1364 = vmatprep.subr.bf16.mxu1 %v1450_v27 }
 0x1da   : > { %1366 = vmatpush3.bf16.msra.mxu1 %v1365_v33 }
 0x2a0   : > { %v921_v34 = vpop.f32.mrb[4].mxu1 }
 0x2a1   : > { %v1335_v35 = vpop.f32.mrb[5].mxu1  ;;  %1353 = vmatmul.mubr.msk.f32.vlgmr.msra.gmra.mrb[6].mxu1 %vm933_vm5, %v921_v34 }
 0x374   : > { %v1003_v36 = vpop.f32.mrb[6].mxu1 }
 0x375   : > { %v1007_v37 = vpack.c.bf16 %v1003_v36, %v1003_v36  ;;  %v1354_v38 = vpop.f32.mrb[7].mxu1 }
 0x377   : > { %1009 = vst.msk [vmem:[%s244_s25] sm:$0x1] %vm1008_vm6, %v1007_v37 }
 0x378 PF: > { %s16_s21 = sadd.s32 1, %s1442_s21  }
 0x379   : > { %p13_p4 = scmp.ge.s32.totalorder %s16_s21, 4  }
 0x37b   :  { %15 = sbr.rel (!%p13_p4) target bundleno = 1 (0x1), region = 78 }

// kernel: forward.10
= control target key start
LH: loop header
LB: loop body
LE: loop exit
PB: predicated region body
PF: predicated region fallthrough
CT: control target
= control target key end

     0   :  { %v865_v2 = vmov 0   ;;  %vm97_vm0 = vcmask 523264   ;;  %s1132_s0 = inlined_call_operand.vmem [shape: bf16[2,64], index: 0, kind: input, shape index: {}]   ;;  %s1133_s1 = inlined_call_operand.vmem [shape: bf16[64,256], index: 1, kind: input, shape index: {}]   ;;  %s1134_s2 = inlined_call_operand.vmem [shape: f32[1,256], index: 2, kind: input, shape index: {}]   ;;  %s1135_s3 = inlined_call_operand.vmem [shape: bf16[256,128], index: 3, kind: input, shape index: {}]   ;;  %s1136_s4 = inlined_call_operand.vmem [shape: f32[1,128], index: 4, kind: input, shape index: {}]   ;;  %s1137_s5 = inlined_call_operand.vmem [shape: bf16[128,256], index: 5, kind: input, shape index: {}]   ;;  %s1138_s6 = inlined_call_operand.vmem [shape: f32[1,256], index: 6, kind: input, shape index: {}]   ;;  %s1139_s7 = inlined_call_operand.vmem [shape: bf16[256,64], index: 7, kind: input, shape index: {}]   ;;  %s1140_s8 = inlined_call_operand.vmem [shape: f32[1,64], index: 8, kind: input, shape index: {}]   ;;  %s1141_s9 = inlined_call_operand.hbm [shape: f32[2,128], index: 9, kind: output, shape index: {0}]   ;;  %s1142_s10 = inlined_call_operand.vmem [shape: bf16[2,64], index: 10, kind: output, shape index: {1}]  }
   0x1   :  { %v773_v0 = vld [vmem:[%s1133_s1 + $0x4] ss:$8 sps:$4 sm:$0xff]   ;;  %v775_v1 = vld [vmem:[%s1133_s1] ss:$8 sps:$4 sm:$0xff]   ;;  %133 = vmatprep.mubr.bf16.mxu0 %v865_v2  ;;  %v776_v3 = vld [vmem:[%s1133_s1 + $0x14] ss:$8 sps:$4 sm:$0xff]  }
   0x2   :  { %101 = vmatprep.subr.bf16.mxu0 %v773_v0  ;;  %v778_v4 = vld [vmem:[%s1133_s1 + $0x10] ss:$8 sps:$4 sm:$0xff]   ;;  %v779_v5 = vld [vmem:[%s1133_s1 + $0x24] ss:$8 sps:$4 sm:$0xff]   ;;  %v781_v6 = vld [vmem:[%s1133_s1 + $0x20] ss:$8 sps:$4 sm:$0xff]  }
   0x3   :  { %102 = vmatpush1.bf16.msra.mxu0 %v775_v1  ;;  %v782_v7 = vld [vmem:[%s1133_s1 + $0x34] ss:$8 sps:$4 sm:$0xff]   ;;  %v785_v8 = vld [vmem:[%s1135_s3 + $0x40] sm:$0xff]   ;;  %v787_v10 = vld [vmem:[%s1135_s3 + $0x48] sm:$0xff]  }
   0x4   :  { %103 = vmatprep.subr.bf16.mxu0 %v776_v3  ;;  %v786_v9 = vld [vmem:[%s1135_s3] sm:$0xff]   ;;  %727 = vmatprep.subr.bf16.mxu1 %v785_v8  ;;  %v788_v11 = vld [vmem:[%s1135_s3 + $0x8] sm:$0xff]   ;;  %v789_v12 = vld [vmem:[%s1135_s3 + $0x50] sm:$0xff]  }
   0x5   :  { %728 = vmatpush3.bf16.msra.mxu1 %v786_v9  ;;  %v784_v13 = vld [vmem:[%s1133_s1 + $0x30] ss:$8 sps:$4 sm:$0xff]   ;;  %v36_v16 = vld [vmem:[%s1132_s0] sm:$0x1]  ;;  %v795_v20 = vld [vmem:[%s1135_s3 + $0x68] sm:$0xff]  }
   0x6   :  { %729 = vmatprep.subr.bf16.mxu1 %v787_v10  ;;  %v790_v14 = vld [vmem:[%s1135_s3 + $0x10] sm:$0xff]   ;;  %v791_v15 = vld [vmem:[%s1135_s3 + $0x58] sm:$0xff]   ;;  %v793_v18 = vld [vmem:[%s1135_s3 + $0x60] sm:$0xff]  }
   0x7   :  { %104 = vmatpush1.bf16.msra.mxu0 %v778_v4  ;;  %v792_v17 = vld [vmem:[%s1135_s3 + $0x18] sm:$0xff]   ;;  %v794_v19 = vld [vmem:[%s1135_s3 + $0x20] sm:$0xff]   ;;  %v796_v21 = vld [vmem:[%s1135_s3 + $0x28] sm:$0xff]  }
   0x8   :  { %105 = vmatprep.subr.bf16.mxu0 %v779_v5  ;;  %v797_v22 = vld [vmem:[%s1135_s3 + $0x70] sm:$0xff]  }
   0x9   :  { %730 = vmatpush3.bf16.msra.mxu1 %v788_v11 }
   0xa   :  { %731 = vmatprep.subr.bf16.mxu1 %v789_v12 }
   0xb   :  { %106 = vmatpush1.bf16.msra.mxu0 %v781_v6 }
   0xc   :  { %107 = vmatprep.subr.bf16.mxu0 %v782_v7 }
   0xd   :  { %732 = vmatpush3.bf16.msra.mxu1 %v790_v14 }
   0xe   :  { %733 = vmatprep.subr.bf16.mxu1 %v791_v15 }
   0xf   :  { %108 = vmatpush1.bf16.msra.mxu0 %v784_v13 }
  0x11   :  { %734 = vmatpush3.bf16.msra.mxu1 %v792_v17 }
  0x12   :  { %676 = vmatmul.mubr.msk.bf16.vlgmr.msra.gmra.mrb[0].mxu0 %vm97_vm0, %v36_v16  ;;  %735 = vmatprep.subr.bf16.mxu1 %v793_v18 }
  0x13   :  { %461 = vmatprep.mubr.bf16.mxu0 %v865_v2 }
  0x15   :  { %736 = vmatpush3.bf16.msra.mxu1 %v794_v19 }
  0x16   :  { %737 = vmatprep.subr.bf16.mxu1 %v795_v20 }
  0x19   :  { %738 = vmatpush3.bf16.msra.mxu1 %v796_v21 }
  0x1a   :  { %739 = vmatprep.subr.bf16.mxu1 %v797_v22 }
  0x1b   :  { %16 = vsyncpa [#allocation3], 0  ;;  %v798_v23 = vld [vmem:[%s1135_s3 + $0x30] sm:$0xff]   ;;  %v799_v24 = vld [vmem:[%s1135_s3 + $0x78] sm:$0xff]   ;;  %v47_v38 = vlaneseq }
  0x1c   :  { %v800_v25 = vld [vmem:[%s1135_s3 + $0x38] sm:$0xff]   ;;  %v801_v26 = vld [vmem:[%s1137_s5] ss:$8 sps:$4 sm:$0xff]   ;;  %v803_v27 = vld [vmem:[%s1137_s5 + $0x4] ss:$8 sps:$4 sm:$0xff]  }
  0x1d   :  { %740 = vmatpush3.bf16.msra.mxu1 %v798_v23  ;;  %v806_v28 = vld [vmem:[%s1137_s5 + $0x14] ss:$8 sps:$4 sm:$0xff]   ;;  %429 = vmatprep.subr.bf16.mxu0 %v803_v27  ;;  %v804_v29 = vld [vmem:[%s1137_s5 + $0x10] ss:$8 sps:$4 sm:$0xff]   ;;  %v809_v30 = vld [vmem:[%s1137_s5 + $0x24] ss:$8 sps:$4 sm:$0xff]  }
  0x1e   :  { %741 = vmatprep.subr.bf16.mxu1 %v799_v24  ;;  %430 = vmatpush1.bf16.msra.mxu0 %v801_v26  ;;  %v807_v31 = vld [vmem:[%s1137_s5 + $0x20] ss:$8 sps:$4 sm:$0xff]   ;;  %v812_v32 = vld [vmem:[%s1137_s5 + $0x34] ss:$8 sps:$4 sm:$0xff]   ;;  %v810_v33 = vld [vmem:[%s1137_s5 + $0x30] ss:$8 sps:$4 sm:$0xff]  }
  0x1f   :  { %431 = vmatprep.subr.bf16.mxu0 %v806_v28  ;;  %v815_v34 = vld [vmem:[%s1137_s5 + $0x44] ss:$8 sps:$4 sm:$0xff]   ;;  %v813_v35 = vld [vmem:[%s1137_s5 + $0x40] ss:$8 sps:$4 sm:$0xff]   ;;  %v818_v36 = vld [vmem:[%s1137_s5 + $0x54] ss:$8 sps:$4 sm:$0xff]  }
  0x20   :  { %v816_v37 = vld [vmem:[%s1137_s5 + $0x50] ss:$8 sps:$4 sm:$0xff]   ;;  %v1033_v39 = vshrl.u32 %v47_v38, 7  ;;  %v45_v41 = vld [vmem:[%s1134_s2] sm:$0x3]  ;;  %v827_v59 = vld [vmem:[%s1139_s7 + $0x48] sm:$0xff]  }
  0x21   :  { %742 = vmatpush3.bf16.msra.mxu1 %v800_v25  ;;  %v821_v53 = vld [vmem:[%s1137_s5 + $0x64] ss:$8 sps:$4 sm:$0xff]   ;;  %v819_v54 = vld [vmem:[%s1137_s5 + $0x60] ss:$8 sps:$4 sm:$0xff]   ;;  %v824_v55 = vld [vmem:[%s1137_s5 + $0x74] ss:$8 sps:$4 sm:$0xff]  }
  0x22   :  { %432 = vmatpush1.bf16.msra.mxu0 %v804_v29  ;;  %v49_v40 = vsub.s32 0, %v1033_v39  ;;  %v53_v42 = vsub.s32 1, %v1033_v39  ;;  %v822_v56 = vld [vmem:[%s1137_s5 + $0x70] ss:$8 sps:$4 sm:$0xff]   ;;  %v825_v57 = vld [vmem:[%s1139_s7 + $0x40] sm:$0xff]   ;;  %v828_v60 = vld [vmem:[%s1139_s7 + $0x8] sm:$0xff]  }
  0x23   :  { %433 = vmatprep.subr.bf16.mxu0 %v809_v30  ;;  %v826_v58 = vld [vmem:[%s1139_s7] sm:$0xff]   ;;  %749 = vmatprep.subr.bf16.mxu1 %v825_v57  ;;  %v829_v61 = vld [vmem:[%s1139_s7 + $0x50] sm:$0xff]   ;;  %v831_v63 = vld [vmem:[%s1139_s7 + $0x58] sm:$0xff]  }
  0x24   :  { %v50_v43 = vrot.slane %v45_v41, %v49_v40  ;;  %v54_v44 = vrot.slane %v45_v41, %v53_v42  ;;  %v830_v62 = vld [vmem:[%s1139_s7 + $0x10] sm:$0xff]   ;;  %v832_v0 = vld [vmem:[%s1139_s7 + $0x18] sm:$0xff]   ;;  %v833_v1 = vld [vmem:[%s1139_s7 + $0x60] sm:$0xff]  }
  0x25   :  { %v834_v2 = vld [vmem:[%s1139_s7 + $0x20] sm:$0xff]   ;;  %v835_v3 = vld [vmem:[%s1139_s7 + $0x68] sm:$0xff]   ;;  %v837_v5 = vld [vmem:[%s1139_s7 + $0x70] sm:$0xff]  }
  0x26   :  { %434 = vmatpush1.bf16.msra.mxu0 %v807_v31  ;;  %v836_v4 = vld [vmem:[%s1139_s7 + $0x28] sm:$0xff]   ;;  %v677_v7 = vld [vmem:[%s1136_s4] ss:$0 sm:$0xff]  ;;  %v838_v14 = vld [vmem:[%s1139_s7 + $0x30] sm:$0xff]  }
  0x27   :  { %435 = vmatprep.subr.bf16.mxu0 %v812_v32  ;;  %v839_v15 = vld [vmem:[%s1139_s7 + $0x78] sm:$0xff]   ;;  %v337_v17 = vld [vmem:[%s1138_s6] sm:$0x3] }
  0x28   :  { %v840_v16 = vld [vmem:[%s1139_s7 + $0x38] sm:$0xff]   ;;  %v342_v18 = vrot.slane %v337_v17, %v49_v40  ;;  %v346_v19 = vrot.slane %v337_v17, %v53_v42  ;;  %s866_s7 = smov [#allocation2]  }
  0x29   :  { %s656_s17 = sshll.u32 %s866_s7, 4  ;;  %s657_s17 = int_to_ptr.vmem [resolvable:$true] %s656_s17 }
  0x2a   :  { %436 = vmatpush1.bf16.msra.mxu0 %v810_v33  ;;  %s841_s6 = scalar_lea.vmem %s657_s17, 32  ;;  %p846_p1 = scmp.lt.s32.totalorder %s657_s17, %s657_s17 }
  0x2b   :  { %437 = vmatprep.subr.bf16.mxu0 %v815_v34  ;;  %p842_p0 = scmp.ne.s32.totalorder %s657_s17, %s841_s6  ;;  %p847_p2 = scmp.lt.s32.totalorder %s841_s6, %s841_s6 }
  0x2d   :  { %p848_p3 = por %p847_p2, %p846_p1 }
  0x2e   :  { %438 = vmatpush1.bf16.msra.mxu0 %v813_v35 }
  0x2f   :  { %439 = vmatprep.subr.bf16.mxu0 %v818_v36  ;;  %p849_p4 = pnand %p848_p3, %p842_p0 }
  0x32   :  { %440 = vmatpush1.bf16.msra.mxu0 %v816_v37 }
  0x33   :  { %441 = vmatprep.subr.bf16.mxu0 %v821_v53 }
  0x36   :  { %442 = vmatpush1.bf16.msra.mxu0 %v819_v54 }
  0x37   :  { %443 = vmatprep.subr.bf16.mxu0 %v824_v55 }
  0x3a   :  { %444 = vmatpush1.bf16.msra.mxu0 %v822_v56 }
  0xe5   :  { %v135_v45 = vpop.f32.mrb[0].mxu0 }
  0xe6   :  { %v136_v46 = vadd.f32 %v135_v45, %v50_v43  ;;  %v137_v47 = vpop.f32.mrb[1].mxu0 }
  0xe7   :  { %v139_v48 = vpop.f32.mrb[2].mxu0  ;;  %v138_v49 = vadd.f32 %v137_v47, %v54_v44 }
  0xe8   :  { %v140_v50 = vpop.f32.mrb[3].mxu0  ;;  %v142_v52 = vpack.c.bf16 %v136_v46, %v136_v46 }
  0xe9   :  { %v143_v51 = vpack.c.bf16 %v138_v49, %v138_v49 }
  0xeb   :  { %311 = vmatprep.mubr.bf16.mxu1 %v143_v51 }
  0xec   :  { %312 = vmatmul.mubr.bf16.vlgmr.msra.gmra.mrb[0].mxu1 %v142_v52 }
  0xed   :  { %750 = vmatpush3.bf16.msra.mxu1 %v826_v58 }
  0xee   :  { %751 = vmatprep.subr.bf16.mxu1 %v827_v59 }
  0xf1   :  { %752 = vmatpush3.bf16.msra.mxu1 %v828_v60 }
  0xf2   :  { %753 = vmatprep.subr.bf16.mxu1 %v829_v61 }
  0xf5   :  { %754 = vmatpush3.bf16.msra.mxu1 %v830_v62 }
  0xf6   :  { %755 = vmatprep.subr.bf16.mxu1 %v831_v63 }
  0xf9   :  { %756 = vmatpush3.bf16.msra.mxu1 %v832_v0 }
  0xfa   :  { %757 = vmatprep.subr.bf16.mxu1 %v833_v1 }
  0xfd   :  { %758 = vmatpush3.bf16.msra.mxu1 %v834_v2 }
  0xfe   :  { %759 = vmatprep.subr.bf16.mxu1 %v835_v3 }
 0x101   :  { %760 = vmatpush3.bf16.msra.mxu1 %v836_v4 }
 0x102   :  { %761 = vmatprep.subr.bf16.mxu1 %v837_v5 }
 0x105   :  { %762 = vmatpush3.bf16.msra.mxu1 %v838_v14 }
 0x106   :  { %763 = vmatprep.subr.bf16.mxu1 %v839_v15 }
 0x109   :  { %764 = vmatpush3.bf16.msra.mxu1 %v840_v16 }
 0x1bf   :  { %v743_v6 = vpop.f32.mrb[0].mxu1 }
 0x1c0   :  { %v744_v8 = vpop.f32.mrb[1].mxu1 }
 0x1c1   :  { %v745_v9 = vadd.f32 %v744_v8, %v743_v6  ;;  %v746_v10 = vpop.f32.mrb[2].mxu1 }
 0x1c2   :  { %v747_v11 = vpop.f32.mrb[3].mxu1 }
 0x1c3   :  { %v314_v12 = vadd.f32 %v745_v9, %v677_v7 }
 0x1c5   :  { %v320_v13 = vpack.c.bf16 %v314_v12, %v314_v12  ;;  %319 = vst [vmem:[#allocation2] sm:$0x3] %v314_v12 }
 0x1c7   :  { %462 = vmatmul.mubr.bf16.vlgmr.msra.gmra.mrb[4].mxu0 %v320_v13 }
 0x29a   :  { %v463_v20 = vpop.f32.mrb[4].mxu0 }
 0x29b   :  { %v464_v21 = vadd.f32 %v463_v20, %v342_v18  ;;  %v465_v22 = vpop.f32.mrb[5].mxu0 }
 0x29c   :  { %v466_v23 = vadd.f32 %v465_v22, %v346_v19  ;;  %v467_v24 = vpop.f32.mrb[6].mxu0 }
 0x29d   :  { %v468_v25 = vpop.f32.mrb[7].mxu0  ;;  %v470_v27 = vpack.c.bf16 %v464_v21, %v464_v21 }
 0x29e   :  { %v471_v26 = vpack.c.bf16 %v466_v23, %v466_v23 }
 0x2a0   :  { %639 = vmatprep.mubr.bf16.mxu1 %v471_v26 }
 0x2a1   :  { %640 = vmatmul.mubr.bf16.vlgmr.msra.gmra.mrb[4].mxu1 %v470_v27 }
 0x2a2   :  { %852 = shalt.err (!%p849_p4)
}
 0x2a3   :  { %s853_s20 = scalar_lea.hbm %s1141_s9, 32 }
 0x2a4   :  { %p854_p5 = scmp.ne.s32.totalorder %s1141_s9, %s853_s20  ;;  %p857_p6 = scmp.lt.u32.totalorder %s853_s20, %s1141_s9 }
 0x2a6   :  { %p859_p7 = pnand %p857_p6, %p854_p5 }
 0x2a8   :  { %862 = shalt.err (!%p859_p7)
}
 0x2a9   :  { %659 = dma.vmem_to_hbm [thread:$0]  %s657_s17, 32, %s1141_s9, [#allocation3]   ;;  %v710_v29 = vld [vmem:[%s1140_s8] ss:$0 sm:$0xff]  ;;  %vm648_vm1 = vcmask 516096  }
 0x374   :  { %v765_v28 = vpop.f32.mrb[4].mxu1 }
 0x375   :  { %v766_v30 = vpop.f32.mrb[5].mxu1 }
 0x376   :  { %v767_v31 = vadd.f32 %v766_v30, %v765_v28  ;;  %v768_v32 = vpop.f32.mrb[6].mxu1 }
 0x377   :  { %v769_v33 = vpop.f32.mrb[7].mxu1 }
 0x378   :  { %v642_v34 = vadd.f32 %v767_v31, %v710_v29 }
 0x37a   :  { %v647_v35 = vpack.c.bf16 %v642_v34, %v642_v34 }
 0x37c   :  { %649 = vst.msk [vmem:[%s1142_s10] sm:$0x1] %vm648_vm1, %v647_v35 }
 0x37d   :  { %863 = dma.done.wait [#allocation3], 32  }
 0x37e   :  { %864 = vsyncadd [#allocation3], 4294967264 }
 0x37f   :  { %667 = vsyncpa [#allocation3], 1 }

// kernel: tile.128
= control target key start
LH: loop header
LB: loop body
LE: loop exit
PB: predicated region body
PF: predicated region fallthrough
CT: control target
= control target key end

     0   :  { %s22_s0 = inlined_call_operand.vmem [shape: f32[8], index: 0, kind: input, shape index: {}]   ;;  %s23_s1 = inlined_call_operand.vmem [shape: f32[8,8], index: 1, kind: output, shape index: {}]  }
   0x1   :  { %v4_v0 = vld [vmem:[%s22_s0] ss:$0 sm:$0xff] }
   0x2   :  { %5 = vst [vmem:[%s23_s1] sm:$0xff] %v4_v0 }

// kernel: tile.129
= control target key start
LH: loop header
LB: loop body
LE: loop exit
PB: predicated region body
PF: predicated region fallthrough
CT: control target
= control target key end

     0   :  { %s67_s10 = smov 56   ;;  %s68_s11 = smov 40   ;;  %vm3_vm0 = vcmask 64512   ;;  %vm9_vm1 = vcmask 523712   ;;  %vm15_vm2 = vcmask 458112   ;;  %vm21_vm3 = vcmask 392512   ;;  %s111_s0 = inlined_call_operand.vmem [shape: f32[8,8], index: 0, kind: input, shape index: {}]   ;;  %s112_s1 = inlined_call_operand.vmem [shape: f32[1,64], index: 1, kind: output, shape index: {}]  }
   0x1   :  { %v53_v0 = vld [vmem:[%s111_s0 + $0x7] sm:$0x1]   ;;  %v55_v1 = vld [vmem:[%s111_s0 + $0x5] sm:$0x1]   ;;  %v54_v2 = vld [vmem:[%s111_s0 + $0x6] sm:$0x1]  }
   0x2   :  { %7 = vrot.lane.b32.xlu0 %v53_v0, %s67_s10  ;;  %19 = vrot.lane.b32.xlu1 %v55_v1, %s68_s11  ;;  %v56_v3 = vld [vmem:[%s111_s0 + $0x4] sm:$0x1]   ;;  %v2_v4 = vld [vmem:[%s111_s0] sm:$0x1]   ;;  %s69_s18 = smov 48   ;;  %s70_s19 = smov 32  }
   0x3   :  { %4 = vst.msk [vmem:[#allocation0] sm:$0x1] %vm3_vm0, %v2_v4   ;;  %v57_v5 = vld [vmem:[%s111_s0 + $0x3] sm:$0x1]   ;;  %v58_v6 = vld [vmem:[%s111_s0 + $0x2] sm:$0x1]  }
   0x4   :  { %s71_s24 = smov 24   ;;  %s72_s25 = smov 16   ;;  %v59_v7 = vld [vmem:[%s111_s0 + $0x1] sm:$0x1]   ;;  %vm27_vm4 = vcmask 326912   ;;  %vm33_vm5 = vcmask 261312  }
   0x5   :  { %s73_s0 = smov 8   ;;  %vm39_vm6 = vcmask 195712   ;;  %vm45_vm7 = vcmask 130112  }
   0x6   :  { %13 = vrot.lane.b32.xlu0 %v54_v2, %s69_s18  ;;  %25 = vrot.lane.b32.xlu1 %v56_v3, %s70_s19 }
   0xa   :  { %31 = vrot.lane.b32.xlu0 %v57_v5, %s71_s24  ;;  %37 = vrot.lane.b32.xlu1 %v58_v6, %s72_s25 }
   0xe   :  { %43 = vrot.lane.b32.xlu0 %v59_v7, %s73_s0 }
  0x74   :  { %v8_v8 = vpop.permute.xlu0 %7   ;;  %v20_v9 = vpop.permute.xlu1 %19  }
  0x75   :  { %10 = vst.msk [vmem:[#allocation0] sm:$0x1] %vm9_vm1, %v8_v8  }
  0x78   :  { %v14_v10 = vpop.permute.xlu0 %13   ;;  %v26_v11 = vpop.permute.xlu1 %25  }
  0x79   :  { %16 = vst.msk [vmem:[#allocation0] sm:$0x1] %vm15_vm2, %v14_v10  }
  0x7a   :  { %22 = vst.msk [vmem:[#allocation0] sm:$0x1] %vm21_vm3, %v20_v9  }
  0x7b   :  { %28 = vst.msk [vmem:[#allocation0] sm:$0x1] %vm27_vm4, %v26_v11  }
  0x7c   :  { %v32_v12 = vpop.permute.xlu0 %31   ;;  %v38_v13 = vpop.permute.xlu1 %37  }
  0x7d   :  { %34 = vst.msk [vmem:[#allocation0] sm:$0x1] %vm33_vm5, %v32_v12  }
  0x7e   :  { %40 = vst.msk [vmem:[#allocation0] sm:$0x1] %vm39_vm6, %v38_v13  }
  0x80   :  { %v44_v14 = vpop.permute.xlu0 %43  }
  0x81   :  { %46 = vst.msk [vmem:[#allocation0] sm:$0x1] %vm45_vm7, %v44_v14  }
  0x88   :  { %v50_v15 = vld [vmem:[#allocation0] sm:$0x1] }
  0x89   :  { %52 = vst [vmem:[%s112_s1] sm:$0x1] %v50_v15 }

// kernel: forward.11
= control target key start
LH: loop header
LB: loop body
LE: loop exit
PB: predicated region body
PF: predicated region fallthrough
CT: control target
= control target key end

     0   :  { %s1362_s21 = smov 0   ;;  %s1582_s0 = inlined_call_operand.vmem [shape: bf16[2,2,32], index: 0, kind: input, shape index: {}]   ;;  %s1583_s1 = inlined_call_operand.vmem [shape: bf16[8,2], index: 1, kind: input, shape index: {}]   ;;  %s1584_s2 = inlined_call_operand.vmem [shape: bf16[32,128], index: 2, kind: input, shape index: {}]   ;;  %s1585_s3 = inlined_call_operand.vmem [shape: bf16[5,128,64], index: 3, kind: input, shape index: {}]   ;;  %s1586_s4 = inlined_call_operand.vmem [shape: f32[1,64], index: 4, kind: input, shape index: {}]   ;;  %s1587_s5 = inlined_call_operand.vmem [shape: f32[1,64], index: 5, kind: input, shape index: {}]   ;;  %s1588_s6 = inlined_call_operand.vmem [shape: bf16[2,4,64], index: 6, kind: output, shape index: {}]  }
   0x1 LB: > { %s970_s22 = sadd.s32 4294967295, %s1323_s21   ;;  %p974_p0 = scmp.ge.s32.totalorder %s1323_s21, 1  ;;  %s1323_s21 = sphi %s1362_s21, %s16_s21  }
   0x2   : > { %p210_p1 = scmp.lt.s32.totalorder %s1323_s21, 3 }
   0x4   : > { %p211_p2 = pnand %p974_p0, %p210_p1 }
   0x5   : > { %p237_p3 = scmp.lt.s32.totalorder (!%p211_p2), %s970_s22, 1  ;;  %v1325_v0 = vmov (!%p211_p2), 0.0   ;;  %vm1326_vm0 = vmmov (!%p211_p2), 0   ;;  %vm251_vm1 = vcmask (!%p211_p2), 1040384   ;;  %vm247_vm2 = vcmask (!%p211_p2), 15360   ;;  %v1275_v4 = vld [vmem:[%s1584_s2] sm:$0xff] (!%p211_p2)  }
   0x6   : > { %214 = sbr.rel (%p211_p2) target bundleno = 735 (0x2df), region = 44  ;;  %1138 = vmatprep.subr.bf16.mxu1 (!%p211_p2), %v1325_v0  ;;  %1140 = vmatprep.mubr.msk.bf16.mxu1 (!%p211_p2), %vm1326_vm0, %v1325_v0  ;;  %v246_v2 = vld [vmem:[%s1583_s1] sm:$0xf] (!%p211_p2)  ;;  %v1276_v5 = vld [vmem:[%s1584_s2 + $0x8] sm:$0xff] (!%p211_p2)   ;;  %v1281_v8 = vld [vmem:[%s1585_s3 + $0x90] sm:$0xff] (!%p211_p2)   ;;  %vm312_vm3 = vcmask (!%p211_p2), 261120  }
   0x7   : > { %1192 = vmatprep.subr.bf16.mxu0 (!%p211_p2), %v1325_v0  ;;  %1208 = vmatprep.mubr.msk.bf16.mxu0 (!%p211_p2), %vm1326_vm0, %v1325_v0  ;;  %v1277_v6 = vld [vmem:[%s1585_s3 + $0x80] sm:$0xff] (!%p211_p2)   ;;  %v1279_v7 = vld [vmem:[%s1585_s3 + $0x88] sm:$0xff] (!%p211_p2)   ;;  %v1283_v9 = vld [vmem:[%s1585_s3 + $0x98] sm:$0xff] (!%p211_p2)   ;;  %vm918_vm4 = vcmask (!%p211_p2), 517120  }
   0x8   : > { %1193 = vmatpush3.bf16.msra.mxu0 (!%p211_p2), %v1277_v6  ;;  %v1285_v10 = vld [vmem:[%s1585_s3 + $0xa0] sm:$0xff] (!%p211_p2)   ;;  %v1287_v11 = vld [vmem:[%s1585_s3 + $0xa8] sm:$0xff] (!%p211_p2)   ;;  %v1289_v12 = vld [vmem:[%s1585_s3 + $0xb0] sm:$0xff] (!%p211_p2)  }
   0x9   : > { %1194 = vmatprep.subr.bf16.mxu0 (!%p211_p2), %v1325_v0  ;;  %v1278_v14 = vld [vmem:[%s1585_s3 + $0x40] sm:$0xff] (!%p211_p2)   ;;  %v1280_v19 = vld [vmem:[%s1585_s3 + $0x48] sm:$0xff] (!%p211_p2)   ;;  %v1282_v20 = vld [vmem:[%s1585_s3 + $0x50] sm:$0xff] (!%p211_p2)  }
   0xa   : > { %v1284_v21 = vld [vmem:[%s1585_s3 + $0x58] sm:$0xff] (!%p211_p2)   ;;  %v1286_v22 = vld [vmem:[%s1585_s3 + $0x60] sm:$0xff] (!%p211_p2)   ;;  %v1288_v23 = vld [vmem:[%s1585_s3 + $0x68] sm:$0xff] (!%p211_p2)  }
   0xb   : > { %v1290_v24 = vld [vmem:[%s1585_s3 + $0x70] sm:$0xff] (!%p211_p2)   ;;  %v1291_v25 = vld [vmem:[%s1585_s3 + $0xb8] sm:$0xff] (!%p211_p2)   ;;  %v1293_v31 = vld [vmem:[%s1585_s3 + $0xc0] sm:$0xff] (!%p211_p2)  }
   0xc   : > { %1195 = vmatpush3.bf16.msra.mxu0 (!%p211_p2), %v1279_v7  ;;  %v1292_v26 = vld [vmem:[%s1585_s3 + $0x78] sm:$0xff] (!%p211_p2)   ;;  %v1294_v37 = vld [vmem:[%s1585_s3] sm:$0xff] (!%p211_p2)   ;;  %v1295_v38 = vld [vmem:[%s1585_s3 + $0xc8] sm:$0xff] (!%p211_p2)  }
   0xd   : > { %s1590_s22 = smov (!%p237_p3, %s970_s22), 1  ;;  %1196 = vmatprep.subr.bf16.mxu0 %v1325_v0  ;;  %v1296_v40 = vld [vmem:[%s1585_s3 + $0x8] sm:$0xff]   ;;  %v1297_v41 = vld [vmem:[%s1585_s3 + $0xd0] sm:$0xff]   ;;  %v1299_v43 = vld [vmem:[%s1585_s3 + $0xd8] sm:$0xff]  }
   0xe   : > { %s239_s25 = scalar_lea.vmem %s1582_s0, %s1590_s22  ;;  %v1298_v42 = vld [vmem:[%s1585_s3 + $0x10] sm:$0xff]   ;;  %v1300_v44 = vld [vmem:[%s1585_s3 + $0x18] sm:$0xff]   ;;  %v1301_v45 = vld [vmem:[%s1585_s3 + $0xe0] sm:$0xff]   ;;  %s975_s28 = sshll.u32 %s1590_s22, 1 }
   0xf   : > { %v245_v1 = vld [vmem:[%s239_s25] sm:$0x1]  ;;  %v1303_v47 = vld [vmem:[%s1585_s3 + $0xe8] sm:$0xff]   ;;  %v1305_v49 = vld [vmem:[%s1585_s3 + $0xf0] sm:$0xff]   ;;  %s243_s7 = scalar_lea.vmem %s1588_s6, %s975_s28 }
  0x10   : > { %v253_v3 = vsel %vm251_vm1, %v245_v1, 0  ;;  %1197 = vmatpush3.bf16.msra.mxu0 %v1281_v8  ;;  %v1302_v46 = vld [vmem:[%s1585_s3 + $0x20] sm:$0xff]   ;;  %v1304_v48 = vld [vmem:[%s1585_s3 + $0x28] sm:$0xff]   ;;  %v1306_v50 = vld [vmem:[%s1585_s3 + $0x30] sm:$0xff]  }
  0x11   : > { %1139 = vmatpush3.bf16.msra.mxu1 %v253_v3  ;;  %1198 = vmatprep.subr.bf16.mxu0 %v1325_v0  ;;  %v1307_v51 = vld [vmem:[%s1585_s3 + $0xf8] sm:$0xff]   ;;  %v1309_v55 = vld [vmem:[%s1585_s3 + $0x100] sm:$0xff]   ;;  %v1310_v57 = vld [vmem:[%s1585_s3 + $0x108] sm:$0xff]  }
  0x12   : > { %1144 = vmatprep.subr.bf16.mxu1 %v1325_v0  ;;  %v1308_v54 = vld [vmem:[%s1585_s3 + $0x38] sm:$0xff]   ;;  %v1311_v58 = vld [vmem:[%s1585_s3 + $0x110] sm:$0xff]   ;;  %v1313_v60 = vld [vmem:[%s1585_s3 + $0x120] sm:$0xff]  }
  0x13   : > { %v1312_v59 = vld [vmem:[%s1585_s3 + $0x118] sm:$0xff]   ;;  %v1314_v61 = vld [vmem:[%s1585_s3 + $0x128] sm:$0xff]   ;;  %v1315_v62 = vld [vmem:[%s1585_s3 + $0x130] sm:$0xff]  }
  0x14   : > { %1141 = vmatmul.mubr.msk.bf16.vlgmr.msra.gmra.mrb[0].mxu1 %vm247_vm2, %v246_v2  ;;  %1199 = vmatpush3.bf16.msra.mxu0 %v1283_v9  ;;  %v1316_v63 = vld [vmem:[%s1585_s3 + $0x138] sm:$0xff]   ;;  %v1084_v7 = vld [vmem:[%s1586_s4] ss:$0 sm:$0xff] }
  0x15   : > { %1145 = vmatpush3.bf16.msra.mxu1 %v1275_v4  ;;  %1148 = vmatprep.mubr.msk.bf16.mxu1 %vm1326_vm0, %v1325_v0 }
  0x16   : > { %1146 = vmatprep.subr.bf16.mxu1 %v1325_v0  ;;  %1200 = vmatprep.subr.bf16.mxu0 %v1325_v0 }
  0x18   : > { %1201 = vmatpush3.bf16.msra.mxu0 %v1285_v10  ;;  %v1085_v10 = vld [vmem:[%s1587_s5] ss:$0 sm:$0xff] }
  0x19   : > { %1147 = vmatpush3.bf16.msra.mxu1 %v1276_v5  ;;  %1202 = vmatprep.subr.bf16.mxu0 %v1325_v0 }
  0x1a   : > { %1152 = vmatprep.subr.bf16.mxu1 %v1325_v0 }
  0x1c   : > { %1203 = vmatpush3.bf16.msra.mxu0 %v1287_v11 }
  0x1d   : > { %1204 = vmatprep.subr.bf16.mxu0 %v1325_v0 }
  0x20   : > { %1205 = vmatpush3.bf16.msra.mxu0 %v1289_v12 }
  0x21   : > { %1206 = vmatprep.subr.bf16.mxu0 %v1325_v0 }
  0x24   : > { %1207 = vmatpush3.bf16.msra.mxu0 %v1291_v25 }
  0x25   : > { %1212 = vmatprep.subr.bf16.mxu0 %v1325_v0 }
  0xe7   : > { %v289_v13 = vpop.f32.mrb[0].mxu1 }
  0xe8   : > { %v295_v15 = vpack.c.bf16 %v289_v13, %v289_v13  ;;  %v1142_v16 = vpop.f32.mrb[1].mxu1 }
  0xe9   : > { %v292_v17 = vpop.f32.mrb[2].mxu1 }
  0xea   : > { %v1143_v18 = vpop.f32.mrb[3].mxu1  ;;  %1149 = vmatmul.mubr.msk.bf16.vlgmr.msra.gmra.mrb[4].mxu1 %vm312_vm3, %v295_v15 }
  0xeb   : > { %1153 = vmatpush3.bf16.msra.mxu1 %v1278_v14  ;;  %1168 = vmatprep.mubr.msk.bf16.mxu1 %vm1326_vm0, %v1325_v0 }
  0xec   : > { %1154 = vmatprep.subr.bf16.mxu1 %v1325_v0 }
  0xef   : > { %1155 = vmatpush3.bf16.msra.mxu1 %v1280_v19 }
  0xf0   : > { %1156 = vmatprep.subr.bf16.mxu1 %v1325_v0 }
  0xf3   : > { %1157 = vmatpush3.bf16.msra.mxu1 %v1282_v20 }
  0xf4   : > { %1158 = vmatprep.subr.bf16.mxu1 %v1325_v0 }
  0xf7   : > { %1159 = vmatpush3.bf16.msra.mxu1 %v1284_v21 }
  0xf8   : > { %1160 = vmatprep.subr.bf16.mxu1 %v1325_v0 }
  0xfb   : > { %1161 = vmatpush3.bf16.msra.mxu1 %v1286_v22 }
  0xfc   : > { %1162 = vmatprep.subr.bf16.mxu1 %v1325_v0 }
  0xff   : > { %1163 = vmatpush3.bf16.msra.mxu1 %v1288_v23 }
 0x100   : > { %1164 = vmatprep.subr.bf16.mxu1 %v1325_v0 }
 0x103   : > { %1165 = vmatpush3.bf16.msra.mxu1 %v1290_v24 }
 0x104   : > { %1166 = vmatprep.subr.bf16.mxu1 %v1325_v0 }
 0x107   : > { %1167 = vmatpush3.bf16.msra.mxu1 %v1292_v26 }
 0x108   : > { %1172 = vmatprep.subr.bf16.mxu1 %v1325_v0 }
 0x1bd   : > { %v350_v27 = vpop.f32.mrb[4].mxu1 }
 0x1be   : > { %v1462_v28 = vpack.c.bf16 %v350_v27, %v350_v27  ;;  %v1150_v29 = vpop.f32.mrb[5].mxu1 }
 0x1bf   : > { %v353_v30 = vpop.f32.mrb[6].mxu1 }
 0x1c0   : > { %v1151_v32 = vpop.f32.mrb[7].mxu1  ;;  %v592_v33 = vrot.slane %v1462_v28, 1  ;;  %v393_v34 = vshll.u32 %v1462_v28, 16  ;;  %v391_v35 = vshrl.u32 %v1462_v28, 16  ;;  %v810_v1 = vrot.slane %v1462_v28, 2 }
 0x1c2   : > { %1209 = vmatmul.mubr.bf16.vlgmr.msra.gmra.mrb[0].mxu0 %v592_v33  ;;  %v395_v36 = vrot.slane %v393_v34, 1  ;;  %v700_v52 = vrot.slane %v391_v35, 1  ;;  %v701_v53 = vrot.slane %v393_v34, 2 }
 0x1c3   : > { %1213 = vmatpush3.bf16.msra.mxu0 %v1293_v31  ;;  %1228 = vmatprep.mubr.msk.bf16.mxu0 %vm1326_vm0, %v1325_v0 }
 0x1c4   : > { %1214 = vmatprep.subr.bf16.mxu0 %v1325_v0  ;;  %v396_v39 = vor.u32 %v395_v36, %v391_v35  ;;  %v702_v56 = vor.u32 %v701_v53, %v700_v52 }
 0x1c6   : > { %1169 = vmatmul.mubr.bf16.vlgmr.msra.gmra.mrb[8].mxu1 %v396_v39 }
 0x1c7   : > { %1173 = vmatpush3.bf16.msra.mxu1 %v1294_v37  ;;  %1215 = vmatpush3.bf16.msra.mxu0 %v1295_v38 }
 0x1c8   : > { %1174 = vmatprep.subr.bf16.mxu1 %v1325_v0  ;;  %1216 = vmatprep.subr.bf16.mxu0 %v1325_v0 }
 0x1c9   : > { %1188 = vmatprep.mubr.msk.bf16.mxu1 %vm1326_vm0, %v1325_v0 }
 0x1cb   : > { %1175 = vmatpush3.bf16.msra.mxu1 %v1296_v40  ;;  %1217 = vmatpush3.bf16.msra.mxu0 %v1297_v41 }
 0x1cc   : > { %1176 = vmatprep.subr.bf16.mxu1 %v1325_v0  ;;  %1218 = vmatprep.subr.bf16.mxu0 %v1325_v0 }
 0x1cf   : > { %1177 = vmatpush3.bf16.msra.mxu1 %v1298_v42  ;;  %1219 = vmatpush3.bf16.msra.mxu0 %v1299_v43 }
 0x1d0   : > { %1178 = vmatprep.subr.bf16.mxu1 %v1325_v0  ;;  %1220 = vmatprep.subr.bf16.mxu0 %v1325_v0 }
 0x1d3   : > { %1179 = vmatpush3.bf16.msra.mxu1 %v1300_v44  ;;  %1221 = vmatpush3.bf16.msra.mxu0 %v1301_v45 }
 0x1d4   : > { %1180 = vmatprep.subr.bf16.mxu1 %v1325_v0  ;;  %1222 = vmatprep.subr.bf16.mxu0 %v1325_v0 }
 0x1d7   : > { %1181 = vmatpush3.bf16.msra.mxu1 %v1302_v46  ;;  %1223 = vmatpush3.bf16.msra.mxu0 %v1303_v47 }
 0x1d8   : > { %1182 = vmatprep.subr.bf16.mxu1 %v1325_v0  ;;  %1224 = vmatprep.subr.bf16.mxu0 %v1325_v0 }
 0x1db   : > { %1183 = vmatpush3.bf16.msra.mxu1 %v1304_v48  ;;  %1225 = vmatpush3.bf16.msra.mxu0 %v1305_v49 }
 0x1dc   : > { %1184 = vmatprep.subr.bf16.mxu1 %v1325_v0  ;;  %1226 = vmatprep.subr.bf16.mxu0 %v1325_v0 }
 0x1df   : > { %1185 = vmatpush3.bf16.msra.mxu1 %v1306_v50  ;;  %1227 = vmatpush3.bf16.msra.mxu0 %v1307_v51 }
 0x1e0   : > { %1186 = vmatprep.subr.bf16.mxu1 %v1325_v0  ;;  %1232 = vmatprep.subr.bf16.mxu0 %v1325_v0 }
 0x1e2   : > { %1229 = vmatmul.mubr.bf16.vlgmr.msra.gmra.mrb[0].mxu0 %v702_v56 }
 0x1e3   : > { %1187 = vmatpush3.bf16.msra.mxu1 %v1308_v54  ;;  %1233 = vmatpush3.bf16.msra.mxu0 %v1309_v55 }
 0x1e4   : > { %1234 = vmatprep.subr.bf16.mxu0 %v1325_v0  ;;  %1248 = vmatprep.mubr.msk.bf16.mxu0 %vm1326_vm0, %v1325_v0 }
 0x1e6   : > { %1189 = vmatmul.mubr.bf16.vlgmr.msra.gmra.mrb[8].mxu1 %v1462_v28 }
 0x1e7   : > { %1235 = vmatpush3.bf16.msra.mxu0 %v1310_v57 }
 0x1e8   : > { %1236 = vmatprep.subr.bf16.mxu0 %v1325_v0 }
 0x1eb   : > { %1237 = vmatpush3.bf16.msra.mxu0 %v1311_v58 }
 0x1ec   : > { %1238 = vmatprep.subr.bf16.mxu0 %v1325_v0 }
 0x1ef   : > { %1239 = vmatpush3.bf16.msra.mxu0 %v1312_v59 }
 0x1f0   : > { %1240 = vmatprep.subr.bf16.mxu0 %v1325_v0 }
 0x1f3   : > { %1241 = vmatpush3.bf16.msra.mxu0 %v1313_v60 }
 0x1f4   : > { %1242 = vmatprep.subr.bf16.mxu0 %v1325_v0 }
 0x1f7   : > { %1243 = vmatpush3.bf16.msra.mxu0 %v1314_v61 }
 0x1f8   : > { %1244 = vmatprep.subr.bf16.mxu0 %v1325_v0 }
 0x1fb   : > { %1245 = vmatpush3.bf16.msra.mxu0 %v1315_v62 }
 0x1fc   : > { %1246 = vmatprep.subr.bf16.mxu0 %v1325_v0 }
 0x1ff   : > { %1247 = vmatpush3.bf16.msra.mxu0 %v1316_v63 }
 0x202   : > { %1249 = vmatmul.mubr.bf16.vlgmr.msra.gmra.mrb[0].mxu0 %v810_v1 }
 0x2b9   : > { %v568_v2 = vpop.f32.mrb[8].mxu1 }
 0x2ba   : > { %v1190_v3 = vpop.f32.mrb[9].mxu1 }
 0x2bb   : > { %v571_v4 = vpop.f32.mrb[10].mxu1 }
 0x2bc   : > { %v1191_v5 = vpop.f32.mrb[11].mxu1 }
 0x2d5   : > { %v894_v6 = vpop.f32.mrb[0].mxu0 }
 0x2d6   : > { %v1252_v8 = vadd.f32 %v894_v6, %v568_v2  ;;  %v1250_v9 = vpop.f32.mrb[1].mxu0 }
 0x2d7   : > { %v897_v0 = vpop.f32.mrb[2].mxu0 }
 0x2d8   : > { %v908_v11 = vmul.f32 %v1252_v8, %v1084_v7  ;;  %v1251_v12 = vpop.f32.mrb[3].mxu0 }
 0x2da   : > { %v916_v13 = vadd.f32 %v1085_v10, %v908_v11 }
 0x2dc   : > { %v917_v14 = vpack.c.bf16 %v916_v13, %v916_v13 }
 0x2de   : > { %919 = vst.msk [vmem:[%s243_s7] sm:$0x3] %vm918_vm4, %v917_v14 }
 0x2df PF: > { %s16_s21 = sadd.s32 1, %s1323_s21  }
 0x2e0   : > { %p13_p4 = scmp.ge.s32.totalorder %s16_s21, 4  }
 0x2e2   :  { %15 = sbr.rel (!%p13_p4) target bundleno = 1 (0x1), region = 78 }

// kernel: forward.12
= control target key start
LH: loop header
LB: loop body
LE: loop exit
PB: predicated region body
PF: predicated region fallthrough
CT: control target
= control target key end

     0   :  { %s1540_s21 = smov 0   ;;  %s1863_s0 = inlined_call_operand.vmem [shape: bf16[2,4,64], index: 0, kind: input, shape index: {}]   ;;  %s1864_s1 = inlined_call_operand.vmem [shape: bf16[12,4], index: 1, kind: input, shape index: {}]   ;;  %s1865_s2 = inlined_call_operand.vmem [shape: bf16[64,192], index: 2, kind: input, shape index: {}]   ;;  %s1866_s3 = inlined_call_operand.vmem [shape: bf16[5,192,64], index: 3, kind: input, shape index: {}]   ;;  %s1867_s4 = inlined_call_operand.vmem [shape: f32[1,64], index: 4, kind: input, shape index: {}]   ;;  %s1868_s5 = inlined_call_operand.vmem [shape: f32[1,64], index: 5, kind: input, shape index: {}]   ;;  %s1869_s6 = inlined_call_operand.vmem [shape: bf16[2,8,64], index: 6, kind: output, shape index: {}]  }
   0x1 LB: > { %s1206_s22 = sadd.s32 4294967295, %s1500_s21   ;;  %p1210_p0 = scmp.ge.s32.totalorder %s1500_s21, 1  ;;  %s1500_s21 = sphi %s1540_s21, %s16_s21  }
   0x2   : > { %p211_p1 = scmp.lt.s32.totalorder %s1500_s21, 3 }
   0x4   : > { %p212_p2 = pnand %p1210_p0, %p211_p1 }
   0x5   : > { %p239_p3 = scmp.lt.s32.totalorder (!%p212_p2), %s1206_s22, 1  ;;  %v1502_v0 = vmov (!%p212_p2), 0.0   ;;  %vm1503_vm0 = vmmov (!%p212_p2), 0   ;;  %vm260_vm1 = vcmask (!%p212_p2), 1041408   ;;  %v1421_v1 = vld [vmem:[%s1864_s1] sm:$0x3f] (!%p212_p2)  }
   0x6   : > { %215 = sbr.rel (%p212_p2) target bundleno = 774 (0x306), region = 44  ;;  %1391 = vmatprep.subr.bf16.mxu1 (!%p212_p2), %v1502_v0  ;;  %1393 = vmatprep.mubr.msk.bf16.mxu1 (!%p212_p2), %vm1503_vm0, %v1502_v0  ;;  %v1424_v2 = vld [vmem:[%s1865_s2 + $0x4] ss:$8 sps:$4 sm:$0xff] (!%p212_p2)   ;;  %v1422_v4 = vld [vmem:[%s1865_s2] ss:$8 sps:$4 sm:$0xff] (!%p212_p2)   ;;  %vm256_vm2 = vcmask (!%p212_p2), 31744  }
   0x7   : > { %v1427_v6 = vld [vmem:[%s1865_s2 + $0x14] ss:$8 sps:$4 sm:$0xff] (!%p212_p2)   ;;  %v1425_v7 = vld [vmem:[%s1865_s2 + $0x10] ss:$8 sps:$4 sm:$0xff] (!%p212_p2)   ;;  %v1430_v8 = vld [vmem:[%s1865_s2 + $0x24] ss:$8 sps:$4 sm:$0xff] (!%p212_p2)  }
   0x8   : > { %v1428_v9 = vld [vmem:[%s1865_s2 + $0x20] ss:$8 sps:$4 sm:$0xff] (!%p212_p2)   ;;  %v1433_v10 = vld [vmem:[%s1865_s2 + $0x34] ss:$8 sps:$4 sm:$0xff] (!%p212_p2)   ;;  %v1431_v11 = vld [vmem:[%s1865_s2 + $0x30] ss:$8 sps:$4 sm:$0xff] (!%p212_p2)  }
   0x9   : > { %v1504_v12 = vmov (!%p212_p2), 0   ;;  %v1434_v13 = vld [vmem:[%s1866_s3 + $0xc0] sm:$0xff] (!%p212_p2)   ;;  %v1436_v14 = vld [vmem:[%s1866_s3 + $0xc8] sm:$0xff] (!%p212_p2)   ;;  %v1438_v15 = vld [vmem:[%s1866_s3 + $0xd0] sm:$0xff] (!%p212_p2)   ;;  %vm354_vm3 = vcmask (!%p212_p2), 523264   ;;  %vm1151_vm4 = vcmask (!%p212_p2), 519168  }
   0xa   : > { %801 = vmatprep.subr.bf16.mxu0 (!%p212_p2), %v1504_v12  ;;  %v1440_v16 = vld [vmem:[%s1866_s3 + $0xd8] sm:$0xff] (!%p212_p2)   ;;  %v1442_v17 = vld [vmem:[%s1866_s3 + $0xe0] sm:$0xff] (!%p212_p2)   ;;  %v1444_v18 = vld [vmem:[%s1866_s3 + $0xe8] sm:$0xff] (!%p212_p2)  }
   0xb   : > { %802 = vmatpush1.bf16.msra.mxu0 (!%p212_p2), %v1434_v13  ;;  %v1446_v19 = vld [vmem:[%s1866_s3 + $0xf0] sm:$0xff] (!%p212_p2)   ;;  %v1448_v20 = vld [vmem:[%s1866_s3 + $0xf8] sm:$0xff] (!%p212_p2)   ;;  %v1450_v21 = vld [vmem:[%s1866_s3 + $0x100] sm:$0xff] (!%p212_p2)  }
   0xc   : > { %803 = vmatprep.subr.bf16.mxu0 (!%p212_p2), %v1504_v12  ;;  %v1452_v22 = vld [vmem:[%s1866_s3 + $0x108] sm:$0xff] (!%p212_p2)   ;;  %v1435_v26 = vld [vmem:[%s1866_s3 + $0x60] sm:$0xff] (!%p212_p2)   ;;  %v1439_v30 = vld [vmem:[%s1866_s3 + $0x70] sm:$0xff] (!%p212_p2)  }
   0xd   : > { %s1871_s22 = smov (!%p239_p3, %s1206_s22), 1  ;;  %v1437_v29 = vld [vmem:[%s1866_s3 + $0x68] sm:$0xff]   ;;  %v1441_v31 = vld [vmem:[%s1866_s3 + $0x78] sm:$0xff]   ;;  %v1443_v32 = vld [vmem:[%s1866_s3 + $0x80] sm:$0xff]  }
   0xe   : > { %s1211_s23 = sshll.u32 %s1871_s22, 1  ;;  %v1445_v33 = vld [vmem:[%s1866_s3 + $0x88] sm:$0xff]   ;;  %v1447_v34 = vld [vmem:[%s1866_s3 + $0x90] sm:$0xff]   ;;  %v1449_v35 = vld [vmem:[%s1866_s3 + $0x98] sm:$0xff]   ;;  %s1212_s13 = sshll.u32 %s1871_s22, 2 }
   0xf   : > { %s242_s26 = scalar_lea.vmem %s1863_s0, %s1211_s23  ;;  %804 = vmatpush1.bf16.msra.mxu0 %v1436_v14  ;;  %v1451_v36 = vld [vmem:[%s1866_s3 + $0xa0] sm:$0xff]   ;;  %v1453_v37 = vld [vmem:[%s1866_s3 + $0xa8] sm:$0xff]   ;;  %v1454_v38 = vld [vmem:[%s1866_s3 + $0x110] sm:$0xff]   ;;  %s246_s16 = scalar_lea.vmem %s1869_s6, %s1212_s13 }
  0x10   : > { %v248_v3 = vld [vmem:[%s242_s26] sm:$0x3]  ;;  %805 = vmatprep.subr.bf16.mxu0 %v1504_v12  ;;  %v1455_v39 = vld [vmem:[%s1866_s3 + $0xb0] sm:$0xff]   ;;  %v1456_v40 = vld [vmem:[%s1866_s3 + $0x118] sm:$0xff]  }
  0x11   : > { %v262_v5 = vsel %vm260_vm1, %v248_v3, 0  ;;  %v1457_v41 = vld [vmem:[%s1866_s3 + $0xb8] sm:$0xff]   ;;  %v1458_v50 = vld [vmem:[%s1866_s3 + $0x120] sm:$0xff]   ;;  %v1460_v62 = vld [vmem:[%s1866_s3 + $0x128] sm:$0xff]  }
  0x12   : > { %1392 = vmatpush3.bf16.msra.mxu1 %v262_v5  ;;  %v1459_v61 = vld [vmem:[%s1866_s3] sm:$0xff]   ;;  %v1461_v0 = vld [vmem:[%s1866_s3 + $0x8] sm:$0xff]   ;;  %v1464_v3 = vld [vmem:[%s1866_s3 + $0x138] sm:$0xff]  }
  0x13   : > { %358 = vmatprep.subr.bf16.mxu1 %v1424_v2  ;;  %806 = vmatpush1.bf16.msra.mxu0 %v1438_v15  ;;  %v1463_v2 = vld [vmem:[%s1866_s3 + $0x10] sm:$0xff]   ;;  %v1466_v5 = vld [vmem:[%s1866_s3 + $0x140] sm:$0xff]   ;;  %v1473_v13 = vld [vmem:[%s1866_s3 + $0x38] sm:$0xff]  }
  0x14   : > { %807 = vmatprep.subr.bf16.mxu0 %v1504_v12  ;;  %v1474_v14 = vld [vmem:[%s1866_s3 + $0x160] sm:$0xff]  }
  0x15   : > { %1394 = vmatmul.mubr.msk.bf16.vlgmr.msra.gmra.mrb[0].mxu1 %vm256_vm2, %v1421_v1  ;;  %v1462_v1 = vld [vmem:[%s1866_s3 + $0x130] sm:$0xff]   ;;  %v1475_v15 = vld [vmem:[%s1866_s3 + $0x40] sm:$0xff]  }
  0x16   : > { %359 = vmatpush1.bf16.msra.mxu1 %v1422_v4  ;;  %390 = vmatprep.mubr.bf16.mxu1 %v1504_v12  ;;  %v1465_v4 = vld [vmem:[%s1866_s3 + $0x18] sm:$0xff]  }
  0x17   : > { %360 = vmatprep.subr.bf16.mxu1 %v1427_v6  ;;  %808 = vmatpush1.bf16.msra.mxu0 %v1440_v16  ;;  %v1467_v6 = vld [vmem:[%s1866_s3 + $0x20] sm:$0xff]   ;;  %v1476_v16 = vld [vmem:[%s1866_s3 + $0x168] sm:$0xff]  }
  0x18   : > { %809 = vmatprep.subr.bf16.mxu0 %v1504_v12 }
  0x1a   : > { %361 = vmatpush1.bf16.msra.mxu1 %v1425_v7  ;;  %v1468_v7 = vld [vmem:[%s1866_s3 + $0x148] sm:$0xff]  }
  0x1b   : > { %362 = vmatprep.subr.bf16.mxu1 %v1430_v8  ;;  %810 = vmatpush1.bf16.msra.mxu0 %v1442_v17  ;;  %v1469_v8 = vld [vmem:[%s1866_s3 + $0x28] sm:$0xff]  }
  0x1c   : > { %811 = vmatprep.subr.bf16.mxu0 %v1504_v12  ;;  %v1477_v17 = vld [vmem:[%s1866_s3 + $0x48] sm:$0xff]  }
  0x1e   : > { %363 = vmatpush1.bf16.msra.mxu1 %v1428_v9  ;;  %v1470_v9 = vld [vmem:[%s1866_s3 + $0x150] sm:$0xff]  }
  0x1f   : > { %364 = vmatprep.subr.bf16.mxu1 %v1433_v10  ;;  %812 = vmatpush1.bf16.msra.mxu0 %v1444_v18  ;;  %v1471_v10 = vld [vmem:[%s1866_s3 + $0x30] sm:$0xff]  }
  0x20   : > { %813 = vmatprep.subr.bf16.mxu0 %v1504_v12  ;;  %v1478_v18 = vld [vmem:[%s1866_s3 + $0x170] sm:$0xff]  }
  0x22   : > { %365 = vmatpush1.bf16.msra.mxu1 %v1431_v11  ;;  %v1472_v11 = vld [vmem:[%s1866_s3 + $0x158] sm:$0xff]  }
  0x23   : > { %542 = vmatprep.subr.bf16.mxu1 %v1504_v12  ;;  %814 = vmatpush1.bf16.msra.mxu0 %v1446_v19  ;;  %v1479_v19 = vld [vmem:[%s1866_s3 + $0x50] sm:$0xff]  }
  0x24   : > { %815 = vmatprep.subr.bf16.mxu0 %v1504_v12 }
  0x27   : > { %816 = vmatpush1.bf16.msra.mxu0 %v1448_v20  ;;  %v1480_v20 = vld [vmem:[%s1866_s3 + $0x178] sm:$0xff]  }
  0x28   : > { %817 = vmatprep.subr.bf16.mxu0 %v1504_v12 }
  0x2b   : > { %818 = vmatpush1.bf16.msra.mxu0 %v1450_v21 }
  0x2c   : > { %819 = vmatprep.subr.bf16.mxu0 %v1504_v12 }
  0x2f   : > { %820 = vmatpush1.bf16.msra.mxu0 %v1452_v22 }
  0x30   : > { %821 = vmatprep.subr.bf16.mxu0 %v1504_v12 }
  0x33   : > { %822 = vmatpush1.bf16.msra.mxu0 %v1454_v38 }
  0x34   : > { %823 = vmatprep.subr.bf16.mxu0 %v1504_v12 }
  0x37   : > { %824 = vmatpush1.bf16.msra.mxu0 %v1456_v40 }
  0x38   : > { %949 = vmatprep.subr.bf16.mxu0 %v1504_v12 }
  0xe8   : > { %v298_v23 = vpop.f32.mrb[0].mxu1 }
  0xe9   : > { %v1395_v24 = vpop.f32.mrb[1].mxu1 }
  0xea   : > { %v301_v25 = vpop.f32.mrb[2].mxu1  ;;  %v1482_v24 = vld [vmem:[%s1866_s3 + $0x180] sm:$0xff]  }
  0xeb   : > { %v305_v27 = vpack.c.bf16 %v301_v25, %v298_v23  ;;  %v1396_v28 = vpop.f32.mrb[3].mxu1  ;;  %v1481_v23 = vld [vmem:[%s1866_s3 + $0x58] sm:$0xff]  }
  0xec   : > { %v1484_v28 = vld [vmem:[%s1866_s3 + $0x190] sm:$0xff]  }
  0xed   : > { %1223 = vmatmul.mubr.msk.bf16.vlgmr.msra.gmra.mrb[4].mxu1 %vm354_vm3, %v305_v27  ;;  %v1483_v27 = vld [vmem:[%s1866_s3 + $0x188] sm:$0xff]  }
  0xee   : > { %543 = vmatpush1.bf16.msra.mxu1 %v1435_v26 }
  0xef   : > { %544 = vmatprep.subr.bf16.mxu1 %v1504_v12 }
  0xf2   : > { %545 = vmatpush1.bf16.msra.mxu1 %v1437_v29  ;;  %v1485_v29 = vld [vmem:[%s1866_s3 + $0x198] sm:$0xff]  }
  0xf3   : > { %546 = vmatprep.subr.bf16.mxu1 %v1504_v12 }
  0xf6   : > { %547 = vmatpush1.bf16.msra.mxu1 %v1439_v30  ;;  %v1486_v30 = vld [vmem:[%s1866_s3 + $0x1a0] sm:$0xff]  }
  0xf7   : > { %548 = vmatprep.subr.bf16.mxu1 %v1504_v12 }
  0xfa   : > { %549 = vmatpush1.bf16.msra.mxu1 %v1441_v31  ;;  %v1487_v31 = vld [vmem:[%s1866_s3 + $0x1a8] sm:$0xff]  }
  0xfb   : > { %550 = vmatprep.subr.bf16.mxu1 %v1504_v12 }
  0xfe   : > { %551 = vmatpush1.bf16.msra.mxu1 %v1443_v32  ;;  %v1488_v32 = vld [vmem:[%s1866_s3 + $0x1b0] sm:$0xff]  }
  0xff   : > { %552 = vmatprep.subr.bf16.mxu1 %v1504_v12 }
 0x102   : > { %553 = vmatpush1.bf16.msra.mxu1 %v1445_v33  ;;  %v1489_v33 = vld [vmem:[%s1866_s3 + $0x1b8] sm:$0xff]  }
 0x103   : > { %554 = vmatprep.subr.bf16.mxu1 %v1504_v12 }
 0x106   : > { %555 = vmatpush1.bf16.msra.mxu1 %v1447_v34  ;;  %v1490_v34 = vld [vmem:[%s1866_s3 + $0x1c0] sm:$0xff]  }
 0x107   : > { %556 = vmatprep.subr.bf16.mxu1 %v1504_v12 }
 0x10a   : > { %557 = vmatpush1.bf16.msra.mxu1 %v1449_v35  ;;  %v1491_v35 = vld [vmem:[%s1866_s3 + $0x1c8] sm:$0xff]  }
 0x10b   : > { %558 = vmatprep.subr.bf16.mxu1 %v1504_v12 }
 0x10e   : > { %559 = vmatpush1.bf16.msra.mxu1 %v1451_v36  ;;  %v1492_v36 = vld [vmem:[%s1866_s3 + $0x1d0] sm:$0xff]  }
 0x10f   : > { %560 = vmatprep.subr.bf16.mxu1 %v1504_v12 }
 0x112   : > { %561 = vmatpush1.bf16.msra.mxu1 %v1453_v37  ;;  %v1493_v37 = vld [vmem:[%s1866_s3 + $0x1d8] sm:$0xff]  }
 0x113   : > { %562 = vmatprep.subr.bf16.mxu1 %v1504_v12 }
 0x116   : > { %563 = vmatpush1.bf16.msra.mxu1 %v1455_v39 }
 0x117   : > { %564 = vmatprep.subr.bf16.mxu1 %v1504_v12 }
 0x11a   : > { %565 = vmatpush1.bf16.msra.mxu1 %v1457_v41 }
 0x11b   : > { %656 = vmatprep.subr.bf16.mxu1 %v1504_v12 }
 0x1c0   : > { %v392_v42 = vpop.f32.mrb[4].mxu1 }
 0x1c1   : > { %v394_v43 = vpop.f32.mrb[5].mxu1 }
 0x1c2   : > { %v396_v44 = vpop.f32.mrb[6].mxu1 }
 0x1c3   : > { %v1681_v45 = vpack.c.bf16 %v396_v44, %v392_v42  ;;  %v398_v46 = vpop.f32.mrb[7].mxu1  ;;  %v1385_v44 = vld [vmem:[%s1867_s4] ss:$0 sm:$0xff] }
 0x1c4   : > { %v1683_v47 = vpack.c.bf16 %v398_v46, %v394_v43 }
 0x1c5   : > { %v455_v48 = vshll.u32 %v1681_v45, 16  ;;  %v723_v53 = vrot.slane %v1681_v45, 1  ;;  %v453_v58 = vshrl.u32 %v1681_v45, 16  ;;  %v1015_v38 = vrot.slane %v1681_v45, 2 }
 0x1c6   : > { %v724_v49 = vrot.slane %v1683_v47, 1  ;;  %v460_v51 = vshrl.u32 %v1683_v47, 16  ;;  %v462_v52 = vshll.u32 %v1683_v47, 16  ;;  %v1016_v26 = vrot.slane %v1683_v47, 2 }
 0x1c7   : > { %v457_v54 = vrot.slane %v455_v48, 1  ;;  %v867_v21 = vrot.slane %v453_v58, 1  ;;  %v868_v22 = vrot.slane %v455_v48, 2  ;;  %v1386_v48 = vld [vmem:[%s1868_s5] ss:$0 sm:$0xff] }
 0x1c8   : > { %1310 = vmatprep.mubr.msk.bf16.mxu0 %vm354_vm3, %v724_v49  ;;  %v464_v55 = vrot.slane %v462_v52, 1  ;;  %v870_v56 = vrot.slane %v460_v51, 1  ;;  %v871_v57 = vrot.slane %v462_v52, 2 }
 0x1c9   : > { %834 = vmatmul.mubr.bf16.vlgmr.msra.gmra.mrb[0].mxu0 %v723_v53  ;;  %v458_v63 = vor.u32 %v457_v54, %v453_v58  ;;  %v869_v25 = vor.u32 %v868_v22, %v867_v21 }
 0x1ca   : > { %950 = vmatpush1.bf16.msra.mxu0 %v1458_v50  ;;  %v465_v59 = vor.u32 %v464_v55, %v460_v51  ;;  %v872_v60 = vor.u32 %v871_v57, %v870_v56 }
 0x1cb   : > { %951 = vmatprep.subr.bf16.mxu0 %v1504_v12 }
 0x1cc   : > { %1260 = vmatprep.mubr.msk.bf16.mxu1 %vm354_vm3, %v465_v59  ;;  %1347 = vmatprep.mubr.msk.bf16.mxu0 %vm354_vm3, %v872_v60 }
 0x1cd   : > { %575 = vmatmul.mubr.bf16.vlgmr.msra.gmra.mrb[8].mxu1 %v458_v63 }
 0x1ce   : > { %657 = vmatpush1.bf16.msra.mxu1 %v1459_v61  ;;  %952 = vmatpush1.bf16.msra.mxu0 %v1460_v62 }
 0x1cf   : > { %1273 = vmatprep.mubr.msk.bf16.mxu1 %vm354_vm3, %v1683_v47  ;;  %658 = vmatprep.subr.bf16.mxu1 %v1504_v12 }
 0x1d0   : > { %953 = vmatprep.subr.bf16.mxu0 %v1504_v12 }
 0x1d2   : > { %659 = vmatpush1.bf16.msra.mxu1 %v1461_v0  ;;  %954 = vmatpush1.bf16.msra.mxu0 %v1462_v1 }
 0x1d3   : > { %660 = vmatprep.subr.bf16.mxu1 %v1504_v12  ;;  %955 = vmatprep.subr.bf16.mxu0 %v1504_v12 }
 0x1d6   : > { %661 = vmatpush1.bf16.msra.mxu1 %v1463_v2  ;;  %956 = vmatpush1.bf16.msra.mxu0 %v1464_v3 }
 0x1d7   : > { %662 = vmatprep.subr.bf16.mxu1 %v1504_v12  ;;  %957 = vmatprep.subr.bf16.mxu0 %v1504_v12 }
 0x1da   : > { %663 = vmatpush1.bf16.msra.mxu1 %v1465_v4  ;;  %958 = vmatpush1.bf16.msra.mxu0 %v1466_v5 }
 0x1db   : > { %664 = vmatprep.subr.bf16.mxu1 %v1504_v12  ;;  %959 = vmatprep.subr.bf16.mxu0 %v1504_v12 }
 0x1de   : > { %665 = vmatpush1.bf16.msra.mxu1 %v1467_v6  ;;  %960 = vmatpush1.bf16.msra.mxu0 %v1468_v7 }
 0x1df   : > { %666 = vmatprep.subr.bf16.mxu1 %v1504_v12  ;;  %961 = vmatprep.subr.bf16.mxu0 %v1504_v12 }
 0x1e2   : > { %667 = vmatpush1.bf16.msra.mxu1 %v1469_v8  ;;  %962 = vmatpush1.bf16.msra.mxu0 %v1470_v9 }
 0x1e3   : > { %668 = vmatprep.subr.bf16.mxu1 %v1504_v12  ;;  %963 = vmatprep.subr.bf16.mxu0 %v1504_v12 }
 0x1e6   : > { %669 = vmatpush1.bf16.msra.mxu1 %v1471_v10  ;;  %964 = vmatpush1.bf16.msra.mxu0 %v1472_v11 }
 0x1e7   : > { %670 = vmatprep.subr.bf16.mxu1 %v1504_v12  ;;  %965 = vmatprep.subr.bf16.mxu0 %v1504_v12 }
 0x1ea   : > { %671 = vmatpush1.bf16.msra.mxu1 %v1473_v13  ;;  %966 = vmatpush1.bf16.msra.mxu0 %v1474_v14 }
 0x1eb   : > { %672 = vmatprep.subr.bf16.mxu1 %v1504_v12  ;;  %967 = vmatprep.subr.bf16.mxu0 %v1504_v12 }
 0x1ee   : > { %673 = vmatpush1.bf16.msra.mxu1 %v1475_v15  ;;  %968 = vmatpush1.bf16.msra.mxu0 %v1476_v16 }
 0x1ef   : > { %674 = vmatprep.subr.bf16.mxu1 %v1504_v12  ;;  %969 = vmatprep.subr.bf16.mxu0 %v1504_v12 }
 0x1f2   : > { %675 = vmatpush1.bf16.msra.mxu1 %v1477_v17  ;;  %970 = vmatpush1.bf16.msra.mxu0 %v1478_v18 }
 0x1f3   : > { %676 = vmatprep.subr.bf16.mxu1 %v1504_v12  ;;  %971 = vmatprep.subr.bf16.mxu0 %v1504_v12 }
 0x1f6   : > { %677 = vmatpush1.bf16.msra.mxu1 %v1479_v19  ;;  %972 = vmatpush1.bf16.msra.mxu0 %v1480_v20 }
 0x1f7   : > { %678 = vmatprep.subr.bf16.mxu1 %v1504_v12  ;;  %1093 = vmatprep.subr.bf16.mxu0 %v1504_v12 }
 0x1f9   : > { %982 = vmatmul.mubr.bf16.vlgmr.msra.gmra.mrb[0].mxu0 %v869_v25 }
 0x1fa   : > { %679 = vmatpush1.bf16.msra.mxu1 %v1481_v23  ;;  %1094 = vmatpush1.bf16.msra.mxu0 %v1482_v24 }
 0x1fb   : > { %1384 = vmatprep.mubr.msk.bf16.mxu0 %vm354_vm3, %v1016_v26  ;;  %1095 = vmatprep.subr.bf16.mxu0 %v1504_v12 }
 0x1fd   : > { %689 = vmatmul.mubr.bf16.vlgmr.msra.gmra.mrb[8].mxu1 %v1681_v45 }
 0x1fe   : > { %1096 = vmatpush1.bf16.msra.mxu0 %v1483_v27 }
 0x1ff   : > { %1097 = vmatprep.subr.bf16.mxu0 %v1504_v12 }
 0x202   : > { %1098 = vmatpush1.bf16.msra.mxu0 %v1484_v28 }
 0x203   : > { %1099 = vmatprep.subr.bf16.mxu0 %v1504_v12 }
 0x206   : > { %1100 = vmatpush1.bf16.msra.mxu0 %v1485_v29 }
 0x207   : > { %1101 = vmatprep.subr.bf16.mxu0 %v1504_v12 }
 0x20a   : > { %1102 = vmatpush1.bf16.msra.mxu0 %v1486_v30 }
 0x20b   : > { %1103 = vmatprep.subr.bf16.mxu0 %v1504_v12 }
 0x20e   : > { %1104 = vmatpush1.bf16.msra.mxu0 %v1487_v31 }
 0x20f   : > { %1105 = vmatprep.subr.bf16.mxu0 %v1504_v12 }
 0x212   : > { %1106 = vmatpush1.bf16.msra.mxu0 %v1488_v32 }
 0x213   : > { %1107 = vmatprep.subr.bf16.mxu0 %v1504_v12 }
 0x216   : > { %1108 = vmatpush1.bf16.msra.mxu0 %v1489_v33 }
 0x217   : > { %1109 = vmatprep.subr.bf16.mxu0 %v1504_v12 }
 0x21a   : > { %1110 = vmatpush1.bf16.msra.mxu0 %v1490_v34 }
 0x21b   : > { %1111 = vmatprep.subr.bf16.mxu0 %v1504_v12 }
 0x21e   : > { %1112 = vmatpush1.bf16.msra.mxu0 %v1491_v35 }
 0x21f   : > { %1113 = vmatprep.subr.bf16.mxu0 %v1504_v12 }
 0x222   : > { %1114 = vmatpush1.bf16.msra.mxu0 %v1492_v36 }
 0x223   : > { %1115 = vmatprep.subr.bf16.mxu0 %v1504_v12 }
 0x226   : > { %1116 = vmatpush1.bf16.msra.mxu0 %v1493_v37 }
 0x229   : > { %1126 = vmatmul.mubr.bf16.vlgmr.msra.gmra.mrb[0].mxu0 %v1015_v38 }
 0x2d0   : > { %v690_v39 = vpop.f32.mrb[8].mxu1 }
 0x2d1   : > { %v692_v40 = vpop.f32.mrb[9].mxu1 }
 0x2d2   : > { %v693_v41 = vpop.f32.mrb[10].mxu1 }
 0x2d3   : > { %v694_v42 = vpop.f32.mrb[11].mxu1 }
 0x2fc   : > { %v1127_v43 = vpop.f32.mrb[0].mxu0 }
 0x2fd   : > { %v1397_v46 = vadd.f32 %v1127_v43, %v690_v39  ;;  %v1129_v47 = vpop.f32.mrb[1].mxu0 }
 0x2fe   : > { %v1130_v12 = vpop.f32.mrb[2].mxu0 }
 0x2ff   : > { %v1141_v49 = vmul.f32 %v1397_v46, %v1385_v44  ;;  %v1131_v45 = vpop.f32.mrb[3].mxu0 }
 0x301   : > { %v1149_v50 = vadd.f32 %v1386_v48, %v1141_v49 }
 0x303   : > { %v1150_v51 = vpack.c.bf16 %v1149_v50, %v1149_v50 }
 0x305   : > { %1152 = vst.msk [vmem:[%s246_s16] sm:$0xf] %vm1151_vm4, %v1150_v51 }
 0x306 PF: > { %s16_s21 = sadd.s32 1, %s1500_s21  }
 0x307   : > { %p13_p4 = scmp.ge.s32.totalorder %s16_s21, 4  }
 0x309   :  { %15 = sbr.rel (!%p13_p4) target bundleno = 1 (0x1), region = 78 }

// kernel: tile.139
= control target key start
LH: loop header
LB: loop body
LE: loop exit
PB: predicated region body
PF: predicated region fallthrough
CT: control target
= control target key end

     0   :  { %s131_s10 = smov 120   ;;  %s132_s11 = smov 104   ;;  %vm3_vm0 = vcmask 64512   ;;  %vm9_vm1 = vcmask 1048512   ;;  %vm15_vm2 = vcmask 982912   ;;  %vm21_vm3 = vcmask 917312   ;;  %s207_s0 = inlined_call_operand.vmem [shape: f32[16,8], index: 0, kind: input, shape index: {}]   ;;  %s208_s1 = inlined_call_operand.vmem [shape: f32[1,128], index: 1, kind: output, shape index: {}]  }
   0x1   :  { %v101_v0 = vld [vmem:[%s207_s0 + $0xf] sm:$0x1]   ;;  %v103_v1 = vld [vmem:[%s207_s0 + $0xd] sm:$0x1]   ;;  %v102_v2 = vld [vmem:[%s207_s0 + $0xe] sm:$0x1]  }
   0x2   :  { %7 = vrot.lane.b32.xlu0 %v101_v0, %s131_s10  ;;  %19 = vrot.lane.b32.xlu1 %v103_v1, %s132_s11  ;;  %v104_v3 = vld [vmem:[%s207_s0 + $0xc] sm:$0x1]   ;;  %s133_s16 = smov 112   ;;  %s134_s17 = smov 96   ;;  %v105_v4 = vld [vmem:[%s207_s0 + $0xb] sm:$0x1]  }
   0x3   :  { %v106_v5 = vld [vmem:[%s207_s0 + $0xa] sm:$0x1]   ;;  %v2_v6 = vld [vmem:[%s207_s0] sm:$0x1]   ;;  %s135_s24 = smov 88   ;;  %s136_s25 = smov 80  }
   0x4   :  { %4 = vst.msk [vmem:[#allocation0] sm:$0x1] %vm3_vm0, %v2_v6   ;;  %v107_v7 = vld [vmem:[%s207_s0 + $0x9] sm:$0x1]   ;;  %v108_v8 = vld [vmem:[%s207_s0 + $0x8] sm:$0x1]  }
   0x5   :  { %s137_s30 = smov 72   ;;  %s138_s2 = smov 64   ;;  %v109_v9 = vld [vmem:[%s207_s0 + $0x7] sm:$0x1]   ;;  %v110_v10 = vld [vmem:[%s207_s0 + $0x6] sm:$0x1]  }
   0x6   :  { %13 = vrot.lane.b32.xlu0 %v102_v2, %s133_s16  ;;  %25 = vrot.lane.b32.xlu1 %v104_v3, %s134_s17  ;;  %s139_s7 = smov 56   ;;  %s140_s8 = smov 48   ;;  %v111_v11 = vld [vmem:[%s207_s0 + $0x5] sm:$0x1]   ;;  %v112_v12 = vld [vmem:[%s207_s0 + $0x4] sm:$0x1]  }
   0x7   :  { %s141_s13 = smov 40   ;;  %s142_s14 = smov 32   ;;  %v113_v13 = vld [vmem:[%s207_s0 + $0x3] sm:$0x1]   ;;  %v114_v14 = vld [vmem:[%s207_s0 + $0x2] sm:$0x1]  }
   0x8   :  { %s143_s19 = smov 24   ;;  %s144_s20 = smov 16   ;;  %v115_v15 = vld [vmem:[%s207_s0 + $0x1] sm:$0x1]   ;;  %vm27_vm4 = vcmask 851712   ;;  %vm33_vm5 = vcmask 786112  }
   0x9   :  { %s145_s0 = smov 8   ;;  %vm39_vm6 = vcmask 720512   ;;  %vm45_vm7 = vcmask 654912   ;;  %vm51_vm8 = vcmask 589312   ;;  %vm57_vm9 = vcmask 523712  }
   0xa   :  { %31 = vrot.lane.b32.xlu0 %v105_v4, %s135_s24  ;;  %37 = vrot.lane.b32.xlu1 %v106_v5, %s136_s25  ;;  %vm63_vm10 = vcmask 458112   ;;  %vm69_vm11 = vcmask 392512   ;;  %vm75_vm12 = vcmask 326912   ;;  %vm81_vm13 = vcmask 261312  }
   0xb   :  { %vm87_vm14 = vcmask 195712   ;;  %vm93_vm15 = vcmask 130112  }
   0xe   :  { %43 = vrot.lane.b32.xlu0 %v107_v7, %s137_s30  ;;  %49 = vrot.lane.b32.xlu1 %v108_v8, %s138_s2 }
  0x12   :  { %55 = vrot.lane.b32.xlu0 %v109_v9, %s139_s7  ;;  %61 = vrot.lane.b32.xlu1 %v110_v10, %s140_s8 }
  0x16   :  { %67 = vrot.lane.b32.xlu0 %v111_v11, %s141_s13  ;;  %73 = vrot.lane.b32.xlu1 %v112_v12, %s142_s14 }
  0x1a   :  { %79 = vrot.lane.b32.xlu0 %v113_v13, %s143_s19  ;;  %85 = vrot.lane.b32.xlu1 %v114_v14, %s144_s20 }
  0x1e   :  { %91 = vrot.lane.b32.xlu0 %v115_v15, %s145_s0 }
  0x74   :  { %v8_v16 = vpop.permute.xlu0 %7   ;;  %v20_v17 = vpop.permute.xlu1 %19  }
  0x75   :  { %10 = vst.msk [vmem:[#allocation0] sm:$0x1] %vm9_vm1, %v8_v16  }
  0x78   :  { %v14_v18 = vpop.permute.xlu0 %13   ;;  %v26_v19 = vpop.permute.xlu1 %25  }
  0x79   :  { %16 = vst.msk [vmem:[#allocation0] sm:$0x1] %vm15_vm2, %v14_v18  }
  0x7a   :  { %22 = vst.msk [vmem:[#allocation0] sm:$0x1] %vm21_vm3, %v20_v17  }
  0x7b   :  { %28 = vst.msk [vmem:[#allocation0] sm:$0x1] %vm27_vm4, %v26_v19  }
  0x7c   :  { %v32_v20 = vpop.permute.xlu0 %31   ;;  %v38_v21 = vpop.permute.xlu1 %37  }
  0x7d   :  { %34 = vst.msk [vmem:[#allocation0] sm:$0x1] %vm33_vm5, %v32_v20  }
  0x7e   :  { %40 = vst.msk [vmem:[#allocation0] sm:$0x1] %vm39_vm6, %v38_v21  }
  0x80   :  { %v44_v22 = vpop.permute.xlu0 %43   ;;  %v50_v23 = vpop.permute.xlu1 %49  }
  0x81   :  { %46 = vst.msk [vmem:[#allocation0] sm:$0x1] %vm45_vm7, %v44_v22  }
  0x82   :  { %52 = vst.msk [vmem:[#allocation0] sm:$0x1] %vm51_vm8, %v50_v23  }
  0x84   :  { %v56_v24 = vpop.permute.xlu0 %55   ;;  %v62_v25 = vpop.permute.xlu1 %61  }
  0x85   :  { %58 = vst.msk [vmem:[#allocation0] sm:$0x1] %vm57_vm9, %v56_v24  }
  0x86   :  { %64 = vst.msk [vmem:[#allocation0] sm:$0x1] %vm63_vm10, %v62_v25  }
  0x88   :  { %v68_v26 = vpop.permute.xlu0 %67   ;;  %v74_v27 = vpop.permute.xlu1 %73  }
  0x89   :  { %70 = vst.msk [vmem:[#allocation0] sm:$0x1] %vm69_vm11, %v68_v26  }
  0x8a   :  { %76 = vst.msk [vmem:[#allocation0] sm:$0x1] %vm75_vm12, %v74_v27  }
  0x8c   :  { %v80_v28 = vpop.permute.xlu0 %79   ;;  %v86_v29 = vpop.permute.xlu1 %85  }
  0x8d   :  { %82 = vst.msk [vmem:[#allocation0] sm:$0x1] %vm81_vm13, %v80_v28  }
  0x8e   :  { %88 = vst.msk [vmem:[#allocation0] sm:$0x1] %vm87_vm14, %v86_v29  }
  0x90   :  { %v92_v30 = vpop.permute.xlu0 %91  }
  0x91   :  { %94 = vst.msk [vmem:[#allocation0] sm:$0x1] %vm93_vm15, %v92_v30  }
  0x98   :  { %v98_v31 = vld [vmem:[#allocation0] sm:$0x1] }
  0x99   :  { %100 = vst [vmem:[%s208_s1] sm:$0x1] %v98_v31 }

// kernel: tile.148
= control target key start
LH: loop header
LB: loop body
LE: loop exit
PB: predicated region body
PF: predicated region fallthrough
CT: control target
= control target key end

     0   :  { %s28_s0 = inlined_call_operand.vmem [shape: f32[4], index: 0, kind: input, shape index: {}]   ;;  %s29_s1 = inlined_call_operand.vmem [shape: f32[16,4], index: 1, kind: output, shape index: {}]  }
   0x1   :  { %v4_v0 = vld [vmem:[%s28_s0] ss:$0 sm:$0xff] }
   0x2   :  { %5 = vst [vmem:[%s29_s1] sm:$0xff] %v4_v0  ;;  %8 = vst [vmem:[%s29_s1 + $0x8] sm:$0xff] %v4_v0 }

// kernel: tile.149
= control target key start
LH: loop header
LB: loop body
LE: loop exit
PB: predicated region body
PF: predicated region fallthrough
CT: control target
= control target key end

     0   :  { %s131_s10 = smov 60   ;;  %s132_s11 = smov 52   ;;  %vm3_vm0 = vcmask 31744   ;;  %vm9_vm1 = vcmask 523744   ;;  %vm15_vm2 = vcmask 490944   ;;  %vm21_vm3 = vcmask 458144   ;;  %s207_s0 = inlined_call_operand.vmem [shape: f32[16,4], index: 0, kind: input, shape index: {}]   ;;  %s208_s1 = inlined_call_operand.vmem [shape: f32[1,64], index: 1, kind: output, shape index: {}]  }
   0x1   :  { %v101_v0 = vld [vmem:[%s207_s0 + $0xf] sm:$0x1]   ;;  %v103_v1 = vld [vmem:[%s207_s0 + $0xd] sm:$0x1]   ;;  %v102_v2 = vld [vmem:[%s207_s0 + $0xe] sm:$0x1]  }
   0x2   :  { %7 = vrot.lane.b32.xlu0 %v101_v0, %s131_s10  ;;  %19 = vrot.lane.b32.xlu1 %v103_v1, %s132_s11  ;;  %v104_v3 = vld [vmem:[%s207_s0 + $0xc] sm:$0x1]   ;;  %s133_s16 = smov 56   ;;  %s134_s17 = smov 48   ;;  %v105_v4 = vld [vmem:[%s207_s0 + $0xb] sm:$0x1]  }
   0x3   :  { %v106_v5 = vld [vmem:[%s207_s0 + $0xa] sm:$0x1]   ;;  %v2_v6 = vld [vmem:[%s207_s0] sm:$0x1]   ;;  %s135_s24 = smov 44   ;;  %s136_s25 = smov 40  }
   0x4   :  { %4 = vst.msk [vmem:[#allocation0] sm:$0x1] %vm3_vm0, %v2_v6   ;;  %v107_v7 = vld [vmem:[%s207_s0 + $0x9] sm:$0x1]   ;;  %v108_v8 = vld [vmem:[%s207_s0 + $0x8] sm:$0x1]  }
   0x5   :  { %s137_s30 = smov 36   ;;  %s138_s2 = smov 32   ;;  %v109_v9 = vld [vmem:[%s207_s0 + $0x7] sm:$0x1]   ;;  %v110_v10 = vld [vmem:[%s207_s0 + $0x6] sm:$0x1]  }
   0x6   :  { %13 = vrot.lane.b32.xlu0 %v102_v2, %s133_s16  ;;  %25 = vrot.lane.b32.xlu1 %v104_v3, %s134_s17  ;;  %s139_s7 = smov 28   ;;  %s140_s8 = smov 24   ;;  %v111_v11 = vld [vmem:[%s207_s0 + $0x5] sm:$0x1]   ;;  %v112_v12 = vld [vmem:[%s207_s0 + $0x4] sm:$0x1]  }
   0x7   :  { %s141_s13 = smov 20   ;;  %s142_s14 = smov 16   ;;  %v113_v13 = vld [vmem:[%s207_s0 + $0x3] sm:$0x1]   ;;  %v114_v14 = vld [vmem:[%s207_s0 + $0x2] sm:$0x1]  }
   0x8   :  { %s143_s19 = smov 12   ;;  %s144_s20 = smov 8   ;;  %v115_v15 = vld [vmem:[%s207_s0 + $0x1] sm:$0x1]   ;;  %vm27_vm4 = vcmask 425344   ;;  %vm33_vm5 = vcmask 392544  }
   0x9   :  { %s145_s0 = smov 4   ;;  %vm39_vm6 = vcmask 359744   ;;  %vm45_vm7 = vcmask 326944   ;;  %vm51_vm8 = vcmask 294144   ;;  %vm57_vm9 = vcmask 261344  }
   0xa   :  { %31 = vrot.lane.b32.xlu0 %v105_v4, %s135_s24  ;;  %37 = vrot.lane.b32.xlu1 %v106_v5, %s136_s25  ;;  %vm63_vm10 = vcmask 228544   ;;  %vm69_vm11 = vcmask 195744   ;;  %vm75_vm12 = vcmask 162944   ;;  %vm81_vm13 = vcmask 130144  }
   0xb   :  { %vm87_vm14 = vcmask 97344   ;;  %vm93_vm15 = vcmask 64544  }
   0xe   :  { %43 = vrot.lane.b32.xlu0 %v107_v7, %s137_s30  ;;  %49 = vrot.lane.b32.xlu1 %v108_v8, %s138_s2 }
  0x12   :  { %55 = vrot.lane.b32.xlu0 %v109_v9, %s139_s7  ;;  %61 = vrot.lane.b32.xlu1 %v110_v10, %s140_s8 }
  0x16   :  { %67 = vrot.lane.b32.xlu0 %v111_v11, %s141_s13  ;;  %73 = vrot.lane.b32.xlu1 %v112_v12, %s142_s14 }
  0x1a   :  { %79 = vrot.lane.b32.xlu0 %v113_v13, %s143_s19  ;;  %85 = vrot.lane.b32.xlu1 %v114_v14, %s144_s20 }
  0x1e   :  { %91 = vrot.lane.b32.xlu0 %v115_v15, %s145_s0 }
  0x74   :  { %v8_v16 = vpop.permute.xlu0 %7   ;;  %v20_v17 = vpop.permute.xlu1 %19  }
  0x75   :  { %10 = vst.msk [vmem:[#allocation0] sm:$0x1] %vm9_vm1, %v8_v16  }
  0x78   :  { %v14_v18 = vpop.permute.xlu0 %13   ;;  %v26_v19 = vpop.permute.xlu1 %25  }
  0x79   :  { %16 = vst.msk [vmem:[#allocation0] sm:$0x1] %vm15_vm2, %v14_v18  }
  0x7a   :  { %22 = vst.msk [vmem:[#allocation0] sm:$0x1] %vm21_vm3, %v20_v17  }
  0x7b   :  { %28 = vst.msk [vmem:[#allocation0] sm:$0x1] %vm27_vm4, %v26_v19  }
  0x7c   :  { %v32_v20 = vpop.permute.xlu0 %31   ;;  %v38_v21 = vpop.permute.xlu1 %37  }
  0x7d   :  { %34 = vst.msk [vmem:[#allocation0] sm:$0x1] %vm33_vm5, %v32_v20  }
  0x7e   :  { %40 = vst.msk [vmem:[#allocation0] sm:$0x1] %vm39_vm6, %v38_v21  }
  0x80   :  { %v44_v22 = vpop.permute.xlu0 %43   ;;  %v50_v23 = vpop.permute.xlu1 %49  }
  0x81   :  { %46 = vst.msk [vmem:[#allocation0] sm:$0x1] %vm45_vm7, %v44_v22  }
  0x82   :  { %52 = vst.msk [vmem:[#allocation0] sm:$0x1] %vm51_vm8, %v50_v23  }
  0x84   :  { %v56_v24 = vpop.permute.xlu0 %55   ;;  %v62_v25 = vpop.permute.xlu1 %61  }
  0x85   :  { %58 = vst.msk [vmem:[#allocation0] sm:$0x1] %vm57_vm9, %v56_v24  }
  0x86   :  { %64 = vst.msk [vmem:[#allocation0] sm:$0x1] %vm63_vm10, %v62_v25  }
  0x88   :  { %v68_v26 = vpop.permute.xlu0 %67   ;;  %v74_v27 = vpop.permute.xlu1 %73  }
  0x89   :  { %70 = vst.msk [vmem:[#allocation0] sm:$0x1] %vm69_vm11, %v68_v26  }
  0x8a   :  { %76 = vst.msk [vmem:[#allocation0] sm:$0x1] %vm75_vm12, %v74_v27  }
  0x8c   :  { %v80_v28 = vpop.permute.xlu0 %79   ;;  %v86_v29 = vpop.permute.xlu1 %85  }
  0x8d   :  { %82 = vst.msk [vmem:[#allocation0] sm:$0x1] %vm81_vm13, %v80_v28  }
  0x8e   :  { %88 = vst.msk [vmem:[#allocation0] sm:$0x1] %vm87_vm14, %v86_v29  }
  0x90   :  { %v92_v30 = vpop.permute.xlu0 %91  }
  0x91   :  { %94 = vst.msk [vmem:[#allocation0] sm:$0x1] %vm93_vm15, %v92_v30  }
  0x98   :  { %v98_v31 = vld [vmem:[#allocation0] sm:$0x1] }
  0x99   :  { %100 = vst [vmem:[%s208_s1] sm:$0x1] %v98_v31 }

// kernel: forward.13
= control target key start
LH: loop header
LB: loop body
LE: loop exit
PB: predicated region body
PF: predicated region fallthrough
CT: control target
= control target key end

     0   :  { %s1756_s27 = smov 0   ;;  %s2081_s0 = inlined_call_operand.vmem [shape: bf16[2,8,64], index: 0, kind: input, shape index: {}]   ;;  %s2082_s1 = inlined_call_operand.vmem [shape: bf16[20,8], index: 1, kind: input, shape index: {}]   ;;  %s2083_s2 = inlined_call_operand.vmem [shape: bf16[64,160], index: 2, kind: input, shape index: {}]   ;;  %s2084_s3 = inlined_call_operand.vmem [shape: bf16[5,160,128], index: 3, kind: input, shape index: {}]   ;;  %s2085_s4 = inlined_call_operand.vmem [shape: f32[1,128], index: 4, kind: input, shape index: {}]   ;;  %s2086_s5 = inlined_call_operand.vmem [shape: f32[1,128], index: 5, kind: input, shape index: {}]   ;;  %s2087_s6 = inlined_call_operand.vmem [shape: bf16[128,64], index: 6, kind: input, shape index: {}]   ;;  %s2088_s7 = inlined_call_operand.vmem [shape: f32[1,64], index: 7, kind: input, shape index: {}]   ;;  %s2089_s8 = inlined_call_operand.vmem [shape: f32[2,16,64], index: 8, kind: output, shape index: {}]  }
   0x1 LB: > { %s1383_s28 = sadd.s32 4294967295, %s1706_s27   ;;  %p1387_p0 = scmp.ge.s32.totalorder %s1706_s27, 1  ;;  %s1706_s27 = sphi %s1756_s27, %s18_s27  }
   0x2   : > { %p261_p1 = scmp.lt.s32.totalorder %s1706_s27, 3 }
   0x4   : > { %p262_p2 = pnand %p1387_p0, %p261_p1 }
   0x5   : > { %p294_p3 = scmp.lt.s32.totalorder (!%p262_p2), %s1383_s28, 1  ;;  %v1620_v0 = vld [vmem:[%s2082_s1] sm:$0xff] (!%p262_p2)   ;;  %vm316_vm0 = vcmask (!%p262_p2), 64512   ;;  %vm323_vm1 = vcmask (!%p262_p2), 1043456   ;;  %v1625_v3 = vld [vmem:[%s2083_s2 + $0x14] ss:$8 sps:$4 sm:$0xff] (!%p262_p2)  }
   0x6   : > { %265 = sbr.rel (%p262_p2) target bundleno = 1010 (0x3f2), region = 52  ;;  %1570 = vmatprep.mubr.msk.bf16.mxu0 (!%p262_p2), %vm316_vm0, %v1620_v0  ;;  %v1622_v1 = vld [vmem:[%s2083_s2 + $0x4] ss:$8 sps:$4 sm:$0xff] (!%p262_p2)   ;;  %v1624_v2 = vld [vmem:[%s2083_s2] ss:$8 sps:$4 sm:$0xff] (!%p262_p2)   ;;  %v1708_v12 = vmov (!%p262_p2), 0  }
   0x7   : > { %v1621_v4 = vld [vmem:[%s2082_s1 + $0x8] ss:$0 sps:$4 sm:$0x33] (!%p262_p2)   ;;  %432 = vmatprep.subr.bf16.mxu1 (!%p262_p2), %v1622_v1  ;;  %v1627_v5 = vld [vmem:[%s2083_s2 + $0x10] ss:$8 sps:$4 sm:$0xff] (!%p262_p2)   ;;  %464 = vmatprep.mubr.bf16.mxu1 (!%p262_p2), %v1708_v12  ;;  %v1634_v13 = vld [vmem:[%s2084_s3 + $0xa0] sm:$0xff] (!%p262_p2)  }
   0x8   : > { %433 = vmatpush1.bf16.msra.mxu1 (!%p262_p2), %v1624_v2  ;;  %v1628_v7 = vld [vmem:[%s2083_s2 + $0x24] ss:$8 sps:$4 sm:$0xff] (!%p262_p2)   ;;  %v1630_v9 = vld [vmem:[%s2083_s2 + $0x20] ss:$8 sps:$4 sm:$0xff] (!%p262_p2)   ;;  %v1631_v10 = vld [vmem:[%s2083_s2 + $0x34] ss:$8 sps:$4 sm:$0xff] (!%p262_p2)  }
   0x9   : > { %434 = vmatprep.subr.bf16.mxu1 (!%p262_p2), %v1625_v3  ;;  %v1633_v11 = vld [vmem:[%s2083_s2 + $0x30] ss:$8 sps:$4 sm:$0xff] (!%p262_p2)   ;;  %v1636_v14 = vld [vmem:[%s2084_s3 + $0xa8] sm:$0xff] (!%p262_p2)   ;;  %v1642_v17 = vld [vmem:[%s2084_s3 + $0xc0] sm:$0xff] (!%p262_p2)   ;;  %vm425_vm2 = vcmask (!%p262_p2), 523264   ;;  %vm787_vm3 = vcmask (!%p262_p2), 1046528  }
   0xa   : > { %v1638_v15 = vld [vmem:[%s2084_s3 + $0xb0] sm:$0xff] (!%p262_p2)   ;;  %v1640_v16 = vld [vmem:[%s2084_s3 + $0xb8] sm:$0xff] (!%p262_p2)   ;;  %v1644_v18 = vld [vmem:[%s2084_s3 + $0xc8] sm:$0xff] (!%p262_p2)   ;;  %vm1069_vm4 = vcmask (!%p262_p2), 1045504   ;;  %vm614_vm5 = vcmask (!%p262_p2), 261120   ;;  %vm1710_vm8 = vmmov (!%p262_p2), 0  }
   0xb   : > { %v1635_v23 = vld [vmem:[%s2084_s3 + $0x50] sm:$0xff] (!%p262_p2)   ;;  %v1637_v25 = vld [vmem:[%s2084_s3 + $0x58] sm:$0xff] (!%p262_p2)   ;;  %v1639_v26 = vld [vmem:[%s2084_s3 + $0x60] sm:$0xff] (!%p262_p2)   ;;  %vm528_vm6 = vsmask.f32 (!%p262_p2), 7424 }
   0xc   : > { %435 = vmatpush1.bf16.msra.mxu1 (!%p262_p2), %v1627_v5  ;;  %v1641_v28 = vld [vmem:[%s2084_s3 + $0x68] sm:$0xff] (!%p262_p2)   ;;  %v1643_v29 = vld [vmem:[%s2084_s3 + $0x70] sm:$0xff] (!%p262_p2)   ;;  %v1645_v30 = vld [vmem:[%s2084_s3 + $0x78] sm:$0xff] (!%p262_p2)   ;;  %vm922_vm7 = vsmask.f32 (!%p262_p2), 6400 }
   0xd   : > { %s2091_s28 = smov (!%p294_p3, %s1383_s28), 1  ;;  %436 = vmatprep.subr.bf16.mxu1 %v1628_v7  ;;  %v1646_v31 = vld [vmem:[%s2084_s3 + $0xd0] sm:$0xff]   ;;  %v1647_v32 = vld [vmem:[%s2084_s3 + $0x80] sm:$0xff]   ;;  %v1648_v33 = vld [vmem:[%s2084_s3 + $0xd8] sm:$0xff]  }
   0xe   : > { %s1388_s13 = sshll.u32 %s2091_s28, 2  ;;  %v1649_v34 = vld [vmem:[%s2084_s3 + $0x88] sm:$0xff]   ;;  %v1650_v35 = vld [vmem:[%s2084_s3 + $0xe0] sm:$0xff]   ;;  %v1651_v36 = vld [vmem:[%s2084_s3 + $0x90] sm:$0xff]  }
   0xf   : > { %s297_s18 = scalar_lea.vmem %s2081_s0, %s1388_s13  ;;  %v1652_v37 = vld [vmem:[%s2084_s3 + $0xe8] sm:$0xff]   ;;  %v1653_v38 = vld [vmem:[%s2084_s3 + $0x98] sm:$0xff]   ;;  %s1555_s13 = sshll.u32 %s2091_s28, 4 }
  0x10   : > { %v304_v6 = vld [vmem:[%s297_s18] sm:$0xf]  ;;  %437 = vmatpush1.bf16.msra.mxu1 %v1630_v9  ;;  %s302_s16 = scalar_lea.vmem %s2089_s8, %s1555_s13 }
  0x11   : > { %1608 = vmatprep.subr.msk.bf16.mxu0 %vm323_vm1, %v304_v6  ;;  %v325_v8 = vsel %vm323_vm1, %v304_v6, 0  ;;  %438 = vmatprep.subr.bf16.mxu1 %v1631_v10 }
  0x12   : > { %1569 = vmatpush3.bf16.msra.mxu0 %v325_v8 }
  0x13   : > { %858 = vmatprep.subr.bf16.mxu0 %v1708_v12 }
  0x14   : > { %439 = vmatpush1.bf16.msra.mxu1 %v1633_v11 }
  0x15   : > { %1571 = vmatmul.mubr.msk.bf16.vlgmr.msra.gmra.mrb[0].mxu0 %vm316_vm0, %v1621_v4  ;;  %618 = vmatprep.subr.bf16.mxu1 %v1708_v12 }
  0x16   : > { %859 = vmatpush1.bf16.msra.mxu0 %v1634_v13 }
  0x17   : > { %860 = vmatprep.subr.bf16.mxu0 %v1708_v12 }
  0x1a   : > { %861 = vmatpush1.bf16.msra.mxu0 %v1636_v14 }
  0x1b   : > { %862 = vmatprep.subr.bf16.mxu0 %v1708_v12 }
  0x1e   : > { %863 = vmatpush1.bf16.msra.mxu0 %v1638_v15  ;;  %v1654_v15 = vld [vmem:[%s2084_s3 + $0xf0] sm:$0xff]  }
  0x1f   : > { %864 = vmatprep.subr.bf16.mxu0 %v1708_v12 }
  0x22   : > { %865 = vmatpush1.bf16.msra.mxu0 %v1640_v16 }
  0x23   : > { %866 = vmatprep.subr.bf16.mxu0 %v1708_v12 }
  0x26   : > { %867 = vmatpush1.bf16.msra.mxu0 %v1642_v17 }
  0x27   : > { %868 = vmatprep.subr.bf16.mxu0 %v1708_v12 }
  0x2a   : > { %869 = vmatpush1.bf16.msra.mxu0 %v1644_v18 }
  0x2b   : > { %870 = vmatprep.subr.bf16.mxu0 %v1708_v12 }
  0x2e   : > { %871 = vmatpush1.bf16.msra.mxu0 %v1646_v31 }
  0x2f   : > { %872 = vmatprep.subr.bf16.mxu0 %v1708_v12 }
  0x32   : > { %873 = vmatpush1.bf16.msra.mxu0 %v1648_v33  ;;  %v1657_v33 = vld [vmem:[%s2084_s3 + $0x8] sm:$0xff]  }
  0x33   : > { %874 = vmatprep.subr.bf16.mxu0 %v1708_v12 }
  0x36   : > { %875 = vmatpush1.bf16.msra.mxu0 %v1650_v35  ;;  %v1659_v35 = vld [vmem:[%s2084_s3 + $0x10] sm:$0xff]  }
  0x37   : > { %876 = vmatprep.subr.bf16.mxu0 %v1708_v12 }
  0x3a   : > { %877 = vmatpush1.bf16.msra.mxu0 %v1652_v37  ;;  %v1661_v37 = vld [vmem:[%s2084_s3 + $0x18] sm:$0xff]  }
  0x3b   : > { %1005 = vmatprep.subr.bf16.mxu0 %v1708_v12 }
  0xe8   : > { %v1572_v19 = vpop.f32.mrb[0].mxu0 }
  0xe9   : > { %v361_v20 = vpop.f32.mrb[1].mxu0  ;;  %v376_v27 = vpack.c.bf16 %v1572_v19, %v1572_v19 }
  0xea   : > { %v1573_v21 = vpop.f32.mrb[2].mxu0 }
  0xeb   : > { %v364_v22 = vpop.f32.mrb[3].mxu0 }
  0xec   : > { %v375_v24 = vpack.c.bf16 %v364_v22, %v361_v20 }
  0xee   : > { %1403 = vmatmul.mubr.msk.bf16.vlgmr.msra.gmra.mrb[0].mxu1 %vm425_vm2, %v375_v24 }
  0xef   : > { %474 = vmatprep.mubr.bf16.mxu1 %v1708_v12  ;;  %619 = vmatpush1.bf16.msra.mxu1 %v1635_v23  ;;  %v1655_v23 = vld [vmem:[%s2084_s3] sm:$0xff]  }
  0xf0   : > { %620 = vmatprep.subr.bf16.mxu1 %v1708_v12 }
  0xf3   : > { %621 = vmatpush1.bf16.msra.mxu1 %v1637_v25 }
  0xf4   : > { %622 = vmatprep.subr.bf16.mxu1 %v1708_v12 }
  0xf6   : > { %1404 = vmatmul.mubr.msk.bf16.gmra.mrb[4].mxu1 %vm425_vm2, %v376_v27 }
  0xf7   : > { %623 = vmatpush1.bf16.msra.mxu1 %v1639_v26 }
  0xf8   : > { %624 = vmatprep.subr.bf16.mxu1 %v1708_v12 }
  0xfb   : > { %625 = vmatpush1.bf16.msra.mxu1 %v1641_v28 }
  0xfc   : > { %626 = vmatprep.subr.bf16.mxu1 %v1708_v12 }
  0xff   : > { %627 = vmatpush1.bf16.msra.mxu1 %v1643_v29 }
 0x100   : > { %628 = vmatprep.subr.bf16.mxu1 %v1708_v12 }
 0x103   : > { %629 = vmatpush1.bf16.msra.mxu1 %v1645_v30  ;;  %v1656_v30 = vld [vmem:[%s2084_s3 + $0xf8] sm:$0xff]  }
 0x104   : > { %630 = vmatprep.subr.bf16.mxu1 %v1708_v12 }
 0x107   : > { %631 = vmatpush1.bf16.msra.mxu1 %v1647_v32 }
 0x108   : > { %632 = vmatprep.subr.bf16.mxu1 %v1708_v12 }
 0x10b   : > { %633 = vmatpush1.bf16.msra.mxu1 %v1649_v34  ;;  %v1658_v34 = vld [vmem:[%s2084_s3 + $0x100] sm:$0xff]  }
 0x10c   : > { %634 = vmatprep.subr.bf16.mxu1 %v1708_v12 }
 0x10f   : > { %635 = vmatpush1.bf16.msra.mxu1 %v1651_v36  ;;  %v1660_v36 = vld [vmem:[%s2084_s3 + $0x108] sm:$0xff]  }
 0x110   : > { %636 = vmatprep.subr.bf16.mxu1 %v1708_v12 }
 0x113   : > { %637 = vmatpush1.bf16.msra.mxu1 %v1653_v38  ;;  %v1662_v38 = vld [vmem:[%s2084_s3 + $0x110] sm:$0xff]  }
 0x114   : > { %721 = vmatprep.subr.bf16.mxu1 %v1708_v12 }
 0x1c1   : > { %v466_v39 = vpop.f32.mrb[0].mxu1 }
 0x1c2   : > { %v468_v40 = vpop.f32.mrb[1].mxu1 }
 0x1c3   : > { %v470_v41 = vpop.f32.mrb[2].mxu1 }
 0x1c4   : > { %v1888_v42 = vpack.c.bf16 %v470_v41, %v466_v39  ;;  %v472_v43 = vpop.f32.mrb[3].mxu1  ;;  %v1663_v39 = vld [vmem:[%s2084_s3 + $0x20] sm:$0xff]   ;;  %v1665_v41 = vld [vmem:[%s2084_s3 + $0x28] sm:$0xff]  }
 0x1c5   : > { %v1890_v44 = vpack.c.bf16 %v472_v43, %v468_v40  ;;  %v1664_v40 = vld [vmem:[%s2084_s3 + $0x118] sm:$0xff]   ;;  %v1666_v43 = vld [vmem:[%s2084_s3 + $0x120] sm:$0xff]  }
 0x1c6   : > { %v532_v45 = vshll.u32 %v1888_v42, 16  ;;  %v530_v46 = vshrl.u32 %v1888_v42, 16  ;;  %v788_v54 = vrot.slane %v1888_v42, 1  ;;  %v1070_v56 = vrot.slane %v1888_v42, 2 }
 0x1c7   : > { %v542_v47 = vshrl.u32 %v1890_v44, 16  ;;  %v544_v48 = vshll.u32 %v1890_v44, 16  ;;  %v791_v53 = vrot.slane %v1890_v44, 1  ;;  %v1073_v61 = vrot.slane %v1890_v44, 2 }
 0x1c8   : > { %v534_v49 = vrot.slane %v532_v45, 1  ;;  %v923_v50 = vrot.slane %v530_v46, 1  ;;  %v924_v51 = vrot.slane %v532_v45, 2  ;;  %v1668_v45 = vld [vmem:[%s2084_s3 + $0x128] sm:$0xff]  }
 0x1c9   : > { %v476_v52 = vpop.f32.mrb[4].mxu1  ;;  %v546_v55 = vrot.slane %v544_v48, 1  ;;  %v932_v59 = vrot.slane %v542_v47, 1  ;;  %v933_v60 = vrot.slane %v544_v48, 2  ;;  %v1671_v48 = vld [vmem:[%s2084_s3 + $0x40] sm:$0xff]  }
 0x1ca   : > { %v485_v57 = vpack.c.bf16 %v476_v52, %v476_v52  ;;  %v478_v58 = vpop.f32.mrb[5].mxu1  ;;  %v535_v1 = vor.u32 %v534_v49, %v530_v46  ;;  %v925_v2 = vor.u32 %v924_v51, %v923_v50  ;;  %v1669_v46 = vld [vmem:[%s2084_s3 + $0x38] sm:$0xff]   ;;  %v1673_v50 = vld [vmem:[%s2084_s3 + $0x48] sm:$0xff]   ;;  %v1674_v51 = vld [vmem:[%s2084_s3 + $0x140] sm:$0xff]  }
 0x1cb   : > { %v486_v62 = vpack.c.bf16 %v478_v58, %v478_v58  ;;  %v480_v63 = vpop.f32.mrb[6].mxu1  ;;  %v547_v0 = vor.u32 %v546_v55, %v542_v47  ;;  %v934_v28 = vor.u32 %v933_v60, %v932_v59  ;;  %v1670_v47 = vld [vmem:[%s2084_s3 + $0x130] sm:$0xff]   ;;  %v1672_v49 = vld [vmem:[%s2084_s3 + $0x138] sm:$0xff]   ;;  %v1675_v52 = vld [vmem:[%s2084_s3 + $0x148] sm:$0xff]  }
 0x1cc   : > { %v537_v3 = vshll.u32 %v485_v57, 16  ;;  %v926_v4 = vshrl.u32 %v485_v57, 16  ;;  %v481_v5 = vpop.f32.mrb[7].mxu1  ;;  %v789_v6 = vrot.slane %v485_v57, 1  ;;  %v1071_v7 = vrot.slane %v485_v57, 2  ;;  %v1679_v55 = vld [vmem:[%s2084_s3 + $0x168] sm:$0xff]  }
 0x1cd   : > { %v549_v8 = vshll.u32 %v486_v62, 16  ;;  %v935_v9 = vshrl.u32 %v486_v62, 16  ;;  %v792_v10 = vrot.slane %v486_v62, 1  ;;  %v1074_v11 = vrot.slane %v486_v62, 2  ;;  %v1681_v57 = vld [vmem:[%s2084_s3 + $0x178] sm:$0xff]   ;;  %v1682_v58 = vld [vmem:[%s2084_s3 + $0x180] sm:$0xff]  }
 0x1ce   : > { %v928_v13 = vrot.slane %v926_v4, 1  ;;  %v790_v14 = vsel %vm787_vm3, %v788_v54, %v789_v6  ;;  %v539_v16 = vrot.slane %v537_v3, 1  ;;  %v929_v17 = vrot.slane %v537_v3, 2  ;;  %v1677_v54 = vld [vmem:[%s2084_s3 + $0x158] sm:$0xff]   ;;  %v1683_v59 = vld [vmem:[%s2084_s3 + $0x188] sm:$0xff]   ;;  %v1684_v60 = vld [vmem:[%s2087_s6] sm:$0xff]  }
 0x1cf   : > { %v937_v18 = vrot.slane %v935_v9, 1  ;;  %v793_v19 = vsel %vm787_vm3, %v791_v53, %v792_v10  ;;  %v551_v20 = vrot.slane %v549_v8, 1  ;;  %v938_v21 = vrot.slane %v549_v8, 2  ;;  %v1676_v53 = vld [vmem:[%s2084_s3 + $0x150] sm:$0xff]   ;;  %v1685_v62 = vld [vmem:[%s2087_s6 + $0x8] sm:$0xff]   ;;  %v1687_v63 = vld [vmem:[%s2087_s6 + $0x18] sm:$0xff]  }
 0x1d0   : > { %1477 = vmatprep.mubr.msk.bf16.mxu0 %vm614_vm5, %v793_v19  ;;  %v540_v22 = vsel %vm528_vm6, %v535_v1, %v539_v16  ;;  %v930_v24 = vor.u32 %v929_v17, %v928_v13  ;;  %v1911_v25 = vsel %vm1069_vm4, %v1073_v61, %v1074_v11  ;;  %v1914_v26 = vsel %vm1069_vm4, %v1070_v56, %v1071_v7  ;;  %v1680_v56 = vld [vmem:[%s2084_s3 + $0x170] sm:$0xff]   ;;  %v1689_v1 = vld [vmem:[%s2087_s6 + $0x28] sm:$0xff]   ;;  %v1691_v3 = vld [vmem:[%s2087_s6 + $0x38] sm:$0xff]  }
 0x1d1   : > { %891 = vmatmul.mubr.bf16.vlgmr.msra.gmra.mrb[4].mxu0 %v790_v14  ;;  %v552_v27 = vsel %vm528_vm6, %v547_v0, %v551_v20  ;;  %v939_v29 = vor.u32 %v938_v21, %v937_v18  ;;  %v1709_v61 = vmov 0.0   ;;  %v1688_v0 = vld [vmem:[%s2087_s6 + $0x20] sm:$0xff]  }
 0x1d2   : > { %1006 = vmatpush1.bf16.msra.mxu0 %v1654_v15  ;;  %1435 = vmatprep.mubr.msk.bf16.mxu1 %vm614_vm5, %v552_v27  ;;  %v931_v31 = vsel %vm922_vm7, %v925_v2, %v930_v24  ;;  %v1690_v2 = vld [vmem:[%s2087_s6 + $0x30] sm:$0xff]   ;;  %v1540_v9 = vld [vmem:[%s2085_s4] ss:$0 sm:$0xff] }
 0x1d3   : > { %651 = vmatmul.mubr.bf16.vlgmr.msra.gmra.mrb[8].mxu1 %v540_v22  ;;  %1007 = vmatprep.subr.bf16.mxu0 %v1708_v12  ;;  %v940_v32 = vsel %vm922_vm7, %v934_v28, %v939_v29  ;;  %v1541_v17 = vld [vmem:[%s2086_s5] ss:$0 sm:$0xff] }
 0x1d4   : > { %722 = vmatpush1.bf16.msra.mxu1 %v1655_v23  ;;  %1446 = vmatprep.mubr.msk.bf16.mxu1 %vm614_vm5, %v1890_v44  ;;  %v1667_v44 = vld [vmem:[%s2084_s3 + $0x30] sm:$0xff]   ;;  %v1542_v22 = vld [vmem:[%s2088_s7] ss:$0 sm:$0xff] }
 0x1d5   : > { %1508 = vmatprep.mubr.msk.bf16.mxu0 %vm614_vm5, %v940_v32  ;;  %723 = vmatprep.subr.bf16.mxu1 %v1708_v12 }
 0x1d6   : > { %1008 = vmatpush1.bf16.msra.mxu0 %v1656_v30 }
 0x1d7   : > { %1009 = vmatprep.subr.bf16.mxu0 %v1708_v12 }
 0x1d8   : > { %724 = vmatpush1.bf16.msra.mxu1 %v1657_v33 }
 0x1d9   : > { %725 = vmatprep.subr.bf16.mxu1 %v1708_v12 }
 0x1da   : > { %1010 = vmatpush1.bf16.msra.mxu0 %v1658_v34 }
 0x1db   : > { %1011 = vmatprep.subr.bf16.mxu0 %v1708_v12 }
 0x1dc   : > { %726 = vmatpush1.bf16.msra.mxu1 %v1659_v35 }
 0x1dd   : > { %727 = vmatprep.subr.bf16.mxu1 %v1708_v12 }
 0x1de   : > { %1012 = vmatpush1.bf16.msra.mxu0 %v1660_v36 }
 0x1df   : > { %1013 = vmatprep.subr.bf16.mxu0 %v1708_v12 }
 0x1e0   : > { %728 = vmatpush1.bf16.msra.mxu1 %v1661_v37 }
 0x1e1   : > { %729 = vmatprep.subr.bf16.mxu1 %v1708_v12 }
 0x1e2   : > { %1014 = vmatpush1.bf16.msra.mxu0 %v1662_v38 }
 0x1e3   : > { %1015 = vmatprep.subr.bf16.mxu0 %v1708_v12 }
 0x1e4   : > { %730 = vmatpush1.bf16.msra.mxu1 %v1663_v39 }
 0x1e5   : > { %731 = vmatprep.subr.bf16.mxu1 %v1708_v12 }
 0x1e6   : > { %1016 = vmatpush1.bf16.msra.mxu0 %v1664_v40 }
 0x1e7   : > { %1017 = vmatprep.subr.bf16.mxu0 %v1708_v12 }
 0x1e8   : > { %732 = vmatpush1.bf16.msra.mxu1 %v1665_v41 }
 0x1e9   : > { %733 = vmatprep.subr.bf16.mxu1 %v1708_v12 }
 0x1ea   : > { %1018 = vmatpush1.bf16.msra.mxu0 %v1666_v43 }
 0x1eb   : > { %1019 = vmatprep.subr.bf16.mxu0 %v1708_v12 }
 0x1ec   : > { %734 = vmatpush1.bf16.msra.mxu1 %v1667_v44 }
 0x1ed   : > { %735 = vmatprep.subr.bf16.mxu1 %v1708_v12 }
 0x1ee   : > { %1020 = vmatpush1.bf16.msra.mxu0 %v1668_v45 }
 0x1ef   : > { %1021 = vmatprep.subr.bf16.mxu0 %v1708_v12 }
 0x1f0   : > { %736 = vmatpush1.bf16.msra.mxu1 %v1669_v46 }
 0x1f1   : > { %737 = vmatprep.subr.bf16.mxu1 %v1708_v12 }
 0x1f2   : > { %1022 = vmatpush1.bf16.msra.mxu0 %v1670_v47 }
 0x1f3   : > { %1023 = vmatprep.subr.bf16.mxu0 %v1708_v12 }
 0x1f4   : > { %738 = vmatpush1.bf16.msra.mxu1 %v1671_v48 }
 0x1f5   : > { %739 = vmatprep.subr.bf16.mxu1 %v1708_v12 }
 0x1f6   : > { %1024 = vmatpush1.bf16.msra.mxu0 %v1672_v49 }
 0x1f7   : > { %1140 = vmatprep.subr.bf16.mxu0 %v1708_v12 }
 0x1f8   : > { %740 = vmatpush1.bf16.msra.mxu1 %v1673_v50 }
 0x1f9   : > { %1038 = vmatmul.mubr.bf16.vlgmr.msra.gmra.mrb[4].mxu0 %v931_v31  ;;  %1574 = vmatprep.subr.bf16.mxu1 %v1709_v61 }
 0x1fa   : > { %1141 = vmatpush1.bf16.msra.mxu0 %v1674_v51  ;;  %1539 = vmatprep.mubr.msk.bf16.mxu0 %vm614_vm5, %v1911_v25 }
 0x1fb   : > { %754 = vmatmul.mubr.bf16.vlgmr.msra.gmra.mrb[8].mxu1 %v1888_v42  ;;  %1142 = vmatprep.subr.bf16.mxu0 %v1708_v12  ;;  %v1678_v42 = vld [vmem:[%s2084_s3 + $0x160] sm:$0xff]  }
 0x1fc   : > { %1575 = vmatpush3.bf16.msra.mxu1 %v1684_v60  ;;  %1590 = vmatprep.mubr.msk.bf16.mxu1 %vm1710_vm8, %v1709_v61 }
 0x1fd   : > { %1576 = vmatprep.subr.bf16.mxu1 %v1709_v61 }
 0x1fe   : > { %1143 = vmatpush1.bf16.msra.mxu0 %v1675_v52 }
 0x1ff   : > { %1144 = vmatprep.subr.bf16.mxu0 %v1708_v12 }
 0x200   : > { %1577 = vmatpush3.bf16.msra.mxu1 %v1685_v62 }
 0x201   : > { %1578 = vmatprep.subr.bf16.mxu1 %v1709_v61 }
 0x202   : > { %1145 = vmatpush1.bf16.msra.mxu0 %v1676_v53 }
 0x203   : > { %1146 = vmatprep.subr.bf16.mxu0 %v1708_v12 }
 0x206   : > { %1147 = vmatpush1.bf16.msra.mxu0 %v1677_v54 }
 0x207   : > { %1148 = vmatprep.subr.bf16.mxu0 %v1708_v12 }
 0x20a   : > { %1149 = vmatpush1.bf16.msra.mxu0 %v1678_v42 }
 0x20b   : > { %1150 = vmatprep.subr.bf16.mxu0 %v1708_v12 }
 0x20e   : > { %1151 = vmatpush1.bf16.msra.mxu0 %v1679_v55 }
 0x20f   : > { %1152 = vmatprep.subr.bf16.mxu0 %v1708_v12 }
 0x212   : > { %1153 = vmatpush1.bf16.msra.mxu0 %v1680_v56 }
 0x213   : > { %1154 = vmatprep.subr.bf16.mxu0 %v1708_v12 }
 0x216   : > { %1155 = vmatpush1.bf16.msra.mxu0 %v1681_v57 }
 0x217   : > { %1156 = vmatprep.subr.bf16.mxu0 %v1708_v12 }
 0x21a   : > { %1157 = vmatpush1.bf16.msra.mxu0 %v1682_v58 }
 0x21b   : > { %1158 = vmatprep.subr.bf16.mxu0 %v1708_v12  ;;  %v1686_v12 = vld [vmem:[%s2087_s6 + $0x10] sm:$0xff]  }
 0x21c   : > { %1579 = vmatpush3.bf16.msra.mxu1 %v1686_v12 }
 0x21d   : > { %1580 = vmatprep.subr.bf16.mxu1 %v1709_v61 }
 0x21e   : > { %1159 = vmatpush1.bf16.msra.mxu0 %v1683_v59 }
 0x220   : > { %1581 = vmatpush3.bf16.msra.mxu1 %v1687_v63 }
 0x221   : > { %1173 = vmatmul.mubr.bf16.vlgmr.msra.gmra.mrb[4].mxu0 %v1914_v26  ;;  %1582 = vmatprep.subr.bf16.mxu1 %v1709_v61 }
 0x224   : > { %1583 = vmatpush3.bf16.msra.mxu1 %v1688_v0 }
 0x225   : > { %1584 = vmatprep.subr.bf16.mxu1 %v1709_v61 }
 0x228   : > { %1585 = vmatpush3.bf16.msra.mxu1 %v1689_v1 }
 0x229   : > { %1586 = vmatprep.subr.bf16.mxu1 %v1709_v61 }
 0x22c   : > { %1587 = vmatpush3.bf16.msra.mxu1 %v1690_v2 }
 0x22d   : > { %1588 = vmatprep.subr.bf16.mxu1 %v1709_v61 }
 0x230   : > { %1589 = vmatpush3.bf16.msra.mxu1 %v1691_v3 }
 0x2ce   : > { %v755_v4 = vpop.f32.mrb[8].mxu1 }
 0x2cf   : > { %v757_v5 = vpop.f32.mrb[9].mxu1 }
 0x2d0   : > { %v758_v6 = vpop.f32.mrb[10].mxu1 }
 0x2d1   : > { %v760_v7 = vpop.f32.mrb[11].mxu1 }
 0x2f4   : > { %v1174_v8 = vpop.f32.mrb[4].mxu0 }
 0x2f5   : > { %v1594_v10 = vadd.f32 %v1174_v8, %v755_v4  ;;  %v1176_v11 = vpop.f32.mrb[5].mxu0 }
 0x2f6   : > { %v1177_v13 = vpop.f32.mrb[6].mxu0 }
 0x2f7   : > { %v1190_v14 = vmul.f32 %v1594_v10, %v1540_v9  ;;  %v1595_v15 = vadd.f32 %v1177_v13, %v758_v6  ;;  %v1179_v16 = vpop.f32.mrb[7].mxu0 }
 0x2f9   : > { %v1191_v18 = vmul.f32 %v1595_v15, %v1540_v9  ;;  %v1199_v19 = vadd.f32 %v1541_v17, %v1190_v14 }
 0x2fb   : > { %v1200_v20 = vadd.f32 %v1541_v17, %v1191_v18 }
 0x2fd   : > { %v1201_v21 = vpack.c.bf16 %v1200_v20, %v1199_v19 }
 0x2ff   : > { %1591 = vmatmul.mubr.bf16.vlgmr.msra.gmra.mrb[12].mxu1 %v1201_v21 }
 0x3d2   : > { %v1307_v23 = vpop.f32.mrb[12].mxu1 }
 0x3d3   : > { %v1308_v24 = vadd.f32 %v1542_v22, %v1307_v23  ;;  %v1592_v25 = vpop.f32.mrb[13].mxu1 }
 0x3d4   : > { %v1310_v26 = vpop.f32.mrb[14].mxu1 }
 0x3d5   : > { %v1551_v27 = vmul.f32 -1.442695, %v1308_v24  ;;  %v1311_v28 = vadd.f32 %v1542_v22, %v1310_v26  ;;  %v1593_v29 = vpop.f32.mrb[15].mxu1 }
 0x3d7   : > { %1692 = vpow2.f32 %v1551_v27  ;;  %v1552_v30 = vmul.f32 -1.442695, %v1311_v28 }
 0x3d9   : > { %1694 = vpow2.f32 %v1552_v30 }
 0x3e1   : > { %v1693_v31 = vpop.eup %1692 }
 0x3e2   : > { %v1320_v32 = vadd.f32 1.0, %v1693_v31 }
 0x3e3   : > { %v1695_v33 = vpop.eup %1694 }
 0x3e4   : > { %1696 = vrcp.f32 %v1320_v32  ;;  %v1321_v34 = vadd.f32 1.0, %v1695_v33 }
 0x3e6   : > { %1698 = vrcp.f32 %v1321_v34 }
 0x3ee   : > { %v1697_v35 = vpop.eup %1696 }
 0x3ef   : > { %1326 = vst.msk [vmem:[%s302_s16] sm:$0xff] %vm425_vm2, %v1697_v35 }
 0x3f0   : > { %v1699_v36 = vpop.eup %1698 }
 0x3f1   : > { %1327 = vst.msk [vmem:[%s302_s16 + $0x8] sm:$0xff] %vm425_vm2, %v1699_v36 }
 0x3f2 PF: > { %s18_s27 = sadd.s32 1, %s1706_s27  }
 0x3f3   : > { %p15_p4 = scmp.ge.s32.totalorder %s18_s27, 4  }
 0x3f5   :  { %17 = sbr.rel (!%p15_p4) target bundleno = 1 (0x1), region = 86 }

</bundles_post_ra>
